<compile_context>
chip_gen: v7x
topology: tpu7x:2x2x1
jax: 0.10.0
libtpu: 0.0.40
codegen_flags: <defaults>
</compile_context>

<pallas_src>
import functools

import jax
import jax.numpy as jnp
from jax.experimental import pallas as pl
from jax.experimental.pallas import tpu as pltpu

BN_EPS = 1e-5
LEAKY_SLOPE = 0.2          # module spec: nn.LeakyReLU(0.2)
LANE = 128
VMEM_LIMIT = 48 * 1024 * 1024


def _round_up(x, m):
    return ((x + m - 1) // m) * m


def _pick_tile_h(H, W, cap=512):
    """Largest even divisor of H with tile_h*W <= cap (keeps tile_M ~256-512)."""
    cands = [th for th in range(2, H + 1, 2) if H % th == 0]
    if not cands:
        return H
    fitting = [th for th in cands if th * W <= cap]
    return max(fitting) if fitting else min(cands)


# ---------------------------------------------------------------------------
# Pass 1: packed conv + bias, emitting ONLY per-tile BN partial sums (sum, sumsq).
#   x_ref     : (1, th, W, K)   bf16   tap-packed im2col tile (K = 9*Cin padded to 128)
#   w_ref     : (K, Co)         bf16   tap-packed weights
#   b_ref     : (1, Co)         f32
#   stats_ref : (1, 1, 2, Co)   f32
# ---------------------------------------------------------------------------
def conv_stats_kernel(x_ref, w_ref, b_ref, stats_ref):
    _, th, w_, k = x_ref.shape
    x = x_ref[0].reshape(th * w_, k)
    y = jnp.dot(x, w_ref[...], preferred_element_type=jnp.float32) + b_ref[...]
    s = jnp.sum(y, axis=0, keepdims=True)          # (1, Co)
    sq = jnp.sum(y * y, axis=0, keepdims=True)     # (1, Co)
    stats_ref[...] = jnp.concatenate([s, sq], axis=0)[None, None]


# ---------------------------------------------------------------------------
# Pass 2a (block 1): recompute conv, apply BN affine + LeakyReLU, store only the
# real output channels (bf16) to feed the next conv's im2col.
# ---------------------------------------------------------------------------
def conv_bn_lrelu_kernel(x_ref, w_ref, b_ref, scale_ref, shift_ref, c_ref):
    _, th, w_, k = x_ref.shape
    co_real = c_ref.shape[-1]
    x = x_ref[0].reshape(th * w_, k)
    y = jnp.dot(x, w_ref[...], preferred_element_type=jnp.float32) + b_ref[...]
    z = y * scale_ref[...] + shift_ref[...]
    c = jnp.where(z > 0, z, LEAKY_SLOPE * z)
    c_ref[0] = c.reshape(th, w_, -1)[:, :, :co_real].astype(c_ref.dtype)


# ---------------------------------------------------------------------------
# Pass 2b (block 2): same as above + fused 2x2 MaxPool + inverted dropout.
# Keep-mask is exact 0/1 bf16; the 1/(1-p) scale is a compile-time constant.
# ---------------------------------------------------------------------------
def conv_bn_lrelu_pool_drop_kernel(x_ref, w_ref, b_ref, scale_ref, shift_ref,
                                   mask_ref, c_ref, p_ref, *, inv_keep):
    _, th, w_, k = x_ref.shape
    co = w_ref.shape[-1]
    co_real = c_ref.shape[-1]
    x = x_ref[0].reshape(th * w_, k)
    y = jnp.dot(x, w_ref[...], preferred_element_type=jnp.float32) + b_ref[...]
    z = y * scale_ref[...] + shift_ref[...]
    c = jnp.where(z > 0, z, LEAKY_SLOPE * z).reshape(th, w_, co)
    c_ref[0] = c[:, :, :co_real].astype(c_ref.dtype)
    # 2x2 max pool: rows first (major axis), then columns (sublane axis).
    r = jnp.max(c.reshape(th // 2, 2, w_, co), axis=1)          # (th/2, W, Co)
    p = jnp.max(r.reshape(th // 2, w_ // 2, 2, co), axis=2)     # (th/2, W/2, Co)
    drop = p[:, :, :co_real] * mask_ref[0].astype(jnp.float32) * inv_keep
    p_ref[0] = drop.astype(p_ref.dtype)


# ---------------------------------------------------------------------------
# Host glue
# ---------------------------------------------------------------------------
def _im2col_3x3(x_nhwc, k_pad):
    """(N,H,W,C) -> (N,H,W,k_pad) bf16: the 9 taps of a 3x3 SAME conv packed into lanes.

    For 9*C <= 128 this costs the same HBM bytes as channel-padding C -> 128 would,
    so there is no im2col inflation and no separate halo materialization.
    """
    N, H, W, C = x_nhwc.shape
    xp = jnp.pad(x_nhwc, ((0, 0), (1, 1), (1, 1), (0, 0)))
    taps = [xp[:, dy:dy + H, dx:dx + W, :] for dy in range(3) for dx in range(3)]
    packed = jnp.concatenate(taps, axis=-1)                      # (N,H,W,9C)
    packed = jnp.pad(packed, ((0, 0), (0, 0), (0, 0), (0, k_pad - 9 * C)))
    # TODO(synk): for large channel counts (9*C >> 128) this duplicates the input ~9x in HBM;
    # switch back to a halo-tiled multi-dot path (or manual-DMA halo fetch) in that regime.
    return packed.astype(jnp.bfloat16)


def _pack_conv_params(w, b, g, be, k_pad, co_pad):
    """HWIO 3x3 weights -> tap-packed (k_pad, co_pad) bf16; bias/BN params padded f32."""
    kh, kw, cin, cout = w.shape
    w_flat = w.reshape(kh * kw * cin, cout).astype(jnp.float32)
    wp = jnp.zeros((k_pad, co_pad), jnp.float32).at[:kh * kw * cin, :cout].set(w_flat)
    bp = jnp.zeros((1, co_pad), jnp.float32).at[:, :cout].set(b)
    gp = jnp.zeros((co_pad,), jnp.float32).at[:cout].set(g)
    bep = jnp.zeros((co_pad,), jnp.float32).at[:cout].set(be)
    return wp.astype(jnp.bfloat16), bp, gp, bep


def _conv_stats(xp, wp, bp, *, tile_h):
    N, H, W, K = xp.shape
    Co = wp.shape[-1]
    T = H // tile_h
    return pl.pallas_call(
        conv_stats_kernel,
        out_shape=jax.ShapeDtypeStruct((N, T, 2, Co), jnp.float32),
        grid=(N, T),
        in_specs=[
            pl.BlockSpec((1, tile_h, W, K), lambda n, t: (n, t, 0, 0)),
            pl.BlockSpec((K, Co), lambda n, t: (0, 0)),
            pl.BlockSpec((1, Co), lambda n, t: (0, 0)),
        ],
        out_specs=pl.BlockSpec((1, 1, 2, Co), lambda n, t: (n, t, 0, 0)),
        compiler_params=pltpu.CompilerParams(
            dimension_semantics=("parallel", "parallel"),
            vmem_limit_bytes=VMEM_LIMIT),
    )(xp, wp, bp)


def _bn_scale_shift(stats, gamma_p, beta_p, count):
    """Finalize BN batch stats: scale = g*rsqrt(var+eps), shift = b - mean*scale."""
    s = jnp.sum(stats, axis=(0, 1))                              # (2, Co)
    mean = s[0] / count
    # TODO(synk): E[x^2]-E[x]^2 in f32 can cancel for very large N*H*W; use per-tile centering then.
    var = jnp.maximum(s[1] / count - mean * mean, 0.0)           # biased var (torch training BN)
    scale = gamma_p * jax.lax.rsqrt(var + BN_EPS)
    shift = beta_p - mean * scale
    return scale.reshape(1, -1).astype(jnp.float32), shift.reshape(1, -1).astype(jnp.float32)


def _finalize_block1(xp, wp, bp, scale, shift, co_real, *, tile_h, out_dtype):
    N, H, W, K = xp.shape
    Co = wp.shape[-1]
    T = H // tile_h
    return pl.pallas_call(
        conv_bn_lrelu_kernel,
        out_shape=jax.ShapeDtypeStruct((N, H, W, co_real), out_dtype),
        grid=(N, T),
        in_specs=[
            pl.BlockSpec((1, tile_h, W, K), lambda n, t: (n, t, 0, 0)),
            pl.BlockSpec((K, Co), lambda n, t: (0, 0)),
            pl.BlockSpec((1, Co), lambda n, t: (0, 0)),
            pl.BlockSpec((1, Co), lambda n, t: (0, 0)),
            pl.BlockSpec((1, Co), lambda n, t: (0, 0)),
        ],
        out_specs=pl.BlockSpec((1, tile_h, W, co_real), lambda n, t: (n, t, 0, 0)),
        compiler_params=pltpu.CompilerParams(
            dimension_semantics=("parallel", "parallel"),
            vmem_limit_bytes=VMEM_LIMIT),
    )(xp, wp, bp, scale, shift)


def _finalize_block2(xp, wp, bp, scale, shift, mask, co_real, p_drop, *, tile_h):
    N, H, W, K = xp.shape
    Co = wp.shape[-1]
    T = H // tile_h
    kern = functools.partial(conv_bn_lrelu_pool_drop_kernel,
                             inv_keep=float(1.0 / (1.0 - p_drop)))
    return pl.pallas_call(
        kern,
        out_shape=(jax.ShapeDtypeStruct((N, H, W, co_real), jnp.float32),
                   jax.ShapeDtypeStruct((N, H // 2, W // 2, co_real), jnp.float32)),
        grid=(N, T),
        in_specs=[
            pl.BlockSpec((1, tile_h, W, K), lambda n, t: (n, t, 0, 0)),
            pl.BlockSpec((K, Co), lambda n, t: (0, 0)),
            pl.BlockSpec((1, Co), lambda n, t: (0, 0)),
            pl.BlockSpec((1, Co), lambda n, t: (0, 0)),
            pl.BlockSpec((1, Co), lambda n, t: (0, 0)),
            pl.BlockSpec((1, tile_h // 2, W // 2, co_real), lambda n, t: (n, t, 0, 0)),
        ],
        out_specs=(
            pl.BlockSpec((1, tile_h, W, co_real), lambda n, t: (n, t, 0, 0)),
            pl.BlockSpec((1, tile_h // 2, W // 2, co_real), lambda n, t: (n, t, 0, 0)),
        ),
        compiler_params=pltpu.CompilerParams(
            dimension_semantics=("parallel", "parallel"),
            vmem_limit_bytes=VMEM_LIMIT),
    )(xp, wp, bp, scale, shift, mask)


def contraction_block(x_nchw, params, keep_mask, p_drop=0.1, tile_h=None):
    """Pallas ContractionBlock.forward; returns (c, p) in NCHW like the PyTorch module."""
    (w1, b1, g1, be1, w2, b2, g2, be2) = params
    N, Cin, H, W = x_nchw.shape
    Cout = w1.shape[-1]
    if tile_h is None:
        tile_h = _pick_tile_h(H, W)
    assert H % tile_h == 0 and tile_h % 2 == 0 and W % 2 == 0

    K1 = _round_up(9 * Cin, LANE)
    K2 = _round_up(9 * Cout, LANE)
    Cop = _round_up(Cout, LANE)

    # NCHW -> NHWC bf16 (MXU operands; all accumulation is f32 inside the kernels).
    x = jnp.transpose(x_nchw, (0, 2, 3, 1)).astype(jnp.bfloat16)

    w1p, b1p, g1p, be1p = _pack_conv_params(w1, b1, g1, be1, K1, Cop)
    w2p, b2p, g2p, be2p = _pack_conv_params(w2, b2, g2, be2, K2, Cop)

    # Block 1: packed conv -> BN(batch stats, two-pass w/ recompute) -> LeakyReLU.
    xp1 = _im2col_3x3(x, K1)
    stats1 = _conv_stats(xp1, w1p, b1p, tile_h=tile_h)
    scale1, shift1 = _bn_scale_shift(stats1, g1p, be1p, N * H * W)
    c1 = _finalize_block1(xp1, w1p, b1p, scale1, shift1, Cout,
                          tile_h=tile_h, out_dtype=jnp.bfloat16)

    # Block 2: same, with 2x2 maxpool + inverted dropout fused into the finalize pass.
    # TODO(synk): keep-mask could be generated in-kernel with pltpu.prng_random_bits, but torch's
    # Dropout RNG stream is not reproducible in JAX either way, so it stays an explicit input.
    xp2 = _im2col_3x3(c1, K2)
    stats2 = _conv_stats(xp2, w2p, b2p, tile_h=tile_h)
    scale2, shift2 = _bn_scale_shift(stats2, g2p, be2p, N * H * W)
    mask = keep_mask.astype(jnp.bfloat16)       # exact 0/1; 1/(1-p) folded in-kernel
    c2, p = _finalize_block2(xp2, w2p, b2p, scale2, shift2, mask, Cout, p_drop,
                             tile_h=tile_h)

    # TODO(synk): training-mode BatchNorm2d running_mean/running_var buffer updates are not
    # produced (forward outputs only).
    return jnp.transpose(c2, (0, 3, 1, 2)), jnp.transpose(p, (0, 3, 1, 2))


# ---------------------------------------------------------------------------
# Pure-JAX reference (independent path: lax.conv + reduce_window).  Conv inputs
# are cast to bf16 with f32 accumulation to mirror the kernels' MXU precision.
# ---------------------------------------------------------------------------
def _reference(x_nchw, params, keep_mask, p_drop):
    (w1, b1, g1, be1, w2, b2, g2, be2) = params
    x = jnp.transpose(x_nchw, (0, 2, 3, 1)).astype(jnp.float32)

    def blk(x, w, b, g, be):
        y = jax.lax.conv_general_dilated(
            x.astype(jnp.bfloat16), w.astype(jnp.bfloat16),
            window_strides=(1, 1), padding="SAME",
            dimension_numbers=("NHWC", "HWIO", "NHWC"),
            preferred_element_type=jnp.float32) + b.reshape(1, 1, 1, -1)
        mean = jnp.mean(y, axis=(0, 1, 2), keepdims=True)
        var = jnp.mean((y - mean) ** 2, axis=(0, 1, 2), keepdims=True)
        z = (y - mean) * jax.lax.rsqrt(var + BN_EPS)
        z = z * g.reshape(1, 1, 1, -1) + be.reshape(1, 1, 1, -1)
        return jnp.where(z > 0, z, LEAKY_SLOPE * z)

    c = blk(blk(x, w1, b1, g1, be1), w2, b2, g2, be2)
    pooled = jax.lax.reduce_window(c, -jnp.inf, jax.lax.max,
                                   (1, 2, 2, 1), (1, 2, 2, 1), "VALID")
    p = pooled * keep_mask / (1.0 - p_drop)
    return jnp.transpose(c, (0, 3, 1, 2)), jnp.transpose(p, (0, 3, 1, 2))


if __name__ == "__main__":
    N, Cin, Cout, H, W = 2, 4, 8, 16, 16
    p_drop = 0.1

    key = jax.random.PRNGKey(0)
    ks = jax.random.split(key, 10)

    x_nchw = jax.random.normal(ks[0], (N, Cin, H, W), jnp.float32)

    w1 = 0.2 * jax.random.normal(ks[1], (3, 3, Cin, Cout), jnp.float32)
    b1 = 0.1 * jax.random.normal(ks[2], (Cout,), jnp.float32)
    g1 = 1.0 + 0.1 * jax.random.normal(ks[3], (Cout,), jnp.float32)
    be1 = 0.1 * jax.random.normal(ks[4], (Cout,), jnp.float32)
    w2 = 0.2 * jax.random.normal(ks[5], (3, 3, Cout, Cout), jnp.float32)
    b2 = 0.1 * jax.random.normal(ks[6], (Cout,), jnp.float32)
    g2 = 1.0 + 0.1 * jax.random.normal(ks[7], (Cout,), jnp.float32)
    be2 = 0.1 * jax.random.normal(ks[8], (Cout,), jnp.float32)
    params = (w1, b1, g1, be1, w2, b2, g2, be2)

    # Bernoulli keep-mask with the same inverted-dropout semantics as nn.Dropout(0.1).
    keep_mask = jax.random.bernoulli(
        ks[9], 1.0 - p_drop, (N, H // 2, W // 2, Cout)).astype(jnp.float32)

    run = jax.jit(functools.partial(contraction_block, p_drop=p_drop))
    c_out, p_out = run(x_nchw, params, keep_mask)
    jax.block_until_ready((c_out, p_out))

    c_ref, p_ref = _reference(x_nchw, params, keep_mask, p_drop)
    assert c_out.shape == (N, Cout, H, W) and p_out.shape == (N, Cout, H // 2, W // 2)
    # Tolerance reflects bf16 MXU operands (reference conv also uses bf16 inputs / f32 accum).
    assert jnp.allclose(c_out, c_ref, atol=5e-3, rtol=5e-3), "conv block mismatch"
    assert jnp.allclose(p_out, p_ref, atol=5e-3, rtol=5e-3), "pool/dropout mismatch"

    print("KERNEL_OK")
</pallas_src>

<mosaic_0001>
module attributes {stable_mosaic.version = 11 : i64} {
  func.func @conv_stats_kernel(%arg0: i32, %arg1: i32, %arg2: memref<1x16x16x128xbf16, #tpu.memory_space<vmem>>, %arg3: memref<128x128xbf16, #tpu.memory_space<vmem>>, %arg4: memref<1x128xf32, #tpu.memory_space<vmem>>, %arg5: memref<1x1x2x128xf32, #tpu.memory_space<vmem>>) attributes {dimension_semantics = [#tpu.dimension_semantics<parallel>, #tpu.dimension_semantics<parallel>], iteration_bounds = array<i64: 2, 1>, scalar_prefetch = 0 : i64, scratch_operands = 0 : i64, tpu.core_type = #tpu.core_type<tc>, window_params = [{transform_indices = @transform_0, window_bounds = array<i64: 1, 16, 16, 128>}, {pipeline_mode = #tpu.pipeline_mode<synchronous>, transform_indices = @transform_1, window_bounds = array<i64: 128, 128>}, {pipeline_mode = #tpu.pipeline_mode<synchronous>, transform_indices = @transform_2, window_bounds = array<i64: 1, 128>}, {transform_indices = @transform_3, window_bounds = array<i64: 1, 1, 2, 128>}]} {
    %c0 = arith.constant 0 : index
    %c0_0 = arith.constant 0 : index
    %c0_1 = arith.constant 0 : index
    %c0_2 = arith.constant 0 : index
    %0 = vector.load %arg2[%c0, %c0_0, %c0_1, %c0_2] : memref<1x16x16x128xbf16, #tpu.memory_space<vmem>>, vector<1x16x16x128xbf16>
    %1 = vector.shape_cast %0 : vector<1x16x16x128xbf16> to vector<16x16x128xbf16>
    %2 = vector.shape_cast %1 : vector<16x16x128xbf16> to vector<256x128xbf16>
    %c0_3 = arith.constant 0 : index
    %c0_4 = arith.constant 0 : index
    %3 = vector.load %arg3[%c0_3, %c0_4] : memref<128x128xbf16, #tpu.memory_space<vmem>>, vector<128x128xbf16>
    %cst = arith.constant dense<0.000000e+00> : vector<256x128xf32>
    %4 = tpu.matmul %2, %3, %cst {dimension_numbers = #tpu.dot_dimension_numbers<[1], [0], [0], [1], [0, 0, 1, 1], [], []>} : vector<256x128xbf16>, vector<128x128xbf16>, vector<256x128xf32> -> vector<256x128xf32>
    %c0_5 = arith.constant 0 : index
    %c0_6 = arith.constant 0 : index
    %5 = vector.load %arg4[%c0_5, %c0_6] : memref<1x128xf32, #tpu.memory_space<vmem>>, vector<1x128xf32>
    %6 = vector.broadcast %5 : vector<1x128xf32> to vector<256x128xf32>
    %7 = arith.addf %4, %6 : vector<256x128xf32>
    %cst_7 = arith.constant dense<0.000000e+00> : vector<128xf32>
    %8 = vector.multi_reduction <add>, %7, %cst_7 [0] : vector<256x128xf32> to vector<128xf32>
    %9 = vector.shape_cast %8 : vector<128xf32> to vector<1x128xf32>
    %10 = arith.mulf %7, %7 : vector<256x128xf32>
    %cst_8 = arith.constant dense<0.000000e+00> : vector<128xf32>
    %11 = vector.multi_reduction <add>, %10, %cst_8 [0] : vector<256x128xf32> to vector<128xf32>
    %12 = vector.shape_cast %11 : vector<128xf32> to vector<1x128xf32>
    %13 = tpu.concatenate %9, %12 in 0 : vector<1x128xf32>, vector<1x128xf32> -> vector<2x128xf32>
    %14 = vector.shape_cast %13 : vector<2x128xf32> to vector<1x1x2x128xf32>
    %c0_9 = arith.constant 0 : index
    %c0_10 = arith.constant 0 : index
    %c0_11 = arith.constant 0 : index
    %c0_12 = arith.constant 0 : index
    %15 = vector.load %arg5[%c0_9, %c0_10, %c0_11, %c0_12] : memref<1x1x2x128xf32, #tpu.memory_space<vmem>>, vector<1x1x2x128xf32>
    tpu.vector_store %arg5[%c0_9, %c0_10, %c0_11, %c0_12], %14 {strides = array<i32>} : memref<1x1x2x128xf32, #tpu.memory_space<vmem>>, vector<1x1x2x128xf32>,
    return
  }
  func.func @transform_0(%arg0: i32, %arg1: i32) -> (i32, i32, i32, i32) {
    %c0_i32 = arith.constant 0 : i32
    %c0_i32_0 = arith.constant 0 : i32
    %c0_i32_1 = arith.constant 0 : i32
    return %arg0, %arg1, %c0_i32, %c0_i32_0 : i32, i32, i32, i32
  }
  func.func @transform_1(%arg0: i32, %arg1: i32) -> (i32, i32) {
    %c0_i32 = arith.constant 0 : i32
    %c0_i32_0 = arith.constant 0 : i32
    %c0_i32_1 = arith.constant 0 : i32
    return %c0_i32, %c0_i32_0 : i32, i32
  }
  func.func @transform_2(%arg0: i32, %arg1: i32) -> (i32, i32) {
    %c0_i32 = arith.constant 0 : i32
    %c0_i32_0 = arith.constant 0 : i32
    %c0_i32_1 = arith.constant 0 : i32
    return %c0_i32, %c0_i32_0 : i32, i32
  }
  func.func @transform_3(%arg0: i32, %arg1: i32) -> (i32, i32, i32, i32) {
    %c0_i32 = arith.constant 0 : i32
    %c0_i32_0 = arith.constant 0 : i32
    %c0_i32_1 = arith.constant 0 : i32
    return %arg0, %arg1, %c0_i32, %c0_i32_0 : i32, i32, i32, i32
  }
}

module attributes {stable_mosaic.version = 11 : i64} {
  func.func @conv_bn_lrelu_kernel(%arg0: i32, %arg1: i32, %arg2: memref<1x16x16x128xbf16, #tpu.memory_space<vmem>>, %arg3: memref<128x128xbf16, #tpu.memory_space<vmem>>, %arg4: memref<1x128xf32, #tpu.memory_space<vmem>>, %arg5: memref<1x128xf32, #tpu.memory_space<vmem>>, %arg6: memref<1x128xf32, #tpu.memory_space<vmem>>, %arg7: memref<1x16x16x8xbf16, #tpu.memory_space<vmem>>) attributes {dimension_semantics = [#tpu.dimension_semantics<parallel>, #tpu.dimension_semantics<parallel>], iteration_bounds = array<i64: 2, 1>, scalar_prefetch = 0 : i64, scratch_operands = 0 : i64, tpu.core_type = #tpu.core_type<tc>, window_params = [{transform_indices = @transform_0, window_bounds = array<i64: 1, 16, 16, 128>}, {pipeline_mode = #tpu.pipeline_mode<synchronous>, transform_indices = @transform_1, window_bounds = array<i64: 128, 128>}, {pipeline_mode = #tpu.pipeline_mode<synchronous>, transform_indices = @transform_2, window_bounds = array<i64: 1, 128>}, {pipeline_mode = #tpu.pipeline_mode<synchronous>, transform_indices = @transform_3, window_bounds = array<i64: 1, 128>}, {pipeline_mode = #tpu.pipeline_mode<synchronous>, transform_indices = @transform_4, window_bounds = array<i64: 1, 128>}, {transform_indices = @transform_5, window_bounds = array<i64: 1, 16, 16, 8>}]} {
    %c0 = arith.constant 0 : index
    %c0_0 = arith.constant 0 : index
    %c0_1 = arith.constant 0 : index
    %c0_2 = arith.constant 0 : index
    %0 = vector.load %arg2[%c0, %c0_0, %c0_1, %c0_2] : memref<1x16x16x128xbf16, #tpu.memory_space<vmem>>, vector<1x16x16x128xbf16>
    %1 = vector.shape_cast %0 : vector<1x16x16x128xbf16> to vector<16x16x128xbf16>
    %2 = vector.shape_cast %1 : vector<16x16x128xbf16> to vector<256x128xbf16>
    %c0_3 = arith.constant 0 : index
    %c0_4 = arith.constant 0 : index
    %3 = vector.load %arg3[%c0_3, %c0_4] : memref<128x128xbf16, #tpu.memory_space<vmem>>, vector<128x128xbf16>
    %cst = arith.constant dense<0.000000e+00> : vector<256x128xf32>
    %4 = tpu.matmul %2, %3, %cst {dimension_numbers = #tpu.dot_dimension_numbers<[1], [0], [0], [1], [0, 0, 1, 1], [], []>} : vector<256x128xbf16>, vector<128x128xbf16>, vector<256x128xf32> -> vector<256x128xf32>
    %c0_5 = arith.constant 0 : index
    %c0_6 = arith.constant 0 : index
    %5 = vector.load %arg4[%c0_5, %c0_6] : memref<1x128xf32, #tpu.memory_space<vmem>>, vector<1x128xf32>
    %6 = vector.broadcast %5 : vector<1x128xf32> to vector<256x128xf32>
    %7 = arith.addf %4, %6 : vector<256x128xf32>
    %c0_7 = arith.constant 0 : index
    %c0_8 = arith.constant 0 : index
    %8 = vector.load %arg5[%c0_7, %c0_8] : memref<1x128xf32, #tpu.memory_space<vmem>>, vector<1x128xf32>
    %9 = vector.broadcast %8 : vector<1x128xf32> to vector<256x128xf32>
    %10 = arith.mulf %7, %9 : vector<256x128xf32>
    %c0_9 = arith.constant 0 : index
    %c0_10 = arith.constant 0 : index
    %11 = vector.load %arg6[%c0_9, %c0_10] : memref<1x128xf32, #tpu.memory_space<vmem>>, vector<1x128xf32>
    %12 = vector.broadcast %11 : vector<1x128xf32> to vector<256x128xf32>
    %13 = arith.addf %10, %12 : vector<256x128xf32>
    %cst_11 = arith.constant 0.000000e+00 : f32
    %14 = vector.broadcast %cst_11 : f32 to vector<256x128xf32>
    %15 = arith.cmpf ogt, %13, %14 : vector<256x128xf32>
    %cst_12 = arith.constant 2.000000e-01 : f32
    %16 = vector.broadcast %cst_12 : f32 to vector<256x128xf32>
    %17 = arith.mulf %16, %13 : vector<256x128xf32>
    %18 = arith.select %15, %13, %17 : vector<256x128xi1>, vector<256x128xf32>
    %19 = vector.shape_cast %18 : vector<256x128xf32> to vector<16x16x128xf32>
    %20 = vector.extract_strided_slice %19 {offsets = [0, 0, 0], sizes = [16, 16, 8], strides = [1, 1, 1]} : vector<16x16x128xf32> to vector<16x16x8xf32>
    %21 = arith.truncf %20 : vector<16x16x8xf32> to vector<16x16x8xbf16>
    %c0_13 = arith.constant 0 : index
    %c0_14 = arith.constant 0 : index
    %c0_15 = arith.constant 0 : index
    %c0_16 = arith.constant 0 : index
    %22 = vector.load %arg7[%c0_13, %c0_14, %c0_15, %c0_16] : memref<1x16x16x8xbf16, #tpu.memory_space<vmem>>, vector<1x16x16x8xbf16>
    %23 = vector.shape_cast %22 : vector<1x16x16x8xbf16> to vector<16x16x8xbf16>
    %24 = vector.shape_cast %21 : vector<16x16x8xbf16> to vector<1x16x16x8xbf16>
    tpu.vector_store %arg7[%c0_13, %c0_14, %c0_15, %c0_16], %24 {strides = array<i32>} : memref<1x16x16x8xbf16, #tpu.memory_space<vmem>>, vector<1x16x16x8xbf16>,
    return
  }
  func.func @transform_0(%arg0: i32, %arg1: i32) -> (i32, i32, i32, i32) {
    %c0_i32 = arith.constant 0 : i32
    %c0_i32_0 = arith.constant 0 : i32
    %c0_i32_1 = arith.constant 0 : i32
    return %arg0, %arg1, %c0_i32, %c0_i32_0 : i32, i32, i32, i32
  }
  func.func @transform_1(%arg0: i32, %arg1: i32) -> (i32, i32) {
    %c0_i32 = arith.constant 0 : i32
    %c0_i32_0 = arith.constant 0 : i32
    %c0_i32_1 = arith.constant 0 : i32
    return %c0_i32, %c0_i32_0 : i32, i32
  }
  func.func @transform_2(%arg0: i32, %arg1: i32) -> (i32, i32) {
    %c0_i32 = arith.constant 0 : i32
    %c0_i32_0 = arith.constant 0 : i32
    %c0_i32_1 = arith.constant 0 : i32
    return %c0_i32, %c0_i32_0 : i32, i32
  }
  func.func @transform_3(%arg0: i32, %arg1: i32) -> (i32, i32) {
    %c0_i32 = arith.constant 0 : i32
    %c0_i32_0 = arith.constant 0 : i32
    %c0_i32_1 = arith.constant 0 : i32
    return %c0_i32, %c0_i32_0 : i32, i32
  }
  func.func @transform_4(%arg0: i32, %arg1: i32) -> (i32, i32) {
    %c0_i32 = arith.constant 0 : i32
    %c0_i32_0 = arith.constant 0 : i32
    %c0_i32_1 = arith.constant 0 : i32
    return %c0_i32, %c0_i32_0 : i32, i32
  }
  func.func @transform_5(%arg0: i32, %arg1: i32) -> (i32, i32, i32, i32) {
    %c0_i32 = arith.constant 0 : i32
    %c0_i32_0 = arith.constant 0 : i32
    %c0_i32_1 = arith.constant 0 : i32
    return %arg0, %arg1, %c0_i32, %c0_i32_0 : i32, i32, i32, i32
  }
}

module attributes {stable_mosaic.version = 11 : i64} {
  func.func @conv_bn_lrelu_pool_drop_kernel(%arg0: i32, %arg1: i32, %arg2: memref<1x16x16x128xbf16, #tpu.memory_space<vmem>>, %arg3: memref<128x128xbf16, #tpu.memory_space<vmem>>, %arg4: memref<1x128xf32, #tpu.memory_space<vmem>>, %arg5: memref<1x128xf32, #tpu.memory_space<vmem>>, %arg6: memref<1x128xf32, #tpu.memory_space<vmem>>, %arg7: memref<1x8x8x8xbf16, #tpu.memory_space<vmem>>, %arg8: memref<1x16x16x8xf32, #tpu.memory_space<vmem>>, %arg9: memref<1x8x8x8xf32, #tpu.memory_space<vmem>>) attributes {dimension_semantics = [#tpu.dimension_semantics<parallel>, #tpu.dimension_semantics<parallel>], iteration_bounds = array<i64: 2, 1>, scalar_prefetch = 0 : i64, scratch_operands = 0 : i64, tpu.core_type = #tpu.core_type<tc>, window_params = [{transform_indices = @transform_0, window_bounds = array<i64: 1, 16, 16, 128>}, {pipeline_mode = #tpu.pipeline_mode<synchronous>, transform_indices = @transform_1, window_bounds = array<i64: 128, 128>}, {pipeline_mode = #tpu.pipeline_mode<synchronous>, transform_indices = @transform_2, window_bounds = array<i64: 1, 128>}, {pipeline_mode = #tpu.pipeline_mode<synchronous>, transform_indices = @transform_3, window_bounds = array<i64: 1, 128>}, {pipeline_mode = #tpu.pipeline_mode<synchronous>, transform_indices = @transform_4, window_bounds = array<i64: 1, 128>}, {transform_indices = @transform_5, window_bounds = array<i64: 1, 8, 8, 8>}, {transform_indices = @transform_6, window_bounds = array<i64: 1, 16, 16, 8>}, {transform_indices = @transform_7, window_bounds = array<i64: 1, 8, 8, 8>}]} {
    %c0 = arith.constant 0 : index
    %c0_0 = arith.constant 0 : index
    %c0_1 = arith.constant 0 : index
    %c0_2 = arith.constant 0 : index
    %0 = vector.load %arg2[%c0, %c0_0, %c0_1, %c0_2] : memref<1x16x16x128xbf16, #tpu.memory_space<vmem>>, vector<1x16x16x128xbf16>
    %1 = vector.shape_cast %0 : vector<1x16x16x128xbf16> to vector<16x16x128xbf16>
    %2 = vector.shape_cast %1 : vector<16x16x128xbf16> to vector<256x128xbf16>
    %c0_3 = arith.constant 0 : index
    %c0_4 = arith.constant 0 : index
    %3 = vector.load %arg3[%c0_3, %c0_4] : memref<128x128xbf16, #tpu.memory_space<vmem>>, vector<128x128xbf16>
    %cst = arith.constant dense<0.000000e+00> : vector<256x128xf32>
    %4 = tpu.matmul %2, %3, %cst {dimension_numbers = #tpu.dot_dimension_numbers<[1], [0], [0], [1], [0, 0, 1, 1], [], []>} : vector<256x128xbf16>, vector<128x128xbf16>, vector<256x128xf32> -> vector<256x128xf32>
    %c0_5 = arith.constant 0 : index
    %c0_6 = arith.constant 0 : index
    %5 = vector.load %arg4[%c0_5, %c0_6] : memref<1x128xf32, #tpu.memory_space<vmem>>, vector<1x128xf32>
    %6 = vector.broadcast %5 : vector<1x128xf32> to vector<256x128xf32>
    %7 = arith.addf %4, %6 : vector<256x128xf32>
    %c0_7 = arith.constant 0 : index
    %c0_8 = arith.constant 0 : index
    %8 = vector.load %arg5[%c0_7, %c0_8] : memref<1x128xf32, #tpu.memory_space<vmem>>, vector<1x128xf32>
    %9 = vector.broadcast %8 : vector<1x128xf32> to vector<256x128xf32>
    %10 = arith.mulf %7, %9 : vector<256x128xf32>
    %c0_9 = arith.constant 0 : index
    %c0_10 = arith.constant 0 : index
    %11 = vector.load %arg6[%c0_9, %c0_10] : memref<1x128xf32, #tpu.memory_space<vmem>>, vector<1x128xf32>
    %12 = vector.broadcast %11 : vector<1x128xf32> to vector<256x128xf32>
    %13 = arith.addf %10, %12 : vector<256x128xf32>
    %cst_11 = arith.constant 0.000000e+00 : f32
    %14 = vector.broadcast %cst_11 : f32 to vector<256x128xf32>
    %15 = arith.cmpf ogt, %13, %14 : vector<256x128xf32>
    %cst_12 = arith.constant 2.000000e-01 : f32
    %16 = vector.broadcast %cst_12 : f32 to vector<256x128xf32>
    %17 = arith.mulf %16, %13 : vector<256x128xf32>
    %18 = arith.select %15, %13, %17 : vector<256x128xi1>, vector<256x128xf32>
    %19 = vector.shape_cast %18 : vector<256x128xf32> to vector<16x16x128xf32>
    %20 = vector.extract_strided_slice %19 {offsets = [0, 0, 0], sizes = [16, 16, 8], strides = [1, 1, 1]} : vector<16x16x128xf32> to vector<16x16x8xf32>
    %c0_13 = arith.constant 0 : index
    %c0_14 = arith.constant 0 : index
    %c0_15 = arith.constant 0 : index
    %c0_16 = arith.constant 0 : index
    %21 = vector.load %arg8[%c0_13, %c0_14, %c0_15, %c0_16] : memref<1x16x16x8xf32, #tpu.memory_space<vmem>>, vector<1x16x16x8xf32>
    %22 = vector.shape_cast %21 : vector<1x16x16x8xf32> to vector<16x16x8xf32>
    %23 = vector.shape_cast %20 : vector<16x16x8xf32> to vector<1x16x16x8xf32>
    tpu.vector_store %arg8[%c0_13, %c0_14, %c0_15, %c0_16], %23 {strides = array<i32>} : memref<1x16x16x8xf32, #tpu.memory_space<vmem>>, vector<1x16x16x8xf32>,
    %24 = vector.shape_cast %19 : vector<16x16x128xf32> to vector<8x2x16x128xf32>
    %cst_17 = arith.constant dense<0xFF800000> : vector<8x16x128xf32>
    %25 = vector.multi_reduction <maximumf>, %24, %cst_17 [1] : vector<8x2x16x128xf32> to vector<8x16x128xf32>
    %26 = vector.shape_cast %25 : vector<8x16x128xf32> to vector<8x8x2x128xf32>
    %cst_18 = arith.constant dense<0xFF800000> : vector<8x8x128xf32>
    %27 = vector.multi_reduction <maximumf>, %26, %cst_18 [2] : vector<8x8x2x128xf32> to vector<8x8x128xf32>
    %28 = vector.extract_strided_slice %27 {offsets = [0, 0, 0], sizes = [8, 8, 8], strides = [1, 1, 1]} : vector<8x8x128xf32> to vector<8x8x8xf32>
    %c0_19 = arith.constant 0 : index
    %c0_20 = arith.constant 0 : index
    %c0_21 = arith.constant 0 : index
    %c0_22 = arith.constant 0 : index
    %29 = vector.load %arg7[%c0_19, %c0_20, %c0_21, %c0_22] : memref<1x8x8x8xbf16, #tpu.memory_space<vmem>>, vector<1x8x8x8xbf16>
    %30 = vector.shape_cast %29 : vector<1x8x8x8xbf16> to vector<8x8x8xbf16>
    %31 = arith.extf %30 : vector<8x8x8xbf16> to vector<8x8x8xf32>
    %32 = arith.mulf %28, %31 : vector<8x8x8xf32>
    %cst_23 = arith.constant 1.11111116 : f32
    %33 = vector.broadcast %cst_23 : f32 to vector<8x8x8xf32>
    %34 = arith.mulf %32, %33 : vector<8x8x8xf32>
    %c0_24 = arith.constant 0 : index
    %c0_25 = arith.constant 0 : index
    %c0_26 = arith.constant 0 : index
    %c0_27 = arith.constant 0 : index
    %35 = vector.load %arg9[%c0_24, %c0_25, %c0_26, %c0_27] : memref<1x8x8x8xf32, #tpu.memory_space<vmem>>, vector<1x8x8x8xf32>
    %36 = vector.shape_cast %35 : vector<1x8x8x8xf32> to vector<8x8x8xf32>
    %37 = vector.shape_cast %34 : vector<8x8x8xf32> to vector<1x8x8x8xf32>
    tpu.vector_store %arg9[%c0_24, %c0_25, %c0_26, %c0_27], %37 {strides = array<i32>} : memref<1x8x8x8xf32, #tpu.memory_space<vmem>>, vector<1x8x8x8xf32>,
    return
  }
  func.func @transform_0(%arg0: i32, %arg1: i32) -> (i32, i32, i32, i32) {
    %c0_i32 = arith.constant 0 : i32
    %c0_i32_0 = arith.constant 0 : i32
    %c0_i32_1 = arith.constant 0 : i32
    return %arg0, %arg1, %c0_i32, %c0_i32_0 : i32, i32, i32, i32
  }
  func.func @transform_1(%arg0: i32, %arg1: i32) -> (i32, i32) {
    %c0_i32 = arith.constant 0 : i32
    %c0_i32_0 = arith.constant 0 : i32
    %c0_i32_1 = arith.constant 0 : i32
    return %c0_i32, %c0_i32_0 : i32, i32
  }
  func.func @transform_2(%arg0: i32, %arg1: i32) -> (i32, i32) {
    %c0_i32 = arith.constant 0 : i32
    %c0_i32_0 = arith.constant 0 : i32
    %c0_i32_1 = arith.constant 0 : i32
    return %c0_i32, %c0_i32_0 : i32, i32
  }
  func.func @transform_3(%arg0: i32, %arg1: i32) -> (i32, i32) {
    %c0_i32 = arith.constant 0 : i32
    %c0_i32_0 = arith.constant 0 : i32
    %c0_i32_1 = arith.constant 0 : i32
    return %c0_i32, %c0_i32_0 : i32, i32
  }
  func.func @transform_4(%arg0: i32, %arg1: i32) -> (i32, i32) {
    %c0_i32 = arith.constant 0 : i32
    %c0_i32_0 = arith.constant 0 : i32
    %c0_i32_1 = arith.constant 0 : i32
    return %c0_i32, %c0_i32_0 : i32, i32
  }
  func.func @transform_5(%arg0: i32, %arg1: i32) -> (i32, i32, i32, i32) {
    %c0_i32 = arith.constant 0 : i32
    %c0_i32_0 = arith.constant 0 : i32
    %c0_i32_1 = arith.constant 0 : i32
    return %arg0, %arg1, %c0_i32, %c0_i32_0 : i32, i32, i32, i32
  }
  func.func @transform_6(%arg0: i32, %arg1: i32) -> (i32, i32, i32, i32) {
    %c0_i32 = arith.constant 0 : i32
    %c0_i32_0 = arith.constant 0 : i32
    %c0_i32_1 = arith.constant 0 : i32
    return %arg0, %arg1, %c0_i32, %c0_i32_0 : i32, i32, i32, i32
  }
  func.func @transform_7(%arg0: i32, %arg1: i32) -> (i32, i32, i32, i32) {
    %c0_i32 = arith.constant 0 : i32
    %c0_i32_0 = arith.constant 0 : i32
    %c0_i32_1 = arith.constant 0 : i32
    return %arg0, %arg1, %c0_i32, %c0_i32_0 : i32, i32, i32, i32
  }
}

</mosaic_0001>

<bundles_post_ra>
// kernel: contraction_block.4
= control target key start
LH: loop header
LB: loop body
LE: loop exit
PB: predicated region body
PF: predicated region fallthrough
CT: control target
= control target key end

     0   :  { %s974_s12 = smov 0   ;;  %s976_s13 = smov 0   ;;  %s1138_s0 = inlined_call_operand.vmem [shape: bf16[2,16,16,128], index: 0, kind: input, shape index: {}]   ;;  %s1139_s1 = inlined_call_operand.vmem [shape: bf16[128,128], index: 1, kind: input, shape index: {}]   ;;  %s1140_s2 = inlined_call_operand.vmem [shape: f32[1,128], index: 2, kind: input, shape index: {}]   ;;  %s1141_s3 = inlined_call_operand.vmem [shape: f32[2,1,2,128], index: 3, kind: output, shape index: {}]  }
   0x1   :  { %s978_s14 = smov 0  }
   0x2 LB: > { %s25_s15 = sadd.s32 1, %s948_s13  ;;  %p762_p0 = scmp.ge.s32.totalorder %s952_s14, 1  ;;  %s952_s14 = sphi %s978_s14, %s13_s14   ;;  %s948_s13 = sphi %s976_s13, %s1143_s13   ;;  %s944_s12 = sphi %s974_s12, %s1142_s12  }
   0x3   : > { %p27_p1 = scmp.ge.s32.totalorder %s25_s15, 2  ;;  %p159_p2 = scmp.lt.s32.totalorder %s952_s14, 3 }
   0x5   : > { %s1145_s15 = smov (%p27_p1, %s25_s15), 0  ;;  %p160_p3 = pnand %p762_p0, %p159_p2 }
   0x6   : > { %v906_v0 = vld [vmem:[%s1139_s1] sm:$0xff] (!%p160_p3)   ;;  %p191_p4 = scmp.lt.s32.totalorder (!%p160_p3), %s944_s12, 1  ;;  %v907_v1 = vld [vmem:[%s1139_s1 + $0x8] sm:$0xff] (!%p160_p3)   ;;  %v908_v2 = vld [vmem:[%s1139_s1 + $0x10] sm:$0xff] (!%p160_p3)   ;;  %vm675_vm0 = vcmask (!%p160_p3), 1040384  }
   0x7   : > { %163 = sbr.rel (%p160_p3) target bundleno = 334 (0x14e), region = 32  ;;  %818 = vmatprep.subr.bf16.mxu0 (!%p160_p3), %v906_v0  ;;  %866 = vmatprep.subr.bf16.mxu1 (!%p160_p3), %v906_v0  ;;  %v909_v3 = vld [vmem:[%s1139_s1 + $0x18] sm:$0xff] (!%p160_p3)   ;;  %v910_v5 = vld [vmem:[%s1139_s1 + $0x20] sm:$0xff] (!%p160_p3)   ;;  %v911_v6 = vld [vmem:[%s1139_s1 + $0x28] sm:$0xff] (!%p160_p3)  }
   0x8   : > { %819 = vmatpush3.bf16.msra.mxu0 (!%p160_p3), %v906_v0  ;;  %874 = vmatpush3.bf16.msra.mxu1 (!%p160_p3), %v906_v0  ;;  %v912_v8 = vld [vmem:[%s1139_s1 + $0x30] sm:$0xff] (!%p160_p3)   ;;  %v913_v9 = vld [vmem:[%s1139_s1 + $0x38] sm:$0xff] (!%p160_p3)   ;;  %v1043_v24 = vld [vmem:[%s1140_s2] ss:$0 sm:$0xff] (!%p160_p3) }
   0x9   : > { %820 = vmatprep.subr.bf16.mxu0 (!%p160_p3), %v907_v1  ;;  %867 = vmatprep.subr.bf16.mxu1 (!%p160_p3), %v907_v1 }
   0xc   : > { %821 = vmatpush3.bf16.msra.mxu0 (!%p160_p3), %v907_v1  ;;  %875 = vmatpush3.bf16.msra.mxu1 (!%p160_p3), %v907_v1 }
   0xd   : > { %822 = vmatprep.subr.bf16.mxu0 (!%p160_p3), %v908_v2  ;;  %868 = vmatprep.subr.bf16.mxu1 (!%p160_p3), %v908_v2 }
   0xe   : > { %s1147_s12 = smov (!%p191_p4, %s944_s12), 1 }
   0xf   : > { %s793_s22 = sshll.u32 %s1147_s12, 7  ;;  %s765_s11 = sshll.u32 %s1147_s12, 1 }
  0x10   : > { %s1007_s25 = scalar_lea.vmem %s1138_s0, %s793_s22  ;;  %823 = vmatpush3.bf16.msra.mxu0 %v908_v2  ;;  %876 = vmatpush3.bf16.msra.mxu1 %v908_v2  ;;  %s207_s18 = scalar_lea.vmem %s1141_s3, %s765_s11 }
  0x11   : > { %v914_v4 = vld [vmem:[%s1007_s25] sm:$0xff]   ;;  %824 = vmatprep.subr.bf16.mxu0 %v909_v3  ;;  %869 = vmatprep.subr.bf16.mxu1 %v909_v3  ;;  %v915_v10 = vld [vmem:[%s1007_s25 + $0x8] sm:$0xff]   ;;  %v916_v12 = vld [vmem:[%s1007_s25 + $0x10] sm:$0xff]  }
  0x12   : > { %834 = vmatprep.mubr.bf16.mxu0 %v914_v4  ;;  %v922_v7 = vld [vmem:[%s1007_s25 + $0x40] sm:$0xff]   ;;  %v923_v11 = vld [vmem:[%s1007_s25 + $0x48] sm:$0xff]   ;;  %v924_v13 = vld [vmem:[%s1007_s25 + $0x50] sm:$0xff]  }
  0x13   : > { %850 = vmatprep.mubr.bf16.mxu1 %v922_v7  ;;  %v917_v14 = vld [vmem:[%s1007_s25 + $0x18] sm:$0xff]   ;;  %v918_v16 = vld [vmem:[%s1007_s25 + $0x20] sm:$0xff]   ;;  %v919_v18 = vld [vmem:[%s1007_s25 + $0x28] sm:$0xff]  }
  0x14   : > { %825 = vmatpush3.bf16.msra.mxu0 %v909_v3  ;;  %877 = vmatpush3.bf16.msra.mxu1 %v909_v3  ;;  %v925_v15 = vld [vmem:[%s1007_s25 + $0x58] sm:$0xff]   ;;  %v926_v17 = vld [vmem:[%s1007_s25 + $0x60] sm:$0xff]   ;;  %v927_v19 = vld [vmem:[%s1007_s25 + $0x68] sm:$0xff]  }
  0x15   : > { %826 = vmatprep.subr.bf16.mxu0 %v910_v5  ;;  %870 = vmatprep.subr.bf16.mxu1 %v910_v5  ;;  %v920_v20 = vld [vmem:[%s1007_s25 + $0x30] sm:$0xff]   ;;  %v921_v22 = vld [vmem:[%s1007_s25 + $0x38] sm:$0xff]  }
  0x16   : > { %v928_v21 = vld [vmem:[%s1007_s25 + $0x70] sm:$0xff]   ;;  %v929_v23 = vld [vmem:[%s1007_s25 + $0x78] sm:$0xff]  }
  0x18   : > { %827 = vmatpush3.bf16.msra.mxu0 %v910_v5  ;;  %878 = vmatpush3.bf16.msra.mxu1 %v910_v5 }
  0x19   : > { %828 = vmatprep.subr.bf16.mxu0 %v911_v6  ;;  %871 = vmatprep.subr.bf16.mxu1 %v911_v6 }
  0x1c   : > { %829 = vmatpush3.bf16.msra.mxu0 %v911_v6  ;;  %879 = vmatpush3.bf16.msra.mxu1 %v911_v6 }
  0x1d   : > { %830 = vmatprep.subr.bf16.mxu0 %v912_v8  ;;  %872 = vmatprep.subr.bf16.mxu1 %v912_v8 }
  0x20   : > { %831 = vmatpush3.bf16.msra.mxu0 %v912_v8  ;;  %880 = vmatpush3.bf16.msra.mxu1 %v912_v8 }
  0x21   : > { %832 = vmatprep.subr.bf16.mxu0 %v913_v9  ;;  %873 = vmatprep.subr.bf16.mxu1 %v913_v9 }
  0x24   : > { %833 = vmatpush3.bf16.msra.mxu0 %v913_v9  ;;  %881 = vmatpush3.bf16.msra.mxu1 %v913_v9 }
  0x27   : > { %835 = vmatmul.mubr.bf16.vlgmr.msra.gmra.mrb[0].mxu0 %v915_v10  ;;  %851 = vmatmul.mubr.bf16.vlgmr.msra.gmra.mrb[0].mxu1 %v923_v11 }
  0x28   : > { %838 = vmatprep.mubr.bf16.mxu0 %v916_v12  ;;  %854 = vmatprep.mubr.bf16.mxu1 %v924_v13 }
  0x2f   : > { %839 = vmatmul.mubr.bf16.gmra.mrb[4].mxu0 %v917_v14  ;;  %855 = vmatmul.mubr.bf16.gmra.mrb[4].mxu1 %v925_v15 }
  0x30   : > { %842 = vmatprep.mubr.bf16.mxu0 %v918_v16  ;;  %858 = vmatprep.mubr.bf16.mxu1 %v926_v17 }
  0x37   : > { %843 = vmatmul.mubr.bf16.gmra.mrb[8].mxu0 %v919_v18  ;;  %859 = vmatmul.mubr.bf16.gmra.mrb[8].mxu1 %v927_v19 }
  0x38   : > { %846 = vmatprep.mubr.bf16.mxu0 %v920_v20  ;;  %862 = vmatprep.mubr.bf16.mxu1 %v928_v21 }
  0x3f   : > { %847 = vmatmul.mubr.bf16.gmra.mrb[12].mxu0 %v921_v22  ;;  %863 = vmatmul.mubr.bf16.gmra.mrb[12].mxu1 %v929_v23 }
  0xfa   : > { %v836_v25 = vpop.f32.mrb[0].mxu0  ;;  %v1045_v26 = vpop.f32.mrb[0].mxu1 }
  0xfb   : > { %v442_v27 = vpop.f32.mrb[1].mxu0  ;;  %v1047_v28 = vpop.f32.mrb[1].mxu1  ;;  %v451_v34 = vadd.f32 %v836_v25, %v1043_v24 }
  0xfc   : > { %v443_v29 = vadd.f32 %v1043_v24, %v442_v27  ;;  %v837_v30 = vpop.f32.mrb[2].mxu0  ;;  %v1050_v31 = vpop.f32.mrb[2].mxu1 }
  0xfd   : > { %v445_v32 = vpop.f32.mrb[3].mxu0  ;;  %v1052_v33 = vpop.f32.mrb[3].mxu1  ;;  %v454_v37 = vadd.f32 %v837_v30, %v1043_v24  ;;  %v608_v40 = vmul.f32 %v451_v34, %v451_v34 }
  0xfe   : > { %v446_v35 = vadd.f32 %v1043_v24, %v445_v32  ;;  %v606_v36 = vmul.f32 %v443_v29, %v443_v29 }
  0xff   : > { %v609_v47 = vmul.f32 %v454_v37, %v454_v37 }
 0x100   : > { %v569_v38 = vadd.f32 %v446_v35, %v443_v29  ;;  %v607_v39 = vmul.f32 %v446_v35, %v446_v35 }
 0x102   : > { %v570_v41 = vadd.f32 %v569_v38, %v451_v34  ;;  %v638_v42 = vadd.f32 %v607_v39, %v606_v36  ;;  %v840_v43 = vpop.f32.mrb[4].mxu0  ;;  %v1057_v44 = vpop.f32.mrb[4].mxu1 }
 0x103   : > { %v458_v45 = vpop.f32.mrb[5].mxu0  ;;  %v1059_v46 = vpop.f32.mrb[5].mxu1  ;;  %v467_v53 = vadd.f32 %v840_v43, %v1043_v24 }
 0x104   : > { %v639_v48 = vadd.f32 %v638_v42, %v608_v40  ;;  %v459_v49 = vadd.f32 %v1043_v24, %v458_v45  ;;  %v571_v50 = vadd.f32 %v570_v41, %v454_v37  ;;  %v841_v51 = vpop.f32.mrb[6].mxu0  ;;  %v1062_v52 = vpop.f32.mrb[6].mxu1 }
 0x105   : > { %v461_v54 = vpop.f32.mrb[7].mxu0  ;;  %v1065_v55 = vpop.f32.mrb[7].mxu1  ;;  %v470_v61 = vadd.f32 %v841_v51, %v1043_v24  ;;  %v612_v0 = vmul.f32 %v467_v53, %v467_v53  ;;  %v507_v51 = vadd.f32 %v1043_v24, %v1047_v28 }
 0x106   : > { %v572_v56 = vadd.f32 %v571_v50, %v459_v49  ;;  %v610_v57 = vmul.f32 %v459_v49, %v459_v49  ;;  %v640_v58 = vadd.f32 %v639_v48, %v609_v47  ;;  %v462_v59 = vadd.f32 %v1043_v24, %v461_v54 }
 0x107   : > { %v613_v7 = vmul.f32 %v470_v61, %v470_v61 }
 0x108   : > { %v641_v60 = vadd.f32 %v640_v58, %v610_v57  ;;  %v573_v62 = vadd.f32 %v572_v56, %v462_v59  ;;  %v611_v63 = vmul.f32 %v462_v59, %v462_v59 }
 0x10a   : > { %v574_v1 = vadd.f32 %v573_v62, %v467_v53  ;;  %v642_v2 = vadd.f32 %v641_v60, %v611_v63  ;;  %v844_v3 = vpop.f32.mrb[8].mxu0  ;;  %v1069_v4 = vpop.f32.mrb[8].mxu1 }
 0x10b   : > { %v474_v5 = vpop.f32.mrb[9].mxu0  ;;  %v1071_v6 = vpop.f32.mrb[9].mxu1  ;;  %v483_v13 = vadd.f32 %v844_v3, %v1043_v24 }
 0x10c   : > { %v643_v8 = vadd.f32 %v642_v2, %v612_v0  ;;  %v475_v9 = vadd.f32 %v1043_v24, %v474_v5  ;;  %v575_v10 = vadd.f32 %v574_v1, %v470_v61  ;;  %v845_v11 = vpop.f32.mrb[10].mxu0  ;;  %v1074_v12 = vpop.f32.mrb[10].mxu1  ;;  %v622_v61 = vmul.f32 %v507_v51, %v507_v51 }
 0x10d   : > { %v477_v14 = vpop.f32.mrb[11].mxu0  ;;  %v1077_v15 = vpop.f32.mrb[11].mxu1  ;;  %v486_v21 = vadd.f32 %v845_v11, %v1043_v24  ;;  %v616_v25 = vmul.f32 %v483_v13, %v483_v13  ;;  %v510_v1 = vadd.f32 %v1043_v24, %v1052_v33  ;;  %v515_v2 = vadd.f32 %v1045_v26, %v1043_v24 }
 0x10e   : > { %v576_v16 = vadd.f32 %v575_v10, %v475_v9  ;;  %v614_v17 = vmul.f32 %v475_v9, %v475_v9  ;;  %v644_v18 = vadd.f32 %v643_v8, %v613_v7  ;;  %v478_v19 = vadd.f32 %v1043_v24, %v477_v14 }
 0x10f   : > { %v617_v36 = vmul.f32 %v486_v21, %v486_v21  ;;  %v518_v5 = vadd.f32 %v1050_v31, %v1043_v24  ;;  %v623_v9 = vmul.f32 %v510_v1, %v510_v1  ;;  %v523_v10 = vadd.f32 %v1043_v24, %v1059_v46 }
 0x110   : > { %v645_v20 = vadd.f32 %v644_v18, %v614_v17  ;;  %v577_v22 = vadd.f32 %v576_v16, %v478_v19  ;;  %v615_v23 = vmul.f32 %v478_v19, %v478_v19  ;;  %v624_v11 = vmul.f32 %v515_v2, %v515_v2 }
 0x111   : > { %v625_v16 = vmul.f32 %v518_v5, %v518_v5  ;;  %v626_v18 = vmul.f32 %v523_v10, %v523_v10  ;;  %v526_v26 = vadd.f32 %v1043_v24, %v1065_v55  ;;  %v531_v19 = vadd.f32 %v1057_v44, %v1043_v24 }
 0x112   : > { %v578_v27 = vadd.f32 %v577_v22, %v483_v13  ;;  %v646_v29 = vadd.f32 %v645_v20, %v615_v23  ;;  %v848_v30 = vpop.f32.mrb[12].mxu0  ;;  %v1081_v32 = vpop.f32.mrb[12].mxu1  ;;  %v542_v44 = vadd.f32 %v1043_v24, %v1077_v15 }
 0x113   : > { %v490_v34 = vpop.f32.mrb[13].mxu0  ;;  %v1083_v35 = vpop.f32.mrb[13].mxu1  ;;  %v499_v42 = vadd.f32 %v848_v30, %v1043_v24  ;;  %v627_v23 = vmul.f32 %v526_v26, %v526_v26 }
 0x114   : > { %v647_v37 = vadd.f32 %v646_v29, %v616_v25  ;;  %v491_v38 = vadd.f32 %v1043_v24, %v490_v34  ;;  %v579_v39 = vadd.f32 %v578_v27, %v486_v21  ;;  %v849_v40 = vpop.f32.mrb[14].mxu0  ;;  %v1086_v41 = vpop.f32.mrb[14].mxu1  ;;  %v534_v21 = vadd.f32 %v1062_v52, %v1043_v24 }
 0x115   : > { %v493_v43 = vpop.f32.mrb[15].mxu0  ;;  %v1089_v45 = vpop.f32.mrb[15].mxu1  ;;  %v502_v54 = vadd.f32 %v849_v40, %v1043_v24  ;;  %v620_v58 = vmul.f32 %v499_v42, %v499_v42  ;;  %v539_v25 = vadd.f32 %v1043_v24, %v1071_v6  ;;  %v628_v27 = vmul.f32 %v531_v19, %v531_v19 }
 0x116   : > { %v580_v47 = vadd.f32 %v579_v39, %v491_v38  ;;  %v618_v48 = vmul.f32 %v491_v38, %v491_v38  ;;  %v648_v49 = vadd.f32 %v647_v37, %v617_v36  ;;  %v494_v50 = vadd.f32 %v1043_v24, %v493_v43 }
 0x117   : > { %v621_v62 = vmul.f32 %v502_v54, %v502_v54  ;;  %v629_v34 = vmul.f32 %v534_v21, %v534_v21  ;;  %v630_v37 = vmul.f32 %v539_v25, %v539_v25  ;;  %v547_v38 = vadd.f32 %v1069_v4, %v1043_v24 }
 0x118   : > { %v649_v53 = vadd.f32 %v648_v49, %v618_v48  ;;  %v581_v56 = vadd.f32 %v580_v47, %v494_v50  ;;  %v619_v57 = vmul.f32 %v494_v50, %v494_v50  ;;  %v550_v40 = vadd.f32 %v1074_v12, %v1043_v24 }
 0x119   : > { %v631_v43 = vmul.f32 %v542_v44, %v542_v44  ;;  %v555_v47 = vadd.f32 %v1043_v24, %v1083_v35  ;;  %v632_v48 = vmul.f32 %v547_v38, %v547_v38  ;;  %v558_v4 = vadd.f32 %v1043_v24, %v1089_v45 }
 0x11a   : > { %v582_v59 = vadd.f32 %v581_v56, %v499_v42  ;;  %v650_v60 = vadd.f32 %v649_v53, %v619_v57  ;;  %v563_v56 = vadd.f32 %v1081_v32, %v1043_v24 }
 0x11c   : > { %v651_v63 = vadd.f32 %v650_v60, %v620_v58  ;;  %v583_v0 = vadd.f32 %v582_v59, %v502_v54  ;;  %v634_v54 = vmul.f32 %v555_v47, %v555_v47  ;;  %v566_v59 = vadd.f32 %v1086_v41, %v1043_v24 }
 0x11d   : > { %v635_v60 = vmul.f32 %v558_v4, %v558_v4 }
 0x11e   : > { %v584_v3 = vadd.f32 %v583_v0, %v507_v51  ;;  %v652_v28 = vadd.f32 %v651_v63, %v621_v62  ;;  %v633_v51 = vmul.f32 %v550_v40, %v550_v40  ;;  %v637_v0 = vmul.f32 %v566_v59, %v566_v59 }
 0x120   : > { %v653_v7 = vadd.f32 %v652_v28, %v622_v61  ;;  %v585_v8 = vadd.f32 %v584_v3, %v510_v1  ;;  %v636_v61 = vmul.f32 %v563_v56, %v563_v56 }
 0x122   : > { %v586_v13 = vadd.f32 %v585_v8, %v515_v2  ;;  %v654_v14 = vadd.f32 %v653_v7, %v623_v9 }
 0x124   : > { %v655_v17 = vadd.f32 %v654_v14, %v624_v11  ;;  %v587_v33 = vadd.f32 %v586_v13, %v518_v5 }
 0x126   : > { %v588_v31 = vadd.f32 %v587_v33, %v523_v10  ;;  %v656_v20 = vadd.f32 %v655_v17, %v625_v16 }
 0x128   : > { %v657_v22 = vadd.f32 %v656_v20, %v626_v18  ;;  %v589_v46 = vadd.f32 %v588_v31, %v526_v26 }
 0x12a   : > { %v590_v29 = vadd.f32 %v589_v46, %v531_v19  ;;  %v658_v30 = vadd.f32 %v657_v22, %v627_v23 }
 0x12c   : > { %v659_v36 = vadd.f32 %v658_v30, %v628_v27  ;;  %v591_v55 = vadd.f32 %v590_v29, %v534_v21 }
 0x12e   : > { %v592_v52 = vadd.f32 %v591_v55, %v539_v25  ;;  %v660_v39 = vadd.f32 %v659_v36, %v629_v34 }
 0x130   : > { %v661_v42 = vadd.f32 %v660_v39, %v630_v37  ;;  %v593_v6 = vadd.f32 %v592_v52, %v542_v44 }
 0x132   : > { %v594_v49 = vadd.f32 %v593_v6, %v547_v38  ;;  %v662_v50 = vadd.f32 %v661_v42, %v631_v43 }
 0x134   : > { %v663_v53 = vadd.f32 %v662_v50, %v632_v48  ;;  %v595_v15 = vadd.f32 %v594_v49, %v550_v40 }
 0x136   : > { %v596_v12 = vadd.f32 %v595_v15, %v555_v47  ;;  %v664_v57 = vadd.f32 %v663_v53, %v633_v51 }
 0x138   : > { %v665_v58 = vadd.f32 %v664_v57, %v634_v54  ;;  %v597_v35 = vadd.f32 %v596_v12, %v558_v4 }
 0x13a   : > { %v598_v62 = vadd.f32 %v597_v35, %v563_v56  ;;  %v666_v63 = vadd.f32 %v665_v58, %v635_v60 }
 0x13c   : > { %v599_v1 = vadd.f32 %v598_v62, %v566_v59  ;;  %v667_v2 = vadd.f32 %v666_v63, %v636_v61 }
 0x13e   : > { %v600_v3 = vrot.slane %v599_v1, 4  ;;  %v668_v45 = vadd.f32 %v667_v2, %v637_v0 }
 0x140   : > { %v601_v28 = vadd.f32 %v600_v3, %v599_v1  ;;  %v669_v5 = vrot.slane %v668_v45, 4 }
 0x142   : > { %v602_v32 = vrot.slane %v601_v28, 2  ;;  %v670_v7 = vadd.f32 %v669_v5, %v668_v45 }
 0x144   : > { %v603_v8 = vadd.f32 %v602_v32, %v601_v28  ;;  %v671_v9 = vrot.slane %v670_v7, 2 }
 0x146   : > { %v604_v10 = vrot.slane %v603_v8, 1  ;;  %v672_v11 = vadd.f32 %v671_v9, %v670_v7 }
 0x148   : > { %v673_v24 = vrot.slane %v672_v11, 1  ;;  %v605_v41 = vadd.f32 %v604_v10, %v603_v8 }
 0x14a   : > { %v674_v13 = vadd.f32 %v673_v24, %v672_v11 }
 0x14c   : > { %v676_v14 = vsel %vm675_vm0, %v605_v41, %v674_v13 }
 0x14d   : > { %677 = vst [vmem:[%s207_s18] sm:$0x3] %v676_v14 }
 0x14e PF: > { %s13_s14 = sadd.s32 1, %s952_s14   ;;  %s1142_s12 = smov %s948_s13 }
 0x14f   : > { %p10_p5 = scmp.ge.s32.totalorder %s13_s14, 4   ;;  %s1143_s13 = smov %s1145_s15 }
 0x151   :  { %12 = sbr.rel (!%p10_p5) target bundleno = 2 (0x2), region = 62 }

// kernel: contraction_block.5
= control target key start
LH: loop header
LB: loop body
LE: loop exit
PB: predicated region body
PF: predicated region fallthrough
CT: control target
= control target key end

     0   :  { %s1355_s18 = smov 0   ;;  %s1357_s19 = smov 0   ;;  %s1653_s0 = inlined_call_operand.vmem [shape: bf16[2,16,16,128], index: 0, kind: input, shape index: {}]   ;;  %s1654_s1 = inlined_call_operand.vmem [shape: bf16[128,128], index: 1, kind: input, shape index: {}]   ;;  %s1655_s2 = inlined_call_operand.vmem [shape: f32[1,128], index: 2, kind: input, shape index: {}]   ;;  %s1656_s3 = inlined_call_operand.vmem [shape: f32[1,128], index: 3, kind: input, shape index: {}]   ;;  %s1657_s4 = inlined_call_operand.vmem [shape: f32[1,128], index: 4, kind: input, shape index: {}]   ;;  %s1658_s5 = inlined_call_operand.vmem [shape: bf16[2,16,16,8], index: 5, kind: output, shape index: {}]  }
   0x1   :  { %s1359_s20 = smov 0  }
   0x2 LB: > { %s27_s21 = sadd.s32 1, %s1319_s19  ;;  %p1065_p0 = scmp.ge.s32.totalorder %s1323_s20, 1  ;;  %s1323_s20 = sphi %s1359_s20, %s15_s20   ;;  %s1319_s19 = sphi %s1357_s19, %s1660_s19   ;;  %s1315_s18 = sphi %s1355_s18, %s1659_s18  }
   0x3   : > { %p29_p1 = scmp.ge.s32.totalorder %s27_s21, 2  ;;  %p209_p2 = scmp.lt.s32.totalorder %s1323_s20, 3 }
   0x5   : > { %s1662_s21 = smov (%p29_p1, %s27_s21), 0  ;;  %p210_p3 = pnand %p1065_p0, %p209_p2 }
   0x6   : > { %v1277_v0 = vld [vmem:[%s1654_s1] sm:$0xff] (!%p210_p3)   ;;  %p248_p4 = scmp.lt.s32.totalorder (!%p210_p3), %s1315_s18, 1  ;;  %v1278_v1 = vld [vmem:[%s1654_s1 + $0x8] sm:$0xff] (!%p210_p3)   ;;  %v1279_v2 = vld [vmem:[%s1654_s1 + $0x10] sm:$0xff] (!%p210_p3)   ;;  %vm932_vm0 = vcmask (!%p210_p3), 60416  }
   0x7   : > { %213 = sbr.rel (%p210_p3) target bundleno = 315 (0x13b), region = 40  ;;  %1189 = vmatprep.subr.bf16.mxu0 (!%p210_p3), %v1277_v0  ;;  %1237 = vmatprep.subr.bf16.mxu1 (!%p210_p3), %v1277_v0  ;;  %v1280_v3 = vld [vmem:[%s1654_s1 + $0x18] sm:$0xff] (!%p210_p3)   ;;  %v1281_v6 = vld [vmem:[%s1654_s1 + $0x20] sm:$0xff] (!%p210_p3)   ;;  %v1282_v7 = vld [vmem:[%s1654_s1 + $0x28] sm:$0xff] (!%p210_p3)  }
   0x8   : > { %1190 = vmatpush3.bf16.msra.mxu0 (!%p210_p3), %v1277_v0  ;;  %1245 = vmatpush3.bf16.msra.mxu1 (!%p210_p3), %v1277_v0  ;;  %v1283_v8 = vld [vmem:[%s1654_s1 + $0x30] sm:$0xff] (!%p210_p3)   ;;  %v1284_v9 = vld [vmem:[%s1654_s1 + $0x38] sm:$0xff] (!%p210_p3)   ;;  %v1426_v24 = vld [vmem:[%s1655_s2] ss:$0 sm:$0xff] (!%p210_p3) }
   0x9   : > { %1191 = vmatprep.subr.bf16.mxu0 (!%p210_p3), %v1278_v1  ;;  %1238 = vmatprep.subr.bf16.mxu1 (!%p210_p3), %v1278_v1  ;;  %v1431_v26 = vld [vmem:[%s1656_s3] ss:$0 sm:$0xff] (!%p210_p3) }
   0xa   : > { %v1438_v32 = vld [vmem:[%s1657_s4] ss:$0 sm:$0xff] (!%p210_p3) }
   0xc   : > { %1192 = vmatpush3.bf16.msra.mxu0 (!%p210_p3), %v1278_v1  ;;  %1246 = vmatpush3.bf16.msra.mxu1 (!%p210_p3), %v1278_v1 }
   0xd   : > { %1193 = vmatprep.subr.bf16.mxu0 (!%p210_p3), %v1279_v2  ;;  %1239 = vmatprep.subr.bf16.mxu1 (!%p210_p3), %v1279_v2 }
   0xe   : > { %s1664_s18 = smov (!%p248_p4, %s1315_s18), 1 }
   0xf   : > { %s1131_s28 = sshll.u32 %s1664_s18, 7 }
  0x10   : > { %s1390_s6 = scalar_lea.vmem %s1653_s0, %s1131_s28  ;;  %1194 = vmatpush3.bf16.msra.mxu0 %v1279_v2  ;;  %1247 = vmatpush3.bf16.msra.mxu1 %v1279_v2  ;;  %s1463_s30 = scalar_lea.vmem %s1658_s5, %s1131_s28 }
  0x11   : > { %v1285_v4 = vld [vmem:[%s1390_s6] sm:$0xff]   ;;  %1195 = vmatprep.subr.bf16.mxu0 %v1280_v3  ;;  %1240 = vmatprep.subr.bf16.mxu1 %v1280_v3  ;;  %v1287_v10 = vld [vmem:[%s1390_s6 + $0x8] sm:$0xff]   ;;  %v1289_v12 = vld [vmem:[%s1390_s6 + $0x10] sm:$0xff]  }
  0x12   : > { %v1286_v5 = vld [vmem:[%s1390_s6 + $0x40] sm:$0xff]   ;;  %1205 = vmatprep.mubr.bf16.mxu0 %v1285_v4  ;;  %v1288_v11 = vld [vmem:[%s1390_s6 + $0x48] sm:$0xff]   ;;  %v1290_v13 = vld [vmem:[%s1390_s6 + $0x50] sm:$0xff]  }
  0x13   : > { %1221 = vmatprep.mubr.bf16.mxu1 %v1286_v5  ;;  %v1291_v14 = vld [vmem:[%s1390_s6 + $0x18] sm:$0xff]   ;;  %v1293_v16 = vld [vmem:[%s1390_s6 + $0x20] sm:$0xff]   ;;  %v1295_v18 = vld [vmem:[%s1390_s6 + $0x28] sm:$0xff]  }
  0x14   : > { %1196 = vmatpush3.bf16.msra.mxu0 %v1280_v3  ;;  %1248 = vmatpush3.bf16.msra.mxu1 %v1280_v3  ;;  %v1292_v15 = vld [vmem:[%s1390_s6 + $0x58] sm:$0xff]   ;;  %v1294_v17 = vld [vmem:[%s1390_s6 + $0x60] sm:$0xff]   ;;  %v1296_v19 = vld [vmem:[%s1390_s6 + $0x68] sm:$0xff]  }
  0x15   : > { %1197 = vmatprep.subr.bf16.mxu0 %v1281_v6  ;;  %1241 = vmatprep.subr.bf16.mxu1 %v1281_v6  ;;  %v1297_v20 = vld [vmem:[%s1390_s6 + $0x30] sm:$0xff]   ;;  %v1299_v22 = vld [vmem:[%s1390_s6 + $0x38] sm:$0xff]  }
  0x16   : > { %v1298_v21 = vld [vmem:[%s1390_s6 + $0x70] sm:$0xff]   ;;  %v1300_v23 = vld [vmem:[%s1390_s6 + $0x78] sm:$0xff]  }
  0x18   : > { %1198 = vmatpush3.bf16.msra.mxu0 %v1281_v6  ;;  %1249 = vmatpush3.bf16.msra.mxu1 %v1281_v6 }
  0x19   : > { %1199 = vmatprep.subr.bf16.mxu0 %v1282_v7  ;;  %1242 = vmatprep.subr.bf16.mxu1 %v1282_v7 }
  0x1c   : > { %1200 = vmatpush3.bf16.msra.mxu0 %v1282_v7  ;;  %1250 = vmatpush3.bf16.msra.mxu1 %v1282_v7 }
  0x1d   : > { %1201 = vmatprep.subr.bf16.mxu0 %v1283_v8  ;;  %1243 = vmatprep.subr.bf16.mxu1 %v1283_v8 }
  0x20   : > { %1202 = vmatpush3.bf16.msra.mxu0 %v1283_v8  ;;  %1251 = vmatpush3.bf16.msra.mxu1 %v1283_v8 }
  0x21   : > { %1203 = vmatprep.subr.bf16.mxu0 %v1284_v9  ;;  %1244 = vmatprep.subr.bf16.mxu1 %v1284_v9 }
  0x24   : > { %1204 = vmatpush3.bf16.msra.mxu0 %v1284_v9  ;;  %1252 = vmatpush3.bf16.msra.mxu1 %v1284_v9 }
  0x27   : > { %1206 = vmatmul.mubr.bf16.vlgmr.msra.gmra.mrb[0].mxu0 %v1287_v10  ;;  %1222 = vmatmul.mubr.bf16.vlgmr.msra.gmra.mrb[0].mxu1 %v1288_v11 }
  0x28   : > { %1209 = vmatprep.mubr.bf16.mxu0 %v1289_v12  ;;  %1225 = vmatprep.mubr.bf16.mxu1 %v1290_v13 }
  0x2f   : > { %1210 = vmatmul.mubr.bf16.gmra.mrb[4].mxu0 %v1291_v14  ;;  %1226 = vmatmul.mubr.bf16.gmra.mrb[4].mxu1 %v1292_v15 }
  0x30   : > { %1213 = vmatprep.mubr.bf16.mxu0 %v1293_v16  ;;  %1229 = vmatprep.mubr.bf16.mxu1 %v1294_v17 }
  0x37   : > { %1214 = vmatmul.mubr.bf16.gmra.mrb[8].mxu0 %v1295_v18  ;;  %1230 = vmatmul.mubr.bf16.gmra.mrb[8].mxu1 %v1296_v19 }
  0x38   : > { %1217 = vmatprep.mubr.bf16.mxu0 %v1297_v20  ;;  %1233 = vmatprep.mubr.bf16.mxu1 %v1298_v21 }
  0x3f   : > { %1218 = vmatmul.mubr.bf16.gmra.mrb[12].mxu0 %v1299_v22  ;;  %1234 = vmatmul.mubr.bf16.gmra.mrb[12].mxu1 %v1300_v23 }
  0xfa   : > { %v1207_v25 = vpop.f32.mrb[0].mxu0  ;;  %v1223_v27 = vpop.f32.mrb[0].mxu1 }
  0xfb   : > { %v512_v28 = vadd.f32 %v1207_v25, %v1426_v24  ;;  %v576_v29 = vadd.f32 %v1223_v27, %v1426_v24  ;;  %v503_v30 = vpop.f32.mrb[1].mxu0  ;;  %v567_v31 = vpop.f32.mrb[1].mxu1 }
  0xfc   : > { %v504_v33 = vadd.f32 %v1426_v24, %v503_v30  ;;  %v568_v34 = vadd.f32 %v1426_v24, %v567_v31  ;;  %v1208_v35 = vpop.f32.mrb[2].mxu0  ;;  %v1224_v36 = vpop.f32.mrb[2].mxu1 }
  0xfd   : > { %v639_v37 = vmul.f32 %v1431_v26, %v512_v28  ;;  %v655_v38 = vmul.f32 %v1431_v26, %v576_v29  ;;  %v515_v39 = vadd.f32 %v1208_v35, %v1426_v24  ;;  %v579_v40 = vadd.f32 %v1224_v36, %v1426_v24  ;;  %v506_v41 = vpop.f32.mrb[3].mxu0  ;;  %v570_v42 = vpop.f32.mrb[3].mxu1 }
  0xfe   : > { %v637_v43 = vmul.f32 %v1431_v26, %v504_v33  ;;  %v653_v44 = vmul.f32 %v1431_v26, %v568_v34  ;;  %v507_v45 = vadd.f32 %v1426_v24, %v506_v41  ;;  %v571_v46 = vadd.f32 %v1426_v24, %v570_v42 }
  0xff   : > { %v678_v47 = vadd.f32 %v1438_v32, %v639_v37  ;;  %v694_v48 = vadd.f32 %v1438_v32, %v655_v38  ;;  %v640_v49 = vmul.f32 %v1431_v26, %v515_v39  ;;  %v656_v50 = vmul.f32 %v1431_v26, %v579_v40 }
 0x100   : > { %v676_v51 = vadd.f32 %v1438_v32, %v637_v43  ;;  %v692_v52 = vadd.f32 %v1438_v32, %v653_v44  ;;  %v638_v53 = vmul.f32 %v1431_v26, %v507_v45  ;;  %v654_v54 = vmul.f32 %v1431_v26, %v571_v46 }
 0x101   : > { %vm710_vm1 = vcmp.gt.f32.partialorder %v678_v47, 0.0  ;;  %v742_v55 = vmul.f32 0.2, %v678_v47  ;;  %vm726_vm2 = vcmp.gt.f32.partialorder %v694_v48, 0.0  ;;  %v758_v56 = vmul.f32 0.2, %v694_v48 }
 0x102   : > { %vm708_vm3 = vcmp.gt.f32.partialorder %v676_v51, 0.0  ;;  %v740_v57 = vmul.f32 0.2, %v676_v51  ;;  %vm724_vm4 = vcmp.gt.f32.partialorder %v692_v52, 0.0  ;;  %v756_v58 = vmul.f32 0.2, %v692_v52 }
 0x103   : > { %v774_v59 = vsel %vm710_vm1, %v678_v47, %v742_v55  ;;  %v790_v60 = vsel %vm726_vm2, %v694_v48, %v758_v56  ;;  %v679_v61 = vadd.f32 %v1438_v32, %v640_v49  ;;  %v695_v62 = vadd.f32 %v1438_v32, %v656_v50  ;;  %v1211_v63 = vpop.f32.mrb[4].mxu0  ;;  %v1227_v0 = vpop.f32.mrb[4].mxu1 }
 0x104   : > { %v1135_v1 = vpack.c.bf16 %v774_v59, %v774_v59  ;;  %v1151_v2 = vpack.c.bf16 %v790_v60, %v790_v60  ;;  %v772_v3 = vsel %vm708_vm3, %v676_v51, %v740_v57  ;;  %v788_v4 = vsel %vm724_vm4, %v692_v52, %v756_v58  ;;  %v519_v5 = vpop.f32.mrb[5].mxu0  ;;  %v583_v6 = vpop.f32.mrb[5].mxu1 }
 0x105   : > { %v1133_v7 = vpack.c.bf16 %v772_v3, %v772_v3  ;;  %v1149_v8 = vpack.c.bf16 %v788_v4, %v788_v4  ;;  %vm711_vm5 = vcmp.gt.f32.partialorder %v679_v61, 0.0  ;;  %v743_v9 = vmul.f32 0.2, %v679_v61  ;;  %v1212_v10 = vpop.f32.mrb[6].mxu0  ;;  %v1228_v11 = vpop.f32.mrb[6].mxu1 }
 0x106   : > { %935 = vst.msk [vmem:[%s1463_s30 + $0x8] sm:$0xf] %vm932_vm0, %v1135_v1  ;;  %951 = vst.msk [vmem:[%s1463_s30 + $0x48] sm:$0xf] %vm932_vm0, %v1151_v2  ;;  %vm727_vm6 = vcmp.gt.f32.partialorder %v695_v62, 0.0  ;;  %v677_v13 = vadd.f32 %v1438_v32, %v638_v53  ;;  %v693_v14 = vadd.f32 %v1438_v32, %v654_v54  ;;  %v522_v15 = vpop.f32.mrb[7].mxu0  ;;  %v528_v18 = vadd.f32 %v1211_v63, %v1426_v24 }
 0x107   : > { %v759_v12 = vmul.f32 0.2, %v695_v62  ;;  %v1473_v16 = vpop.f32.mrb[7].mxu1  ;;  %933 = vst.msk [vmem:[%s1463_s30] sm:$0xf] %vm932_vm0, %v1133_v7  ;;  %v775_v17 = vsel %vm711_vm5, %v679_v61, %v743_v9  ;;  %v592_v19 = vadd.f32 %v1227_v0, %v1426_v24  ;;  %v520_v20 = vadd.f32 %v1426_v24, %v519_v5 }
 0x108   : > { %949 = vst.msk [vmem:[%s1463_s30 + $0x40] sm:$0xf] %vm932_vm0, %v1149_v8  ;;  %v1136_v21 = vpack.c.bf16 %v775_v17, %v775_v17  ;;  %vm709_vm7 = vcmp.gt.f32.partialorder %v677_v13, 0.0  ;;  %v741_v23 = vmul.f32 0.2, %v677_v13  ;;  %vm725_vm8 = vcmp.gt.f32.partialorder %v693_v14, 0.0 }
 0x109   : > { %v791_v22 = vsel %vm727_vm6, %v695_v62, %v759_v12  ;;  %v757_v27 = vmul.f32 0.2, %v693_v14  ;;  %v643_v28 = vmul.f32 %v1431_v26, %v528_v18  ;;  %v659_v30 = vmul.f32 %v1431_v26, %v592_v19 }
 0x10a   : > { %v1152_v25 = vpack.c.bf16 %v791_v22, %v791_v22  ;;  %936 = vst.msk [vmem:[%s1463_s30 + $0xc] sm:$0xf] %vm932_vm0, %v1136_v21  ;;  %v773_v29 = vsel %vm709_vm7, %v677_v13, %v741_v23  ;;  %v641_v31 = vmul.f32 %v1431_v26, %v520_v20  ;;  %v584_v33 = vadd.f32 %v1426_v24, %v583_v6  ;;  %v1215_v34 = vpop.f32.mrb[8].mxu0  ;;  %v1231_v35 = vpop.f32.mrb[8].mxu1 }
 0x10b   : > { %v1134_v36 = vpack.c.bf16 %v773_v29, %v773_v29  ;;  %v789_v37 = vsel %vm725_vm8, %v693_v14, %v757_v27  ;;  %v682_v38 = vadd.f32 %v1438_v32, %v643_v28  ;;  %v531_v39 = vadd.f32 %v1212_v10, %v1426_v24  ;;  %v535_v40 = vpop.f32.mrb[9].mxu0  ;;  %v599_v41 = vpop.f32.mrb[9].mxu1 }
 0x10c   : > { %952 = vst.msk [vmem:[%s1463_s30 + $0x4c] sm:$0xf] %vm932_vm0, %v1152_v25  ;;  %v1150_v42 = vpack.c.bf16 %v789_v37, %v789_v37  ;;  %v698_v43 = vadd.f32 %v1438_v32, %v659_v30  ;;  %v680_v44 = vadd.f32 %v1438_v32, %v641_v31  ;;  %v657_v45 = vmul.f32 %v1431_v26, %v584_v33  ;;  %v1495_v46 = vpop.f32.mrb[10].mxu0  ;;  %v1497_v47 = vpop.f32.mrb[10].mxu1 }
 0x10d   : > { %934 = vst.msk [vmem:[%s1463_s30 + $0x4] sm:$0xf] %vm932_vm0, %v1134_v36  ;;  %vm714_vm9 = vcmp.gt.f32.partialorder %v682_v38, 0.0  ;;  %v746_v48 = vmul.f32 0.2, %v682_v38  ;;  %v644_v49 = vmul.f32 %v1431_v26, %v531_v39  ;;  %v595_v50 = vadd.f32 %v1228_v11, %v1426_v24  ;;  %v1503_v51 = vpop.f32.mrb[11].mxu0 }
 0x10e   : > { %v1505_v52 = vpop.f32.mrb[11].mxu1  ;;  %950 = vst.msk [vmem:[%s1463_s30 + $0x44] sm:$0xf] %vm932_vm0, %v1150_v42  ;;  %vm730_vm10 = vcmp.gt.f32.partialorder %v698_v43, 0.0  ;;  %v762_v53 = vmul.f32 0.2, %v698_v43  ;;  %v696_v56 = vadd.f32 %v1438_v32, %v657_v45  ;;  %v523_v62 = vadd.f32 %v1426_v24, %v522_v15 }
 0x10f   : > { %vm712_vm11 = vcmp.gt.f32.partialorder %v680_v44, 0.0  ;;  %v744_v54 = vmul.f32 0.2, %v680_v44  ;;  %v778_v55 = vsel %vm714_vm9, %v682_v38, %v746_v48  ;;  %v683_v57 = vadd.f32 %v1438_v32, %v644_v49 }
 0x110   : > { %v660_v58 = vmul.f32 %v1431_v26, %v595_v50  ;;  %v1139_v59 = vpack.c.bf16 %v778_v55, %v778_v55  ;;  %v794_v60 = vsel %vm730_vm10, %v698_v43, %v762_v53  ;;  %vm728_vm12 = vcmp.gt.f32.partialorder %v696_v56, 0.0 }
 0x111   : > { %v776_v61 = vsel %vm712_vm11, %v680_v44, %v744_v54  ;;  %v1155_v63 = vpack.c.bf16 %v794_v60, %v794_v60  ;;  %v760_v1 = vmul.f32 0.2, %v696_v56  ;;  %vm715_vm13 = vcmp.gt.f32.partialorder %v683_v57, 0.0 }
 0x112   : > { %v1137_v0 = vpack.c.bf16 %v776_v61, %v776_v61  ;;  %939 = vst.msk [vmem:[%s1463_s30 + $0x18] sm:$0xf] %vm932_vm0, %v1139_v59  ;;  %v747_v2 = vmul.f32 0.2, %v683_v57  ;;  %v699_v3 = vadd.f32 %v1438_v32, %v660_v58  ;;  %v642_v4 = vmul.f32 %v1431_v26, %v523_v62  ;;  %v1517_v5 = vpop.f32.mrb[12].mxu0  ;;  %v1519_v6 = vpop.f32.mrb[12].mxu1 }
 0x113   : > { %955 = vst.msk [vmem:[%s1463_s30 + $0x58] sm:$0xf] %vm932_vm0, %v1155_v63  ;;  %v792_v7 = vsel %vm728_vm12, %v696_v56, %v760_v1  ;;  %v587_v8 = vadd.f32 %v1426_v24, %v1473_v16  ;;  %v544_v9 = vadd.f32 %v1215_v34, %v1426_v24  ;;  %v608_v10 = vadd.f32 %v1231_v35, %v1426_v24  ;;  %v1529_v11 = vpop.f32.mrb[13].mxu0  ;;  %v1531_v12 = vpop.f32.mrb[13].mxu1 }
 0x114   : > { %937 = vst.msk [vmem:[%s1463_s30 + $0x10] sm:$0xf] %vm932_vm0, %v1137_v0  ;;  %v1153_v13 = vpack.c.bf16 %v792_v7, %v792_v7  ;;  %v779_v14 = vsel %vm715_vm13, %v683_v57, %v747_v2  ;;  %vm731_vm14 = vcmp.gt.f32.partialorder %v699_v3, 0.0  ;;  %v763_v15 = vmul.f32 0.2, %v699_v3  ;;  %v1533_v17 = vpop.f32.mrb[14].mxu0 }
 0x115   : > { %v1535_v18 = vpop.f32.mrb[14].mxu1  ;;  %v1140_v19 = vpack.c.bf16 %v779_v14, %v779_v14  ;;  %v681_v16 = vadd.f32 %v1438_v32, %v642_v4  ;;  %v658_v20 = vmul.f32 %v1431_v26, %v587_v8  ;;  %v647_v21 = vmul.f32 %v1431_v26, %v544_v9  ;;  %v1540_v22 = vpop.f32.mrb[15].mxu0 }
 0x116   : > { %v1542_v23 = vpop.f32.mrb[15].mxu1  ;;  %953 = vst.msk [vmem:[%s1463_s30 + $0x50] sm:$0xf] %vm932_vm0, %v1153_v13  ;;  %v795_v25 = vsel %vm731_vm14, %v699_v3, %v763_v15  ;;  %v663_v27 = vmul.f32 %v1431_v26, %v608_v10  ;;  %v536_v28 = vadd.f32 %v1426_v24, %v535_v40  ;;  %v600_v29 = vadd.f32 %v1426_v24, %v599_v41 }
 0x117   : > { %940 = vst.msk [vmem:[%s1463_s30 + $0x1c] sm:$0xf] %vm932_vm0, %v1140_v19  ;;  %v1156_v30 = vpack.c.bf16 %v795_v25, %v795_v25  ;;  %vm713_vm15 = vcmp.gt.f32.partialorder %v681_v16, 0.0  ;;  %v745_v31 = vmul.f32 0.2, %v681_v16  ;;  %v697_v33 = vadd.f32 %v1438_v32, %v658_v20 }
 0x118   : > { %v686_v34 = vadd.f32 %v1438_v32, %v647_v21  ;;  %v702_v35 = vadd.f32 %v1438_v32, %v663_v27  ;;  %v645_v36 = vmul.f32 %v1431_v26, %v536_v28  ;;  %v661_v37 = vmul.f32 %v1431_v26, %v600_v29 }
 0x119   : > { %956 = vst.msk [vmem:[%s1463_s30 + $0x5c] sm:$0xf] %vm932_vm0, %v1156_v30  ;;  %v777_v38 = vsel %vm713_vm15, %v681_v16, %v745_v31  ;;  %vm729_vm1 = vcmp.gt.f32.partialorder %v697_v33, 0.0  ;;  %v761_v39 = vmul.f32 0.2, %v697_v33  ;;  %v547_v40 = vadd.f32 %v1495_v46, %v1426_v24 }
 0x11a   : > { %v1138_v41 = vpack.c.bf16 %v777_v38, %v777_v38  ;;  %vm718_vm2 = vcmp.gt.f32.partialorder %v686_v34, 0.0  ;;  %v750_v42 = vmul.f32 0.2, %v686_v34  ;;  %vm734_vm3 = vcmp.gt.f32.partialorder %v702_v35, 0.0 }
 0x11b   : > { %v793_v43 = vsel %vm729_vm1, %v697_v33, %v761_v39  ;;  %v766_v44 = vmul.f32 0.2, %v702_v35  ;;  %v684_v45 = vadd.f32 %v1438_v32, %v645_v36  ;;  %v700_v48 = vadd.f32 %v1438_v32, %v661_v37 }
 0x11c   : > { %938 = vst.msk [vmem:[%s1463_s30 + $0x14] sm:$0xf] %vm932_vm0, %v1138_v41  ;;  %v1154_v49 = vpack.c.bf16 %v793_v43, %v793_v43  ;;  %v782_v50 = vsel %vm718_vm2, %v686_v34, %v750_v42  ;;  %v648_v53 = vmul.f32 %v1431_v26, %v547_v40  ;;  %v611_v46 = vadd.f32 %v1497_v47, %v1426_v24 }
 0x11d   : > { %v1143_v54 = vpack.c.bf16 %v782_v50, %v782_v50  ;;  %v798_v55 = vsel %vm734_vm3, %v702_v35, %v766_v44  ;;  %vm716_vm4 = vcmp.gt.f32.partialorder %v684_v45, 0.0  ;;  %v748_v56 = vmul.f32 0.2, %v684_v45 }
 0x11e   : > { %954 = vst.msk [vmem:[%s1463_s30 + $0x54] sm:$0xf] %vm932_vm0, %v1154_v49  ;;  %v1159_v57 = vpack.c.bf16 %v798_v55, %v798_v55  ;;  %vm732_vm5 = vcmp.gt.f32.partialorder %v700_v48, 0.0  ;;  %v764_v58 = vmul.f32 0.2, %v700_v48  ;;  %v687_v59 = vadd.f32 %v1438_v32, %v648_v53 }
 0x11f   : > { %943 = vst.msk [vmem:[%s1463_s30 + $0x28] sm:$0xf] %vm932_vm0, %v1143_v54  ;;  %v780_v60 = vsel %vm716_vm4, %v684_v45, %v748_v56  ;;  %v664_v61 = vmul.f32 %v1431_v26, %v611_v46  ;;  %v539_v47 = vadd.f32 %v1426_v24, %v1503_v51  ;;  %v603_v62 = vadd.f32 %v1426_v24, %v1505_v52 }
 0x120   : > { %959 = vst.msk [vmem:[%s1463_s30 + $0x68] sm:$0xf] %vm932_vm0, %v1159_v57  ;;  %v1141_v63 = vpack.c.bf16 %v780_v60, %v780_v60  ;;  %v796_v0 = vsel %vm732_vm5, %v700_v48, %v764_v58  ;;  %vm719_vm6 = vcmp.gt.f32.partialorder %v687_v59, 0.0  ;;  %v751_v1 = vmul.f32 0.2, %v687_v59 }
 0x121   : > { %v1157_v2 = vpack.c.bf16 %v796_v0, %v796_v0  ;;  %v703_v3 = vadd.f32 %v1438_v32, %v664_v61  ;;  %v646_v4 = vmul.f32 %v1431_v26, %v539_v47  ;;  %v662_v7 = vmul.f32 %v1431_v26, %v603_v62 }
 0x122   : > { %941 = vst.msk [vmem:[%s1463_s30 + $0x20] sm:$0xf] %vm932_vm0, %v1141_v63  ;;  %v783_v51 = vsel %vm719_vm6, %v687_v59, %v751_v1  ;;  %v560_v52 = vadd.f32 %v1517_v5, %v1426_v24  ;;  %v624_v8 = vadd.f32 %v1519_v6, %v1426_v24  ;;  %v552_v9 = vadd.f32 %v1426_v24, %v1529_v11 }
 0x123   : > { %957 = vst.msk [vmem:[%s1463_s30 + $0x60] sm:$0xf] %vm932_vm0, %v1157_v2  ;;  %v1144_v10 = vpack.c.bf16 %v783_v51, %v783_v51  ;;  %vm735_vm7 = vcmp.gt.f32.partialorder %v703_v3, 0.0  ;;  %v767_v13 = vmul.f32 0.2, %v703_v3  ;;  %v685_v14 = vadd.f32 %v1438_v32, %v646_v4 }
 0x124   : > { %v701_v15 = vadd.f32 %v1438_v32, %v662_v7  ;;  %v651_v19 = vmul.f32 %v1431_v26, %v560_v52  ;;  %v667_v5 = vmul.f32 %v1431_v26, %v624_v8  ;;  %v649_v16 = vmul.f32 %v1431_v26, %v552_v9 }
 0x125   : > { %944 = vst.msk [vmem:[%s1463_s30 + $0x2c] sm:$0xf] %vm932_vm0, %v1144_v10  ;;  %v799_v6 = vsel %vm735_vm7, %v703_v3, %v767_v13  ;;  %vm717_vm8 = vcmp.gt.f32.partialorder %v685_v14, 0.0  ;;  %v749_v11 = vmul.f32 0.2, %v685_v14  ;;  %v616_v20 = vadd.f32 %v1426_v24, %v1531_v12 }
 0x126   : > { %v1160_v21 = vpack.c.bf16 %v799_v6, %v799_v6  ;;  %vm733_vm9 = vcmp.gt.f32.partialorder %v701_v15, 0.0  ;;  %v765_v25 = vmul.f32 0.2, %v701_v15  ;;  %v690_v27 = vadd.f32 %v1438_v32, %v651_v19 }
 0x127   : > { %v781_v28 = vsel %vm717_vm8, %v685_v14, %v749_v11  ;;  %v706_v29 = vadd.f32 %v1438_v32, %v667_v5  ;;  %v688_v30 = vadd.f32 %v1438_v32, %v649_v16  ;;  %v665_v31 = vmul.f32 %v1431_v26, %v616_v20 }
 0x128   : > { %960 = vst.msk [vmem:[%s1463_s30 + $0x6c] sm:$0xf] %vm932_vm0, %v1160_v21  ;;  %v1142_v33 = vpack.c.bf16 %v781_v28, %v781_v28  ;;  %v797_v34 = vsel %vm733_vm9, %v701_v15, %v765_v25  ;;  %vm722_vm10 = vcmp.gt.f32.partialorder %v690_v27, 0.0  ;;  %v754_v12 = vmul.f32 0.2, %v690_v27 }
 0x129   : > { %v1158_v35 = vpack.c.bf16 %v797_v34, %v797_v34  ;;  %vm738_vm11 = vcmp.gt.f32.partialorder %v706_v29, 0.0  ;;  %v770_v36 = vmul.f32 0.2, %v706_v29  ;;  %vm720_vm12 = vcmp.gt.f32.partialorder %v688_v30, 0.0 }
 0x12a   : > { %942 = vst.msk [vmem:[%s1463_s30 + $0x24] sm:$0xf] %vm932_vm0, %v1142_v33  ;;  %v786_v37 = vsel %vm722_vm10, %v690_v27, %v754_v12  ;;  %v752_v38 = vmul.f32 0.2, %v688_v30  ;;  %v704_v39 = vadd.f32 %v1438_v32, %v665_v31  ;;  %v563_v40 = vadd.f32 %v1533_v17, %v1426_v24 }
 0x12b   : > { %958 = vst.msk [vmem:[%s1463_s30 + $0x64] sm:$0xf] %vm932_vm0, %v1158_v35  ;;  %v1147_v41 = vpack.c.bf16 %v786_v37, %v786_v37  ;;  %v802_v42 = vsel %vm738_vm11, %v706_v29, %v770_v36  ;;  %v627_v43 = vadd.f32 %v1535_v18, %v1426_v24  ;;  %v555_v44 = vadd.f32 %v1426_v24, %v1540_v22 }
 0x12c   : > { %v1163_v45 = vpack.c.bf16 %v802_v42, %v802_v42  ;;  %v784_v48 = vsel %vm720_vm12, %v688_v30, %v752_v38  ;;  %vm736_vm13 = vcmp.gt.f32.partialorder %v704_v39, 0.0  ;;  %v768_v49 = vmul.f32 0.2, %v704_v39 }
 0x12d   : > { %947 = vst.msk [vmem:[%s1463_s30 + $0x38] sm:$0xf] %vm932_vm0, %v1147_v41  ;;  %v1145_v50 = vpack.c.bf16 %v784_v48, %v784_v48  ;;  %v652_v17 = vmul.f32 %v1431_v26, %v563_v40  ;;  %v668_v53 = vmul.f32 %v1431_v26, %v627_v43  ;;  %v650_v46 = vmul.f32 %v1431_v26, %v555_v44 }
 0x12e   : > { %963 = vst.msk [vmem:[%s1463_s30 + $0x78] sm:$0xf] %vm932_vm0, %v1163_v45  ;;  %v800_v18 = vsel %vm736_vm13, %v704_v39, %v768_v49  ;;  %v619_v22 = vadd.f32 %v1426_v24, %v1542_v23 }
 0x12f   : > { %945 = vst.msk [vmem:[%s1463_s30 + $0x30] sm:$0xf] %vm932_vm0, %v1145_v50  ;;  %v1161_v54 = vpack.c.bf16 %v800_v18, %v800_v18  ;;  %v691_v55 = vadd.f32 %v1438_v32, %v652_v17  ;;  %v707_v56 = vadd.f32 %v1438_v32, %v668_v53  ;;  %v689_v57 = vadd.f32 %v1438_v32, %v650_v46 }
 0x130   : > { %v666_v58 = vmul.f32 %v1431_v26, %v619_v22 }
 0x131   : > { %961 = vst.msk [vmem:[%s1463_s30 + $0x70] sm:$0xf] %vm932_vm0, %v1161_v54  ;;  %vm723_vm14 = vcmp.gt.f32.partialorder %v691_v55, 0.0  ;;  %v755_v59 = vmul.f32 0.2, %v691_v55  ;;  %vm739_vm15 = vcmp.gt.f32.partialorder %v707_v56, 0.0 }
 0x132   : > { %v771_v24 = vmul.f32 0.2, %v707_v56  ;;  %vm721_vm1 = vcmp.gt.f32.partialorder %v689_v57, 0.0  ;;  %v753_v23 = vmul.f32 0.2, %v689_v57  ;;  %v705_v60 = vadd.f32 %v1438_v32, %v666_v58 }
 0x133   : > { %v787_v61 = vsel %vm723_vm14, %v691_v55, %v755_v59 }
 0x134   : > { %v803_v47 = vsel %vm739_vm15, %v707_v56, %v771_v24  ;;  %v1148_v62 = vpack.c.bf16 %v787_v61, %v787_v61  ;;  %v785_v0 = vsel %vm721_vm1, %v689_v57, %v753_v23  ;;  %vm737_vm2 = vcmp.gt.f32.partialorder %v705_v60, 0.0 }
 0x135   : > { %v1164_v63 = vpack.c.bf16 %v803_v47, %v803_v47  ;;  %v1146_v26 = vpack.c.bf16 %v785_v0, %v785_v0  ;;  %v769_v1 = vmul.f32 0.2, %v705_v60 }
 0x136   : > { %948 = vst.msk [vmem:[%s1463_s30 + $0x3c] sm:$0xf] %vm932_vm0, %v1148_v62 }
 0x137   : > { %964 = vst.msk [vmem:[%s1463_s30 + $0x7c] sm:$0xf] %vm932_vm0, %v1164_v63  ;;  %946 = vst.msk [vmem:[%s1463_s30 + $0x34] sm:$0xf] %vm932_vm0, %v1146_v26  ;;  %v801_v2 = vsel %vm737_vm2, %v705_v60, %v769_v1 }
 0x138   : > { %v1162_v3 = vpack.c.bf16 %v801_v2, %v801_v2 }
 0x13a   : > { %962 = vst.msk [vmem:[%s1463_s30 + $0x74] sm:$0xf] %vm932_vm0, %v1162_v3 }
 0x13b PF: > { %s15_s20 = sadd.s32 1, %s1323_s20   ;;  %s1659_s18 = smov %s1319_s19 }
 0x13c   : > { %p12_p5 = scmp.ge.s32.totalorder %s15_s20, 4   ;;  %s1660_s19 = smov %s1662_s21 }
 0x13e   :  { %14 = sbr.rel (!%p12_p5) target bundleno = 2 (0x2), region = 70 }

// kernel: contraction_block.7
= control target key start
LH: loop header
LB: loop body
LE: loop exit
PB: predicated region body
PF: predicated region fallthrough
CT: control target
= control target key end

     0   :  { %s2673_s24 = smov 0   ;;  %s2675_s25 = smov 0   ;;  %s3473_s0 = inlined_call_operand.vmem [shape: bf16[2,16,16,128], index: 0, kind: input, shape index: {}]   ;;  %s3474_s1 = inlined_call_operand.vmem [shape: bf16[128,128], index: 1, kind: input, shape index: {}]   ;;  %s3475_s2 = inlined_call_operand.vmem [shape: f32[1,128], index: 2, kind: input, shape index: {}]   ;;  %s3476_s3 = inlined_call_operand.vmem [shape: f32[1,128], index: 3, kind: input, shape index: {}]   ;;  %s3477_s4 = inlined_call_operand.vmem [shape: f32[1,128], index: 4, kind: input, shape index: {}]   ;;  %s3478_s5 = inlined_call_operand.vmem [shape: bf16[2,8,8,8], index: 5, kind: input, shape index: {}]   ;;  %s3479_s6 = inlined_call_operand.vmem [shape: f32[2,16,16,8], index: 6, kind: output, shape index: {0}]   ;;  %s3480_s7 = inlined_call_operand.vmem [shape: f32[2,8,8,8], index: 7, kind: output, shape index: {1}]  }
   0x1   :  { %s2677_s26 = smov 0  }
   0x2 LB: > { %s30_s27 = sadd.s32 1, %s2626_s25  ;;  %p2407_p0 = scmp.ge.s32.totalorder %s2630_s26, 1  ;;  %s2630_s26 = sphi %s2677_s26, %s18_s26   ;;  %s2626_s25 = sphi %s2675_s25, %s3502_s25   ;;  %s2622_s24 = sphi %s2673_s24, %s3501_s24  }
   0x3   : > { %p32_p1 = scmp.ge.s32.totalorder %s30_s27, 2  ;;  %p281_p2 = scmp.lt.s32.totalorder %s2630_s26, 3 }
   0x5   : > { %s3504_s27 = smov (%p32_p1, %s30_s27), 0  ;;  %p282_p3 = pnand %p2407_p0, %p281_p2 }
   0x6   : > { %v2581_v0 = vld [vmem:[%s3474_s1] sm:$0xff] (!%p282_p3)   ;;  %p342_p4 = scmp.lt.s32.totalorder (!%p282_p3), %s2622_s24, 1  ;;  %v2582_v1 = vld [vmem:[%s3474_s1 + $0x8] sm:$0xff] (!%p282_p3)   ;;  %v2583_v2 = vld [vmem:[%s3474_s1 + $0x10] sm:$0xff] (!%p282_p3)   ;;  %v2632_v24 = vmov (!%p282_p3), 1983009808   ;;  %v987_v26 = vlaneseq (!%p282_p3) }
   0x7   : > { %285 = sbr.rel (%p282_p3) target bundleno = 516 (0x204), region = 44  ;;  %2492 = vmatprep.subr.bf16.mxu0 (!%p282_p3), %v2581_v0  ;;  %2540 = vmatprep.subr.bf16.mxu1 (!%p282_p3), %v2581_v0  ;;  %v2584_v3 = vld [vmem:[%s3474_s1 + $0x18] sm:$0xff] (!%p282_p3)   ;;  %v2585_v6 = vld [vmem:[%s3474_s1 + $0x20] sm:$0xff] (!%p282_p3)   ;;  %v2586_v7 = vld [vmem:[%s3474_s1 + $0x28] sm:$0xff] (!%p282_p3)   ;;  %v985_v25 = vunpack.c.l.s4 (!%p282_p3), %v2632_v24  ;;  %vm918_vm0 = vcmask (!%p282_p3), 64512   ;;  %vm1319_vm1 = vcmask (!%p282_p3), 1041408  }
   0x8   : > { %2493 = vmatpush3.bf16.msra.mxu0 (!%p282_p3), %v2581_v0  ;;  %2548 = vmatpush3.bf16.msra.mxu1 (!%p282_p3), %v2581_v0  ;;  %v2587_v8 = vld [vmem:[%s3474_s1 + $0x30] sm:$0xff] (!%p282_p3)   ;;  %v2588_v9 = vld [vmem:[%s3474_s1 + $0x38] sm:$0xff] (!%p282_p3)   ;;  %v988_v30 = vshrl.u32 (!%p282_p3), %v987_v26, 7  ;;  %v2768_v44 = vld [vmem:[%s3475_s2] ss:$0 sm:$0xff] (!%p282_p3)  ;;  %vm2105_vm9 = vcmask (!%p282_p3), 1041409  }
   0x9   : > { %2494 = vmatprep.subr.bf16.mxu0 (!%p282_p3), %v2582_v1  ;;  %2541 = vmatprep.subr.bf16.mxu1 (!%p282_p3), %v2582_v1  ;;  %v986_v29 = vunpack.c.0.s8 (!%p282_p3), %v985_v25  ;;  %v2777_v49 = vld [vmem:[%s3476_s3] ss:$0 sm:$0xff] (!%p282_p3)  ;;  %vm2108_vm10 = vcmask (!%p282_p3), 1042434   ;;  %vm2111_vm11 = vcmask (!%p282_p3), 1043459   ;;  %vm2114_vm13 = vcmask (!%p282_p3), 1044484  }
   0xa   : > { %vm2117_vm14 = vcmask (!%p282_p3), 1045509   ;;  %vm2120_vm15 = vcmask (!%p282_p3), 1046534  }
   0xb   : > { %v2751_v33 = vsub.s32 (!%p282_p3), %v986_v29, %v988_v30 }
   0xc   : > { %2495 = vmatpush3.bf16.msra.mxu0 (!%p282_p3), %v2582_v1  ;;  %2549 = vmatpush3.bf16.msra.mxu1 (!%p282_p3), %v2582_v1 }
   0xd   : > { %2496 = vmatprep.subr.bf16.mxu0 (!%p282_p3), %v2583_v2  ;;  %2542 = vmatprep.subr.bf16.mxu1 (!%p282_p3), %v2583_v2 }
   0xe   : > { %s3506_s24 = smov (!%p342_p4, %s2622_s24), 1 }
   0xf   : > { %s2445_s11 = sshll.u32 %s3506_s24, 7  ;;  %s2446_s29 = sshll.u32 %s3506_s24, 5 }
  0x10   : > { %s2706_s14 = scalar_lea.vmem %s3473_s0, %s2445_s11  ;;  %2497 = vmatpush3.bf16.msra.mxu0 %v2583_v2  ;;  %2550 = vmatpush3.bf16.msra.mxu1 %v2583_v2  ;;  %s2743_s9 = scalar_lea.vmem %s3478_s5, %s2446_s29  ;;  %v2794_v2 = vld [vmem:[%s3477_s4] ss:$0 sm:$0xff] }
  0x11   : > { %v2589_v4 = vld [vmem:[%s2706_s14] sm:$0xff]   ;;  %2498 = vmatprep.subr.bf16.mxu0 %v2584_v3  ;;  %2543 = vmatprep.subr.bf16.mxu1 %v2584_v3  ;;  %v2591_v10 = vld [vmem:[%s2706_s14 + $0x8] sm:$0xff]   ;;  %v2593_v12 = vld [vmem:[%s2706_s14 + $0x10] sm:$0xff]   ;;  %s2447_s16 = sshll.u32 %s3506_s24, 8  ;;  %s2448_s20 = sshll.u32 %s3506_s24, 6 }
  0x12   : > { %v2590_v5 = vld [vmem:[%s2706_s14 + $0x40] sm:$0xff]   ;;  %2508 = vmatprep.mubr.bf16.mxu0 %v2589_v4  ;;  %v2592_v11 = vld [vmem:[%s2706_s14 + $0x48] sm:$0xff]   ;;  %v2594_v13 = vld [vmem:[%s2706_s14 + $0x50] sm:$0xff]   ;;  %s2820_s19 = scalar_lea.vmem %s3479_s6, %s2447_s16  ;;  %s2975_s23 = scalar_lea.vmem %s3480_s7, %s2448_s20 }
  0x13   : > { %2524 = vmatprep.mubr.bf16.mxu1 %v2590_v5  ;;  %v2595_v14 = vld [vmem:[%s2706_s14 + $0x18] sm:$0xff]   ;;  %v2597_v16 = vld [vmem:[%s2706_s14 + $0x20] sm:$0xff]   ;;  %v2599_v18 = vld [vmem:[%s2706_s14 + $0x28] sm:$0xff]  }
  0x14   : > { %2499 = vmatpush3.bf16.msra.mxu0 %v2584_v3  ;;  %2551 = vmatpush3.bf16.msra.mxu1 %v2584_v3  ;;  %v2596_v15 = vld [vmem:[%s2706_s14 + $0x58] sm:$0xff]   ;;  %v2598_v17 = vld [vmem:[%s2706_s14 + $0x60] sm:$0xff]   ;;  %v2600_v19 = vld [vmem:[%s2706_s14 + $0x68] sm:$0xff]  }
  0x15   : > { %2500 = vmatprep.subr.bf16.mxu0 %v2585_v6  ;;  %2544 = vmatprep.subr.bf16.mxu1 %v2585_v6  ;;  %v2601_v20 = vld [vmem:[%s2706_s14 + $0x30] sm:$0xff]   ;;  %v2603_v22 = vld [vmem:[%s2706_s14 + $0x38] sm:$0xff]   ;;  %v2450_v27 = vld [vmem:[%s2743_s9] sm:$0xff]  }
  0x16   : > { %v2602_v21 = vld [vmem:[%s2706_s14 + $0x70] sm:$0xff]   ;;  %v2604_v23 = vld [vmem:[%s2706_s14 + $0x78] sm:$0xff]   ;;  %v2747_v31 = vunpack.c.l.bf16 %v2450_v27  ;;  %v2754_v35 = vunpack.c.h.bf16 %v2450_v27 }
  0x17   : > { %v2466_v28 = vld [vmem:[%s2743_s9 + $0x10] sm:$0xff]  }
  0x18   : > { %2501 = vmatpush3.bf16.msra.mxu0 %v2585_v6  ;;  %2552 = vmatpush3.bf16.msra.mxu1 %v2585_v6  ;;  %v2749_v32 = vunpack.c.l.bf16 %v2466_v28  ;;  %v1792_v34 = vrot.slane %v2747_v31, 1  ;;  %v1793_v36 = vrot.slane %v2747_v31, 2  ;;  %v1794_v37 = vrot.slane %v2747_v31, 3 }
  0x19   : > { %2502 = vmatprep.subr.bf16.mxu0 %v2586_v7  ;;  %2545 = vmatprep.subr.bf16.mxu1 %v2586_v7  ;;  %v2759_v39 = vunpack.c.h.bf16 %v2466_v28 }
  0x1a   : > { %v1820_v38 = vrot.slane %v2749_v32, 1  ;;  %v1821_v40 = vrot.slane %v2749_v32, 2 }
  0x1c   : > { %2503 = vmatpush3.bf16.msra.mxu0 %v2586_v7  ;;  %2553 = vmatpush3.bf16.msra.mxu1 %v2586_v7 }
  0x1d   : > { %2504 = vmatprep.subr.bf16.mxu0 %v2587_v8  ;;  %2546 = vmatprep.subr.bf16.mxu1 %v2587_v8 }
  0x20   : > { %2505 = vmatpush3.bf16.msra.mxu0 %v2587_v8  ;;  %2554 = vmatpush3.bf16.msra.mxu1 %v2587_v8 }
  0x21   : > { %2506 = vmatprep.subr.bf16.mxu0 %v2588_v9  ;;  %2547 = vmatprep.subr.bf16.mxu1 %v2588_v9 }
  0x24   : > { %2507 = vmatpush3.bf16.msra.mxu0 %v2588_v9  ;;  %2555 = vmatpush3.bf16.msra.mxu1 %v2588_v9 }
  0x27   : > { %2509 = vmatmul.mubr.bf16.vlgmr.msra.gmra.mrb[0].mxu0 %v2591_v10  ;;  %2525 = vmatmul.mubr.bf16.vlgmr.msra.gmra.mrb[0].mxu1 %v2592_v11 }
  0x28   : > { %2512 = vmatprep.mubr.bf16.mxu0 %v2593_v12  ;;  %2528 = vmatprep.mubr.bf16.mxu1 %v2594_v13 }
  0x2f   : > { %2513 = vmatmul.mubr.bf16.gmra.mrb[4].mxu0 %v2595_v14  ;;  %2529 = vmatmul.mubr.bf16.gmra.mrb[4].mxu1 %v2596_v15 }
  0x30   : > { %2516 = vmatprep.mubr.bf16.mxu0 %v2597_v16  ;;  %2532 = vmatprep.mubr.bf16.mxu1 %v2598_v17 }
  0x37   : > { %2517 = vmatmul.mubr.bf16.gmra.mrb[8].mxu0 %v2599_v18  ;;  %2533 = vmatmul.mubr.bf16.gmra.mrb[8].mxu1 %v2600_v19 }
  0x38   : > { %2520 = vmatprep.mubr.bf16.mxu0 %v2601_v20  ;;  %2536 = vmatprep.mubr.bf16.mxu1 %v2602_v21 }
  0x3f   : > { %2521 = vmatmul.mubr.bf16.gmra.mrb[12].mxu0 %v2603_v22  ;;  %2537 = vmatmul.mubr.bf16.gmra.mrb[12].mxu1 %v2604_v23 }
  0xfa   : > { %v2510_v54 = vpop.f32.mrb[0].mxu0  ;;  %v2526_v55 = vpop.f32.mrb[0].mxu1 }
  0xfb   : > { %v626_v60 = vadd.f32 %v2510_v54, %v2768_v44  ;;  %v690_v61 = vadd.f32 %v2526_v55, %v2768_v44  ;;  %v617_v62 = vpop.f32.mrb[1].mxu0  ;;  %v681_v63 = vpop.f32.mrb[1].mxu1 }
  0xfc   : > { %v618_v3 = vadd.f32 %v2768_v44, %v617_v62  ;;  %v682_v4 = vadd.f32 %v2768_v44, %v681_v63  ;;  %v2511_v5 = vpop.f32.mrb[2].mxu0  ;;  %v2527_v6 = vpop.f32.mrb[2].mxu1 }
  0xfd   : > { %v753_v9 = vmul.f32 %v2777_v49, %v626_v60  ;;  %v769_v10 = vmul.f32 %v2777_v49, %v690_v61  ;;  %v629_v11 = vadd.f32 %v2511_v5, %v2768_v44  ;;  %v693_v12 = vadd.f32 %v2527_v6, %v2768_v44  ;;  %v620_v13 = vpop.f32.mrb[3].mxu0  ;;  %v684_v14 = vpop.f32.mrb[3].mxu1 }
  0xfe   : > { %v751_v15 = vmul.f32 %v2777_v49, %v618_v3  ;;  %v767_v16 = vmul.f32 %v2777_v49, %v682_v4  ;;  %v621_v17 = vadd.f32 %v2768_v44, %v620_v13  ;;  %v685_v26 = vadd.f32 %v2768_v44, %v684_v14 }
  0xff   : > { %v792_v19 = vadd.f32 %v2794_v2, %v753_v9  ;;  %v808_v20 = vadd.f32 %v2794_v2, %v769_v10  ;;  %v754_v21 = vmul.f32 %v2777_v49, %v629_v11  ;;  %v770_v22 = vmul.f32 %v2777_v49, %v693_v12 }
 0x100   : > { %v790_v23 = vadd.f32 %v2794_v2, %v751_v15  ;;  %v806_v24 = vadd.f32 %v2794_v2, %v767_v16  ;;  %v752_v25 = vmul.f32 %v2777_v49, %v621_v17  ;;  %v768_v6 = vmul.f32 %v2777_v49, %v685_v26 }
 0x101   : > { %vm824_vm2 = vcmp.gt.f32.partialorder %v792_v19, 0.0  ;;  %v856_v27 = vmul.f32 0.2, %v792_v19  ;;  %vm840_vm3 = vcmp.gt.f32.partialorder %v808_v20, 0.0  ;;  %v872_v28 = vmul.f32 0.2, %v808_v20 }
 0x102   : > { %vm822_vm4 = vcmp.gt.f32.partialorder %v790_v23, 0.0  ;;  %v854_v29 = vmul.f32 0.2, %v790_v23  ;;  %vm838_vm5 = vcmp.gt.f32.partialorder %v806_v24, 0.0  ;;  %v870_v30 = vmul.f32 0.2, %v806_v24 }
 0x103   : > { %v888_v54 = vsel %vm824_vm2, %v792_v19, %v856_v27  ;;  %v904_v55 = vsel %vm840_vm3, %v808_v20, %v872_v28  ;;  %v793_v60 = vadd.f32 %v2794_v2, %v754_v21  ;;  %v809_v61 = vadd.f32 %v2794_v2, %v770_v22  ;;  %v2824_v62 = vpop.f32.mrb[4].mxu0  ;;  %v2826_v63 = vpop.f32.mrb[4].mxu1 }
 0x104   : > { %921 = vst.msk [vmem:[%s2820_s19 + $0x10] sm:$0xff] %vm918_vm0, %v888_v54  ;;  %937 = vst.msk [vmem:[%s2820_s19 + $0x90] sm:$0xff] %vm918_vm0, %v904_v55  ;;  %v886_v3 = vsel %vm822_vm4, %v790_v23, %v854_v29  ;;  %v902_v4 = vsel %vm838_vm5, %v806_v24, %v870_v30  ;;  %v791_v5 = vadd.f32 %v2794_v2, %v752_v25  ;;  %v2834_v9 = vpop.f32.mrb[5].mxu0  ;;  %v2836_v10 = vpop.f32.mrb[5].mxu1  ;;  %vm2123_vm2 = vcmask 1047559  }
 0x105   : > { %919 = vst.msk [vmem:[%s2820_s19] sm:$0xff] %vm918_vm0, %v886_v3  ;;  %v951_v11 = vmax.f32 %v886_v3, %v888_v54  ;;  %935 = vst.msk [vmem:[%s2820_s19 + $0x80] sm:$0xff] %vm918_vm0, %v902_v4  ;;  %v959_v12 = vmax.f32 %v902_v4, %v904_v55  ;;  %vm825_vm6 = vcmp.gt.f32.partialorder %v793_v60, 0.0  ;;  %v857_v13 = vmul.f32 0.2, %v793_v60  ;;  %v2842_v14 = vpop.f32.mrb[6].mxu0 }
 0x106   : > { %v2844_v15 = vpop.f32.mrb[6].mxu1  ;;  %vm841_vm7 = vcmp.gt.f32.partialorder %v809_v61, 0.0  ;;  %v873_v16 = vmul.f32 0.2, %v809_v61  ;;  %vm823_vm8 = vcmp.gt.f32.partialorder %v791_v5, 0.0  ;;  %v2848_v23 = vpop.f32.mrb[7].mxu0  ;;  %v2855_v28 = vadd.f32 %v2794_v2, %v768_v6 }
 0x107   : > { %v855_v17 = vmul.f32 0.2, %v791_v5  ;;  %v983_v19 = vcombine.high %v951_v11, %v951_v11  ;;  %v990_v20 = vrot.slane %v951_v11, %v2751_v33  ;;  %v1119_v21 = vcombine.high %v959_v12, %v959_v12  ;;  %v2850_v24 = vpop.f32.mrb[7].mxu1 }
 0x108   : > { %v1126_v22 = vrot.slane %v959_v12, %v2751_v33  ;;  %v889_v25 = vsel %vm825_vm6, %v793_v60, %v857_v13  ;;  %v2852_v26 = vsel %vm841_vm7, %v809_v61, %v873_v16  ;;  %vm839_vm12 = vcmp.gt.f32.partialorder %v2855_v28, 0.0 }
 0x109   : > { %v887_v27 = vsel %vm823_vm8, %v791_v5, %v855_v17  ;;  %v997_v29 = vrot.slane %v983_v19, %v2751_v33  ;;  %v998_v30 = vcombine.high %v990_v20, %v990_v20  ;;  %v1320_v54 = vsel %vm1319_vm1, %v990_v20, -inf  ;;  %922 = vst.msk [vmem:[%s2820_s19 + $0x18] sm:$0xff] %vm918_vm0, %v889_v25  ;;  %938 = vst.msk [vmem:[%s2820_s19 + $0x98] sm:$0xff] %vm918_vm0, %v2852_v26 }
 0x10a   : > { %v1133_v55 = vrot.slane %v1119_v21, %v2751_v33  ;;  %920 = vst.msk [vmem:[%s2820_s19 + $0x8] sm:$0xff] %vm918_vm0, %v887_v27  ;;  %v1321_v60 = vrot.slane %v1320_v54, 4  ;;  %v1134_v61 = vcombine.high %v1126_v22, %v1126_v22  ;;  %v1544_v3 = vsel %vm1319_vm1, %v1126_v22, -inf  ;;  %v2870_v5 = vpop.f32.mrb[8].mxu0  ;;  %v2872_v6 = vpop.f32.mrb[8].mxu1 }
 0x10b   : > { %v2868_v4 = vmax.f32 %v887_v27, %v889_v25  ;;  %v999_v11 = vcombine.high %v997_v29, %v997_v29  ;;  %v1327_v12 = vsel %vm1319_vm1, %v998_v30, -inf  ;;  %v1334_v13 = vsel %vm1319_vm1, %v997_v29, -inf  ;;  %v2876_v17 = vpop.f32.mrb[9].mxu0  ;;  %v2878_v19 = vpop.f32.mrb[9].mxu1 }
 0x10c   : > { %v1135_v16 = vcombine.high %v1133_v55, %v1133_v55  ;;  %v1322_v20 = vmax.f32 %v1320_v54, %v1321_v60  ;;  %v1328_v21 = vrot.slane %v1327_v12, 4  ;;  %v1335_v18 = vrot.slane %v1334_v13, 4  ;;  %v2880_v25 = vpop.f32.mrb[10].mxu0  ;;  %v2882_v27 = vpop.f32.mrb[10].mxu1 }
 0x10d   : > { %v1545_v22 = vrot.slane %v1544_v3, 4  ;;  %v1341_v8 = vsel %vm1319_vm1, %v999_v11, -inf  ;;  %v1551_v7 = vsel %vm1319_vm1, %v1134_v61, -inf  ;;  %v1558_v30 = vsel %vm1319_vm1, %v1133_v55, -inf  ;;  %v2888_v1 = vpop.f32.mrb[11].mxu0  ;;  %v2890_v0 = vpop.f32.mrb[11].mxu1 }
 0x10e   : > { %v1565_v29 = vsel %vm1319_vm1, %v1135_v16, -inf  ;;  %v1323_v54 = vrot.slane %v1322_v20, 2  ;;  %v1329_v60 = vmax.f32 %v1327_v12, %v1328_v21  ;;  %v1336_v59 = vmax.f32 %v1334_v13, %v1335_v18 }
 0x10f   : > { %v1342_v58 = vrot.slane %v1341_v8, 4  ;;  %v1546_v57 = vmax.f32 %v1544_v3, %v1545_v22  ;;  %v1552_v56 = vrot.slane %v1551_v7, 4  ;;  %v1559_v53 = vrot.slane %v1558_v30, 4 }
 0x110   : > { %v1566_v52 = vrot.slane %v1565_v29, 4  ;;  %v1324_v51 = vmax.f32 %v1322_v20, %v1323_v54  ;;  %v1330_v11 = vrot.slane %v1329_v60, 2  ;;  %v1337_v50 = vrot.slane %v1336_v59, 2 }
 0x111   : > { %v1343_v61 = vmax.f32 %v1341_v8, %v1342_v58  ;;  %v1547_v48 = vrot.slane %v1546_v57, 2  ;;  %v1553_v55 = vmax.f32 %v1551_v7, %v1552_v56  ;;  %v1560_v47 = vmax.f32 %v1558_v30, %v1559_v53 }
 0x112   : > { %v1567_v16 = vmax.f32 %v1565_v29, %v1566_v52  ;;  %v1325_v46 = vrot.slane %v1324_v51, 1  ;;  %v1331_v45 = vmax.f32 %v1329_v60, %v1330_v11  ;;  %v1338_v43 = vmax.f32 %v1336_v59, %v1337_v50 }
 0x113   : > { %v1344_v42 = vrot.slane %v1343_v61, 2  ;;  %v1548_v12 = vmax.f32 %v1546_v57, %v1547_v48  ;;  %v1554_v18 = vrot.slane %v1553_v55, 2  ;;  %v1561_v13 = vrot.slane %v1560_v47, 2 }
 0x114   : > { %v1568_v3 = vrot.slane %v1567_v16, 2  ;;  %v1326_v21 = vmax.f32 %v1324_v51, %v1325_v46  ;;  %v1332_v22 = vrot.slane %v1331_v45, 1  ;;  %v1339_v41 = vrot.slane %v1338_v43, 1 }
 0x115   : > { %v1345_v20 = vmax.f32 %v1343_v61, %v1344_v42  ;;  %v1549_v54 = vrot.slane %v1548_v12, 1  ;;  %v1555_v58 = vmax.f32 %v1553_v55, %v1554_v18  ;;  %v1562_v8 = vmax.f32 %v1560_v47, %v1561_v13 }
 0x116   : > { %v1569_v56 = vmax.f32 %v1567_v16, %v1568_v3  ;;  %v1333_v53 = vmax.f32 %v1331_v45, %v1332_v22  ;;  %v1340_v52 = vmax.f32 %v1338_v43, %v1339_v41  ;;  %v1912_v50 = vmul.f32 %v2747_v31, %v1326_v21 }
 0x117   : > { %v1346_v7 = vrot.slane %v1345_v20, 1  ;;  %v1550_v59 = vmax.f32 %v1548_v12, %v1549_v54  ;;  %v1556_v48 = vrot.slane %v1555_v58, 1  ;;  %v1563_v57 = vrot.slane %v1562_v8, 1 }
 0x118   : > { %v1570_v30 = vrot.slane %v1569_v56, 1  ;;  %v1913_v46 = vmul.f32 %v1792_v34, %v1333_v53  ;;  %v1914_v42 = vmul.f32 %v1793_v36, %v1340_v52  ;;  %v1976_v51 = vmul.f32 1.1111112, %v1912_v50 }
 0x119   : > { %v1347_v29 = vmax.f32 %v1345_v20, %v1346_v7  ;;  %v1557_v47 = vmax.f32 %v1555_v58, %v1556_v48  ;;  %v1564_v60 = vmax.f32 %v1562_v8, %v1563_v57  ;;  %v1944_v41 = vmul.f32 %v2749_v32, %v1550_v59 }
 0x11a   : > { %v1571_v45 = vmax.f32 %v1569_v56, %v1570_v30  ;;  %v1977_v11 = vmul.f32 1.1111112, %v1913_v46  ;;  %v1978_v61 = vmul.f32 1.1111112, %v1914_v42  ;;  %v1000_v55 = vcombine.high %v2868_v4, %v2868_v4 }
 0x11b   : > { %v1915_v43 = vmul.f32 %v1794_v37, %v1347_v29  ;;  %v1945_v34 = vmul.f32 %v1820_v38, %v1557_v47  ;;  %v1946_v36 = vmul.f32 %v1821_v40, %v1564_v60  ;;  %v3481_v16 = vrot.slane %v2749_v32, 3 }
 0x11c   : > { %v2008_v18 = vmul.f32 1.1111112, %v1944_v41  ;;  %v2104_v3 = vrot.slane %v1977_v11, 7  ;;  %v2107_v21 = vrot.slane %v1978_v61, 6  ;;  %v1007_v37 = vrot.slane %v2868_v4, %v2751_v33 }
 0x11d   : > { %v1947_v12 = vmul.f32 %v3481_v16, %v1571_v45  ;;  %v1979_v13 = vmul.f32 1.1111112, %v1915_v43  ;;  %v2009_v22 = vmul.f32 1.1111112, %v1945_v34  ;;  %v2010_v20 = vmul.f32 1.1111112, %v1946_v36 }
 0x11e   : > { %v1014_v58 = vrot.slane %v1000_v55, %v2751_v33  ;;  %v2106_v38 = vsel %vm2105_vm9, %v2104_v3, %v1976_v51  ;;  %v1015_v56 = vcombine.high %v1007_v37, %v1007_v37  ;;  %v1348_v40 = vsel %vm1319_vm1, %v1007_v37, -inf }
 0x11f   : > { %v2011_v54 = vmul.f32 1.1111112, %v1947_v12  ;;  %v2110_v8 = vrot.slane %v1979_v13, 5  ;;  %v2109_v53 = vsel %vm2108_vm10, %v2107_v21, %v2106_v38  ;;  %v2167_v52 = vrot.slane %v2009_v22, 7  ;;  %v2937_v21 = vpop.f32.mrb[12].mxu0 }
 0x120   : > { %v2169_v7 = vrot.slane %v2010_v20, 6  ;;  %v1016_v59 = vcombine.high %v1014_v58, %v1014_v58  ;;  %v1349_v48 = vrot.slane %v1348_v40, 4  ;;  %v1355_v4 = vsel %vm1319_vm1, %v1015_v56, -inf  ;;  %v2945_v20 = vpop.f32.mrb[12].mxu1 }
 0x121   : > { %v2171_v50 = vrot.slane %v2011_v54, 5  ;;  %v1362_v57 = vsel %vm1319_vm1, %v1014_v58, -inf  ;;  %v2168_v30 = vsel %vm2105_vm9, %v2167_v52, %v2008_v18  ;;  %v1356_v29 = vrot.slane %v1355_v4, 4 }
 0x122   : > { %v1363_v46 = vrot.slane %v1362_v57, 4  ;;  %v2919_v42 = vsel %vm2111_vm11, %v2110_v8, %v2109_v53  ;;  %v2170_v51 = vsel %vm2108_vm10, %v2169_v7, %v2168_v30  ;;  %v1350_v47 = vmax.f32 %v1348_v40, %v1349_v48  ;;  %v2947_v8 = vpop.f32.mrb[13].mxu0 }
 0x123   : > { %v1369_v60 = vsel %vm1319_vm1, %v1016_v59, -inf  ;;  %v871_v45 = vmul.f32 0.2, %v2855_v28  ;;  %v1357_v41 = vmax.f32 %v1355_v4, %v1356_v29  ;;  %v2925_v61 = vsel %vm2111_vm11, %v2171_v50, %v2170_v51 }
 0x124   : > { %v1364_v43 = vmax.f32 %v1362_v57, %v1363_v46  ;;  %v1370_v11 = vrot.slane %v1369_v60, 4  ;;  %v1351_v55 = vrot.slane %v1350_v47, 2  ;;  %v642_v36 = vadd.f32 %v2824_v62, %v2768_v44 }
 0x125   : > { %v903_v34 = vsel %vm839_vm12, %v2855_v28, %v871_v45  ;;  %v706_v16 = vadd.f32 %v2826_v63, %v2768_v44  ;;  %v1358_v12 = vrot.slane %v1357_v41, 2  ;;  %v2943_v62 = vadd.f32 %v2768_v44, %v2834_v9 }
 0x126   : > { %v1365_v18 = vrot.slane %v1364_v43, 2  ;;  %v1371_v13 = vmax.f32 %v1369_v60, %v1370_v11  ;;  %936 = vst.msk [vmem:[%s2820_s19 + $0x88] sm:$0xff] %vm918_vm0, %v903_v34  ;;  %v960_v3 = vmax.f32 %v903_v34, %v2852_v26  ;;  %v1352_v37 = vmax.f32 %v1350_v47, %v1351_v55 }
 0x127   : > { %v757_v22 = vmul.f32 %v2777_v49, %v642_v36  ;;  %v773_v28 = vmul.f32 %v2777_v49, %v706_v16  ;;  %v1359_v63 = vmax.f32 %v1357_v41, %v1358_v12  ;;  %v3482_v51 = vrot.slane %v2747_v31, 4 }
 0x128   : > { %v1366_v54 = vmax.f32 %v1364_v43, %v1365_v18  ;;  %v1372_v58 = vrot.slane %v1371_v13, 2  ;;  %v1136_v38 = vcombine.high %v960_v3, %v960_v3  ;;  %v1353_v26 = vrot.slane %v1352_v37, 1 }
 0x129   : > { %v1143_v56 = vrot.slane %v960_v3, %v2751_v33  ;;  %v796_v40 = vadd.f32 %v2794_v2, %v757_v22  ;;  %v2952_v53 = vadd.f32 %v2794_v2, %v773_v28  ;;  %v1360_v9 = vrot.slane %v1359_v63, 1 }
 0x12a   : > { %v1367_v52 = vrot.slane %v1366_v54, 1  ;;  %v1373_v7 = vmax.f32 %v1371_v13, %v1372_v58  ;;  %v1150_v50 = vrot.slane %v1136_v38, %v2751_v33  ;;  %v1354_v59 = vmax.f32 %v1352_v37, %v1353_v26  ;;  %v2965_v37 = vpop.f32.mrb[13].mxu1 }
 0x12b   : > { %v1151_v48 = vcombine.high %v1143_v56, %v1143_v56  ;;  %v1572_v4 = vsel %vm1319_vm1, %v1143_v56, -inf  ;;  %vm828_vm3 = vcmp.gt.f32.partialorder %v796_v40, 0.0  ;;  %v1361_v57 = vmax.f32 %v1359_v63, %v1360_v9 }
 0x12c   : > { %v1368_v30 = vmax.f32 %v1366_v54, %v1367_v52  ;;  %v1374_v29 = vrot.slane %v1373_v7, 1  ;;  %v1152_v46 = vcombine.high %v1150_v50, %v1150_v50  ;;  %v1916_v47 = vmul.f32 %v3482_v51, %v1354_v59 }
 0x12d   : > { %v1573_v60 = vrot.slane %v1572_v4, 4  ;;  %v1579_v45 = vsel %vm1319_vm1, %v1151_v48, -inf  ;;  %v1586_v41 = vsel %vm1319_vm1, %v1150_v50, -inf  ;;  %v3483_v11 = vrot.slane %v2747_v31, 5 }
 0x12e   : > { %v1375_v43 = vmax.f32 %v1373_v7, %v1374_v29  ;;  %v3484_v34 = vrot.slane %v2747_v31, 6  ;;  %v1580_v16 = vrot.slane %v1579_v45, 4  ;;  %v1980_v12 = vmul.f32 1.1111112, %v1916_v47 }
 0x12f   : > { %v1917_v55 = vmul.f32 %v3483_v11, %v1361_v57  ;;  %v1574_v18 = vmax.f32 %v1572_v4, %v1573_v60  ;;  %v1587_v13 = vrot.slane %v1586_v41, 4  ;;  %v1593_v3 = vsel %vm1319_vm1, %v1152_v46, -inf }
 0x130   : > { %v1918_v36 = vmul.f32 %v3484_v34, %v1368_v30  ;;  %v3485_v22 = vrot.slane %v2747_v31, 7  ;;  %v1581_v58 = vmax.f32 %v1579_v45, %v1580_v16  ;;  %v2113_v38 = vrot.slane %v1980_v12, 4 }
 0x131   : > { %v1981_v63 = vmul.f32 1.1111112, %v1917_v55  ;;  %v1575_v26 = vrot.slane %v1574_v18, 2  ;;  %v1588_v56 = vmax.f32 %v1586_v41, %v1587_v13  ;;  %v1594_v9 = vrot.slane %v1593_v3, 4 }
 0x132   : > { %v1919_v28 = vmul.f32 %v3485_v22, %v1375_v43  ;;  %v1982_v54 = vmul.f32 1.1111112, %v1918_v36  ;;  %v1582_v59 = vrot.slane %v1581_v58, 2  ;;  %v2115_v48 = vsel %vm2114_vm13, %v2113_v38, %v2919_v42 }
 0x133   : > { %v2116_v7 = vrot.slane %v1981_v63, 3  ;;  %v1576_v4 = vmax.f32 %v1574_v18, %v1575_v26  ;;  %v1589_v57 = vrot.slane %v1588_v56, 2  ;;  %v1595_v30 = vmax.f32 %v1593_v3, %v1594_v9 }
 0x134   : > { %v1983_v52 = vmul.f32 1.1111112, %v1919_v28  ;;  %v2119_v50 = vrot.slane %v1982_v54, 2  ;;  %v1583_v46 = vmax.f32 %v1581_v58, %v1582_v59  ;;  %v860_v51 = vmul.f32 0.2, %v796_v40 }
 0x135   : > { %v2118_v31 = vsel %vm2117_vm14, %v2116_v7, %v2115_v48  ;;  %v1577_v60 = vrot.slane %v1576_v4, 1  ;;  %v1590_v45 = vmax.f32 %v1588_v56, %v1589_v57  ;;  %v1596_v42 = vrot.slane %v1595_v30, 2 }
 0x136   : > { %v2122_v29 = vrot.slane %v1983_v52, 1  ;;  %v2121_v47 = vsel %vm2120_vm15, %v2119_v50, %v2118_v31  ;;  %v1584_v43 = vrot.slane %v1583_v46, 1  ;;  %v892_v11 = vsel %vm828_vm3, %v796_v40, %v860_v51 }
 0x137   : > { %vm844_vm4 = vcmp.gt.f32.partialorder %v2952_v53, 0.0  ;;  %v1578_v55 = vmax.f32 %v1576_v4, %v1577_v60  ;;  %v1591_v34 = vrot.slane %v1590_v45, 1  ;;  %v1597_v36 = vmax.f32 %v1595_v30, %v1596_v42  ;;  %925 = vst.msk [vmem:[%s2820_s19 + $0x30] sm:$0xff] %vm918_vm0, %v892_v11 }
 0x138   : > { %v2124_v41 = vsel %vm2123_vm2, %v2122_v29, %v2121_v47  ;;  %v876_v16 = vmul.f32 0.2, %v2952_v53  ;;  %v1585_v12 = vmax.f32 %v1583_v46, %v1584_v43  ;;  %v755_v18 = vmul.f32 %v2777_v49, %v2943_v62  ;;  %v3016_v43 = vpop.f32.mrb[14].mxu0 }
 0x139   : > { %2231 = vst.msk [vmem:[%s2975_s23] sm:$0xff] %vm918_vm0, %v2124_v41  ;;  %v698_v13 = vadd.f32 %v2768_v44, %v2836_v10  ;;  %v645_v40 = vadd.f32 %v2842_v14, %v2768_v44  ;;  %v1592_v3 = vmax.f32 %v1590_v45, %v1591_v34  ;;  %v1598_v22 = vrot.slane %v1597_v36, 1 }
 0x13a   : > { %v3486_v28 = vrot.slane %v2749_v32, 4  ;;  %v908_v54 = vsel %vm844_vm4, %v2952_v53, %v876_v16  ;;  %v3487_v58 = vrot.slane %v2749_v32, 5  ;;  %v794_v62 = vadd.f32 %v2794_v2, %v755_v18 }
 0x13b   : > { %941 = vst.msk [vmem:[%s2820_s19 + $0xb0] sm:$0xff] %vm918_vm0, %v908_v54  ;;  %v771_v26 = vmul.f32 %v2777_v49, %v698_v13  ;;  %v758_v10 = vmul.f32 %v2777_v49, %v645_v40  ;;  %v1599_v56 = vmax.f32 %v1597_v36, %v1598_v22  ;;  %v3488_v14 = vrot.slane %v2749_v32, 6 }
 0x13c   : > { %v1948_v63 = vmul.f32 %v3486_v28, %v1578_v55  ;;  %v1949_v38 = vmul.f32 %v3487_v58, %v1585_v12  ;;  %v709_v7 = vadd.f32 %v2844_v15, %v2768_v44  ;;  %vm826_vm5 = vcmp.gt.f32.partialorder %v794_v62, 0.0  ;;  %v3033_v28 = vpop.f32.mrb[14].mxu1 }
 0x13d   : > { %v1950_v9 = vmul.f32 %v3488_v14, %v1592_v3  ;;  %v858_v50 = vmul.f32 0.2, %v794_v62  ;;  %v810_v59 = vadd.f32 %v2794_v2, %v771_v26  ;;  %v3489_v48 = vrot.slane %v2749_v32, 7 }
 0x13e   : > { %v2012_v52 = vmul.f32 1.1111112, %v1948_v63  ;;  %v2013_v53 = vmul.f32 1.1111112, %v1949_v38  ;;  %v797_v31 = vadd.f32 %v2794_v2, %v758_v10  ;;  %v637_v18 = vadd.f32 %v2768_v44, %v2848_v23 }
 0x13f   : > { %v1951_v4 = vmul.f32 %v3489_v48, %v1599_v56  ;;  %v2014_v57 = vmul.f32 1.1111112, %v1950_v9  ;;  %v890_v46 = vsel %vm826_vm5, %v794_v62, %v858_v50  ;;  %vm842_vm6 = vcmp.gt.f32.partialorder %v810_v59, 0.0 }
 0x140   : > { %v2173_v30 = vrot.slane %v2012_v52, 4  ;;  %v2175_v29 = vrot.slane %v2013_v53, 3  ;;  %v874_v51 = vmul.f32 0.2, %v810_v59  ;;  %923 = vst.msk [vmem:[%s2820_s19 + $0x20] sm:$0xff] %vm918_vm0, %v890_v46  ;;  %v953_v45 = vmax.f32 %v890_v46, %v892_v11 }
 0x141   : > { %v2015_v47 = vmul.f32 1.1111112, %v1951_v4  ;;  %v2177_v60 = vrot.slane %v2014_v57, 2  ;;  %vm829_vm7 = vcmp.gt.f32.partialorder %v797_v31, 0.0  ;;  %v861_v41 = vmul.f32 0.2, %v797_v31 }
 0x142   : > { %v2174_v15 = vsel %vm2114_vm13, %v2173_v30, %v2925_v61  ;;  %v906_v42 = vsel %vm842_vm6, %v810_v59, %v874_v51  ;;  %v1017_v36 = vcombine.high %v953_v45, %v953_v45  ;;  %v1024_v16 = vrot.slane %v953_v45, %v2751_v33 }
 0x143   : > { %v2176_v32 = vsel %vm2117_vm14, %v2175_v29, %v2174_v15  ;;  %v2179_v34 = vrot.slane %v2015_v47, 1  ;;  %939 = vst.msk [vmem:[%s2820_s19 + $0xa0] sm:$0xff] %vm918_vm0, %v906_v42  ;;  %v961_v61 = vmax.f32 %v906_v42, %v908_v54  ;;  %v3022_v12 = vsel %vm829_vm7, %v797_v31, %v861_v41 }
 0x144   : > { %v2178_v55 = vsel %vm2120_vm15, %v2177_v60, %v2176_v32  ;;  %v774_v11 = vmul.f32 %v2777_v49, %v709_v7  ;;  %v1031_v40 = vrot.slane %v1017_v36, %v2751_v33  ;;  %v1032_v3 = vcombine.high %v1024_v16, %v1024_v16  ;;  %926 = vst.msk [vmem:[%s2820_s19 + $0x38] sm:$0xff] %vm918_vm0, %v3022_v12 }
 0x145   : > { %v2180_v13 = vsel %vm2123_vm2, %v2179_v34, %v2178_v55  ;;  %v1376_v22 = vsel %vm1319_vm1, %v1024_v16, -inf  ;;  %v1153_v54 = vcombine.high %v961_v61, %v961_v61  ;;  %v1160_v58 = vrot.slane %v961_v61, %v2751_v33 }
 0x146   : > { %2235 = vst.msk [vmem:[%s2975_s23 + $0x20] sm:$0xff] %vm918_vm0, %v2180_v13  ;;  %v1377_v63 = vrot.slane %v1376_v22, 4  ;;  %v1831_v23 = vrot.slane %v2759_v39, 5  ;;  %v1033_v38 = vcombine.high %v1031_v40, %v1031_v40  ;;  %v1383_v62 = vsel %vm1319_vm1, %v1032_v3, -inf  ;;  %v3054_v3 = vpop.f32.mrb[15].mxu0 }
 0x147   : > { %v1390_v26 = vsel %vm1319_vm1, %v1031_v40, -inf  ;;  %v3042_v10 = vadd.f32 %v2794_v2, %v774_v11  ;;  %v1384_v14 = vrot.slane %v1383_v62, 4  ;;  %v1167_v52 = vrot.slane %v1153_v54, %v2751_v33 }
 0x148   : > { %v1378_v56 = vmax.f32 %v1376_v22, %v1377_v63  ;;  %v1391_v9 = vrot.slane %v1390_v26, 4  ;;  %v1397_v7 = vsel %vm1319_vm1, %v1033_v38, -inf  ;;  %v1168_v53 = vcombine.high %v1160_v58, %v1160_v58 }
 0x149   : > { %v1600_v50 = vsel %vm1319_vm1, %v1160_v58, -inf  ;;  %v3048_v59 = vmul.f32 %v2777_v49, %v637_v18  ;;  %v1385_v4 = vmax.f32 %v1383_v62, %v1384_v14  ;;  %v1398_v30 = vrot.slane %v1397_v7, 4 }
 0x14a   : > { %v1379_v48 = vrot.slane %v1378_v56, 2  ;;  %v1392_v57 = vmax.f32 %v1390_v26, %v1391_v9  ;;  %v1169_v31 = vcombine.high %v1167_v52, %v1167_v52  ;;  %v1601_v29 = vrot.slane %v1600_v50, 4 }
 0x14b   : > { %v1607_v46 = vsel %vm1319_vm1, %v1168_v53, -inf  ;;  %v1614_v51 = vsel %vm1319_vm1, %v1167_v52, -inf  ;;  %v1386_v15 = vrot.slane %v1385_v4, 2  ;;  %v1399_v45 = vmax.f32 %v1397_v7, %v1398_v30 }
 0x14c   : > { %v1380_v47 = vmax.f32 %v1378_v56, %v1379_v48  ;;  %v1393_v60 = vrot.slane %v1392_v57, 2  ;;  %v1602_v32 = vmax.f32 %v1600_v50, %v1601_v29  ;;  %v1608_v42 = vrot.slane %v1607_v46, 4 }
 0x14d   : > { %v1615_v41 = vrot.slane %v1614_v51, 4  ;;  %v1621_v55 = vsel %vm1319_vm1, %v1169_v31, -inf  ;;  %vm845_vm8 = vcmp.gt.f32.partialorder %v3042_v10, 0.0  ;;  %v1387_v36 = vmax.f32 %v1385_v4, %v1386_v15 }
 0x14e   : > { %v1381_v34 = vrot.slane %v1380_v47, 1  ;;  %v1394_v16 = vmax.f32 %v1392_v57, %v1393_v60  ;;  %v1400_v61 = vrot.slane %v1399_v45, 2  ;;  %v1603_v11 = vrot.slane %v1602_v32, 2 }
 0x14f   : > { %v1609_v18 = vmax.f32 %v1607_v46, %v1608_v42  ;;  %v1616_v13 = vmax.f32 %v1614_v51, %v1615_v41  ;;  %v1622_v40 = vrot.slane %v1621_v55, 4  ;;  %v1388_v63 = vrot.slane %v1387_v36, 1 }
 0x150   : > { %v1382_v22 = vmax.f32 %v1380_v47, %v1381_v34  ;;  %v1395_v54 = vrot.slane %v1394_v16, 1  ;;  %v1401_v58 = vmax.f32 %v1399_v45, %v1400_v61  ;;  %v1604_v38 = vmax.f32 %v1602_v32, %v1603_v11  ;;  %v3061_v47 = vpop.f32.mrb[15].mxu1 }
 0x151   : > { %v1610_v62 = vrot.slane %v1609_v18, 2  ;;  %v1617_v26 = vrot.slane %v1616_v13, 2  ;;  %v1623_v56 = vmax.f32 %v1621_v55, %v1622_v40  ;;  %v1389_v14 = vmax.f32 %v1387_v36, %v1388_v63 }
 0x152   : > { %v1396_v9 = vmax.f32 %v1394_v16, %v1395_v54  ;;  %v1402_v52 = vrot.slane %v1401_v58, 1  ;;  %v1920_v7 = vmul.f32 %v2754_v35, %v1382_v22  ;;  %v1605_v53 = vrot.slane %v1604_v38, 1 }
 0x153   : > { %v1611_v50 = vmax.f32 %v1609_v18, %v1610_v62  ;;  %v1618_v48 = vmax.f32 %v1616_v13, %v1617_v26  ;;  %v1624_v4 = vrot.slane %v1623_v56, 2  ;;  %v3490_v30 = vrot.slane %v2754_v35, 1 }
 0x154   : > { %v1403_v57 = vmax.f32 %v1401_v58, %v1402_v52  ;;  %v3491_v29 = vrot.slane %v2754_v35, 2  ;;  %v1984_v51 = vmul.f32 1.1111112, %v1920_v7  ;;  %v1606_v15 = vmax.f32 %v1604_v38, %v1605_v53 }
 0x155   : > { %v1921_v31 = vmul.f32 %v3490_v30, %v1389_v14  ;;  %v1612_v60 = vrot.slane %v1611_v50, 1  ;;  %v1619_v45 = vrot.slane %v1618_v48, 1  ;;  %v1625_v32 = vmax.f32 %v1623_v56, %v1624_v4 }
 0x156   : > { %v1922_v46 = vmul.f32 %v3491_v29, %v1396_v9  ;;  %v3492_v42 = vrot.slane %v2754_v35, 3  ;;  %v877_v36 = vmul.f32 0.2, %v3042_v10  ;;  %v1952_v18 = vmul.f32 %v2759_v39, %v1606_v15 }
 0x157   : > { %v1985_v55 = vmul.f32 1.1111112, %v1921_v31  ;;  %v1613_v16 = vmax.f32 %v1611_v50, %v1612_v60  ;;  %v1620_v61 = vmax.f32 %v1618_v48, %v1619_v45  ;;  %v1626_v11 = vrot.slane %v1625_v32, 1 }
 0x158   : > { %v1923_v41 = vmul.f32 %v3492_v42, %v1403_v57  ;;  %v1986_v34 = vmul.f32 1.1111112, %v1922_v46  ;;  %v909_v63 = vsel %vm845_vm8, %v3042_v10, %v877_v36  ;;  %v3493_v58 = vrot.slane %v2759_v39, 1 }
 0x159   : > { %v2125_v40 = vrot.slane %v1985_v55, 7  ;;  %v1627_v54 = vmax.f32 %v1625_v32, %v1626_v11  ;;  %v3494_v62 = vrot.slane %v2759_v39, 2  ;;  %v2016_v56 = vmul.f32 1.1111112, %v1952_v18  ;;  %942 = vst.msk [vmem:[%s2820_s19 + $0xb8] sm:$0xff] %vm918_vm0, %v909_v63 }
 0x15a   : > { %v1987_v13 = vmul.f32 1.1111112, %v1923_v41  ;;  %v2127_v22 = vrot.slane %v1986_v34, 6  ;;  %v1953_v38 = vmul.f32 %v3493_v58, %v1613_v16  ;;  %v795_v52 = vadd.f32 %v2794_v2, %v3048_v59 }
 0x15b   : > { %v1954_v26 = vmul.f32 %v3494_v62, %v1620_v61  ;;  %v2126_v14 = vsel %vm2105_vm9, %v2125_v40, %v1984_v51  ;;  %v701_v7 = vadd.f32 %v2768_v44, %v2850_v24  ;;  %v3495_v53 = vrot.slane %v2759_v39, 3 }
 0x15c   : > { %v2129_v9 = vrot.slane %v1987_v13, 5  ;;  %v2128_v10 = vsel %vm2108_vm10, %v2127_v22, %v2126_v14  ;;  %v2017_v48 = vmul.f32 1.1111112, %v1953_v38  ;;  %vm827_vm12 = vcmp.gt.f32.partialorder %v795_v52, 0.0 }
 0x15d   : > { %v1955_v50 = vmul.f32 %v3495_v53, %v1627_v54  ;;  %v2018_v4 = vmul.f32 1.1111112, %v1954_v26  ;;  %v859_v57 = vmul.f32 0.2, %v795_v52  ;;  %v772_v31 = vmul.f32 %v2777_v49, %v701_v7 }
 0x15e   : > { %v3085_v30 = vsel %vm2111_vm11, %v2129_v9, %v2128_v10  ;;  %v2181_v59 = vrot.slane %v2017_v48, 7  ;;  %v658_v24 = vadd.f32 %v2870_v5, %v2768_v44  ;;  %v722_v60 = vadd.f32 %v2872_v6, %v2768_v44 }
 0x15f   : > { %v2019_v29 = vmul.f32 1.1111112, %v1955_v50  ;;  %v2183_v46 = vrot.slane %v2018_v4, 6  ;;  %v891_v51 = vsel %vm827_vm12, %v795_v52, %v859_v57  ;;  %v811_v15 = vadd.f32 %v2794_v2, %v772_v31 }
 0x160   : > { %v650_v45 = vadd.f32 %v2768_v44, %v2876_v17  ;;  %v2182_v32 = vsel %vm2105_vm9, %v2181_v59, %v2016_v56  ;;  %924 = vst.msk [vmem:[%s2820_s19 + $0x28] sm:$0xff] %vm918_vm0, %v891_v51  ;;  %v954_v41 = vmax.f32 %v891_v51, %v3022_v12  ;;  %v761_v55 = vmul.f32 %v2777_v49, %v658_v24 }
 0x161   : > { %v2185_v42 = vrot.slane %v2019_v29, 5  ;;  %v2184_v5 = vsel %vm2108_vm10, %v2183_v46, %v2182_v32  ;;  %vm843_vm3 = vcmp.gt.f32.partialorder %v811_v15, 0.0  ;;  %v875_v34 = vmul.f32 0.2, %v811_v15 }
 0x162   : > { %v777_v36 = vmul.f32 %v2777_v49, %v722_v60  ;;  %v1034_v6 = vcombine.high %v954_v41, %v954_v41  ;;  %v1041_v16 = vrot.slane %v954_v41, %v2751_v33  ;;  %v1832_v44 = vrot.slane %v2759_v39, 6 }
 0x163   : > { %v800_v17 = vadd.f32 %v2794_v2, %v761_v55  ;;  %v907_v61 = vsel %vm843_vm3, %v811_v15, %v875_v34  ;;  %v1833_v11 = vrot.slane %v2759_v39, 7  ;;  %v3107_v12 = vsel %vm2111_vm11, %v2185_v42, %v2184_v5 }
 0x164   : > { %v3110_v18 = vadd.f32 %v2794_v2, %v777_v36  ;;  %v1048_v13 = vrot.slane %v1034_v6, %v2751_v33  ;;  %v1049_v40 = vcombine.high %v1041_v16, %v1041_v16  ;;  %v1404_v22 = vsel %vm1319_vm1, %v1041_v16, -inf  ;;  %940 = vst.msk [vmem:[%s2820_s19 + $0xa8] sm:$0xff] %vm918_vm0, %v907_v61 }
 0x165   : > { %v962_v54 = vmax.f32 %v907_v61, %v909_v63  ;;  %v1405_v58 = vrot.slane %v1404_v22, 4  ;;  %vm832_vm4 = vcmp.gt.f32.partialorder %v800_v17, 0.0  ;;  %v864_v38 = vmul.f32 0.2, %v800_v17 }
 0x166   : > { %v3117_v62 = vmul.f32 %v2777_v49, %v650_v45  ;;  %v1050_v26 = vcombine.high %v1048_v13, %v1048_v13  ;;  %v1411_v56 = vsel %vm1319_vm1, %v1049_v40, -inf  ;;  %v1418_v2 = vsel %vm1319_vm1, %v1048_v13, -inf }
 0x167   : > { %v1170_v14 = vcombine.high %v962_v54, %v962_v54  ;;  %v1406_v9 = vmax.f32 %v1404_v22, %v1405_v58  ;;  %v1412_v52 = vrot.slane %v1411_v56, 4  ;;  %v1419_v7 = vrot.slane %v1418_v2, 4 }
 0x168   : > { %v1177_v10 = vrot.slane %v962_v54, %v2751_v33  ;;  %v1425_v63 = vsel %vm1319_vm1, %v1050_v26, -inf  ;;  %v3124_v50 = vsel %vm832_vm4, %v800_v17, %v864_v38  ;;  %v3127_v49 = vmul.f32 0.2, %v3110_v18 }
 0x169   : > { %v1184_v53 = vrot.slane %v1170_v14, %v2751_v33  ;;  %v1407_v48 = vrot.slane %v1406_v9, 2  ;;  %v1413_v4 = vmax.f32 %v1411_v56, %v1412_v52  ;;  %v1420_v57 = vmax.f32 %v1418_v2, %v1419_v7  ;;  %929 = vst.msk [vmem:[%s2820_s19 + $0x50] sm:$0xff] %vm918_vm0, %v3124_v50 }
 0x16a   : > { %v1426_v31 = vrot.slane %v1425_v63, 4  ;;  %v1185_v29 = vcombine.high %v1177_v10, %v1177_v10  ;;  %v1628_v46 = vsel %vm1319_vm1, %v1177_v10, -inf  ;;  %vm848_vm5 = vcmp.gt.f32.partialorder %v3110_v18, 0.0 }
 0x16b   : > { %v1186_v59 = vcombine.high %v1184_v53, %v1184_v53  ;;  %v1642_v24 = vsel %vm1319_vm1, %v1184_v53, -inf  ;;  %v1408_v51 = vmax.f32 %v1406_v9, %v1407_v48  ;;  %v1414_v15 = vrot.slane %v1413_v4, 2 }
 0x16c   : > { %v1421_v60 = vrot.slane %v1420_v57, 2  ;;  %v1427_v45 = vmax.f32 %v1425_v63, %v1426_v31  ;;  %v1629_v32 = vrot.slane %v1628_v46, 4  ;;  %v1635_v42 = vsel %vm1319_vm1, %v1185_v29, -inf }
 0x16d   : > { %v1643_v41 = vrot.slane %v1642_v24, 4  ;;  %v1649_v55 = vsel %vm1319_vm1, %v1186_v59, -inf  ;;  %v1409_v5 = vrot.slane %v1408_v51, 1  ;;  %v1415_v34 = vmax.f32 %v1413_v4, %v1414_v15 }
 0x16e   : > { %v1422_v36 = vmax.f32 %v1420_v57, %v1421_v60  ;;  %v1428_v6 = vrot.slane %v1427_v45, 2  ;;  %v1630_v16 = vmax.f32 %v1628_v46, %v1629_v32  ;;  %v1636_v17 = vrot.slane %v1635_v42, 4 }
 0x16f   : > { %v1644_v61 = vmax.f32 %v1642_v24, %v1643_v41  ;;  %v1650_v13 = vrot.slane %v1649_v55, 4  ;;  %v1410_v40 = vmax.f32 %v1408_v51, %v1409_v5  ;;  %v1416_v22 = vrot.slane %v1415_v34, 1 }
 0x170   : > { %v1423_v54 = vrot.slane %v1422_v36, 1  ;;  %v1429_v58 = vmax.f32 %v1427_v45, %v1428_v6  ;;  %v1631_v38 = vrot.slane %v1630_v16, 2  ;;  %v1637_v26 = vmax.f32 %v1635_v42, %v1636_v17 }
 0x171   : > { %v1645_v56 = vrot.slane %v1644_v61, 2  ;;  %v1651_v2 = vmax.f32 %v1649_v55, %v1650_v13  ;;  %v1417_v14 = vmax.f32 %v1415_v34, %v1416_v22  ;;  %v3496_v7 = vrot.slane %v2754_v35, 4 }
 0x172   : > { %v1424_v9 = vmax.f32 %v1422_v36, %v1423_v54  ;;  %v1430_v52 = vrot.slane %v1429_v58, 1  ;;  %v1632_v63 = vmax.f32 %v1630_v16, %v1631_v38  ;;  %v1638_v53 = vrot.slane %v1637_v26, 2 }
 0x173   : > { %v1924_v10 = vmul.f32 %v3496_v7, %v1410_v40  ;;  %v1646_v48 = vmax.f32 %v1644_v61, %v1645_v56  ;;  %v1652_v4 = vrot.slane %v1651_v2, 2  ;;  %v3497_v31 = vrot.slane %v2754_v35, 5 }
 0x174   : > { %v1431_v57 = vmax.f32 %v1429_v58, %v1430_v52  ;;  %v3498_v59 = vrot.slane %v2754_v35, 6  ;;  %v1633_v51 = vrot.slane %v1632_v63, 1  ;;  %v1639_v15 = vmax.f32 %v1637_v26, %v1638_v53 }
 0x175   : > { %v1925_v29 = vmul.f32 %v3497_v31, %v1417_v14  ;;  %v1988_v24 = vmul.f32 1.1111112, %v1924_v10  ;;  %v1647_v60 = vrot.slane %v1646_v48, 1  ;;  %v1653_v45 = vmax.f32 %v1651_v2, %v1652_v4  ;;  %v3161_v2 = vld [vmem:[%s3477_s4] ss:$0 sm:$0xff] }
 0x176   : > { %v1926_v46 = vmul.f32 %v3498_v59, %v1424_v9  ;;  %v3499_v32 = vrot.slane %v2754_v35, 7  ;;  %v1634_v34 = vmax.f32 %v1632_v63, %v1633_v51  ;;  %v1640_v36 = vrot.slane %v1639_v15, 1  ;;  %v3190_v59 = vld [vmem:[%s3475_s2] ss:$0 sm:$0xff] }
 0x177   : > { %v1989_v41 = vmul.f32 1.1111112, %v1925_v29  ;;  %v2131_v5 = vrot.slane %v1988_v24, 4  ;;  %v1648_v6 = vmax.f32 %v1646_v48, %v1647_v60  ;;  %v1654_v16 = vrot.slane %v1653_v45, 1 }
 0x178   : > { %v1927_v42 = vmul.f32 %v3499_v32, %v1431_v57  ;;  %v1990_v55 = vmul.f32 1.1111112, %v1926_v46  ;;  %v1641_v22 = vmax.f32 %v1639_v15, %v1640_v36  ;;  %v3500_v35 = vrot.slane %v2759_v39, 4 }
 0x179   : > { %v2132_v61 = vsel %vm2114_vm13, %v2131_v5, %v3085_v30  ;;  %v2133_v13 = vrot.slane %v1989_v41, 3  ;;  %v1655_v54 = vmax.f32 %v1653_v45, %v1654_v16  ;;  %v1958_v38 = vmul.f32 %v1832_v44, %v1648_v6 }
 0x17a   : > { %v1991_v17 = vmul.f32 1.1111112, %v1927_v42  ;;  %v2135_v40 = vrot.slane %v1990_v55, 2  ;;  %v1956_v58 = vmul.f32 %v3500_v35, %v1634_v34  ;;  %v3156_v30 = vsel %vm848_vm5, %v3110_v18, %v3127_v49  ;;  %v3174_v18 = vld [vmem:[%s2743_s9 + $0x8] sm:$0xff]  }
 0x17b   : > { %v2134_v26 = vsel %vm2117_vm14, %v2133_v13, %v2132_v61  ;;  %v798_v14 = vadd.f32 %v3161_v2, %v3117_v62  ;;  %v1957_v9 = vmul.f32 %v1831_v23, %v1641_v22  ;;  %v1959_v52 = vmul.f32 %v1833_v11, %v1655_v54  ;;  %945 = vst.msk [vmem:[%s2820_s19 + $0xd0] sm:$0xff] %vm918_vm0, %v3156_v30 }
 0x17c   : > { %v2137_v56 = vrot.slane %v1991_v17, 1  ;;  %v2136_v44 = vsel %vm2120_vm15, %v2135_v40, %v2134_v26  ;;  %v2020_v7 = vmul.f32 1.1111112, %v1956_v58  ;;  %v2022_v10 = vmul.f32 1.1111112, %v1958_v38 }
 0x17d   : > { %vm830_vm6 = vcmp.gt.f32.partialorder %v798_v14, 0.0  ;;  %v862_v62 = vmul.f32 0.2, %v798_v14  ;;  %v2021_v63 = vmul.f32 1.1111112, %v1957_v9  ;;  %v3180_v39 = vunpack.c.l.bf16 %v3174_v18 }
 0x17e   : > { %v2138_v49 = vsel %vm2123_vm2, %v2137_v56, %v2136_v44  ;;  %v2023_v53 = vmul.f32 1.1111112, %v1959_v52  ;;  %v2187_v23 = vrot.slane %v2020_v7, 4  ;;  %v2191_v31 = vrot.slane %v2022_v10, 2 }
 0x17f   : > { %2232 = vst.msk [vmem:[%s2975_s23 + $0x8] sm:$0xff] %vm918_vm0, %v2138_v49  ;;  %v894_v48 = vsel %vm830_vm6, %v798_v14, %v862_v62  ;;  %v2189_v4 = vrot.slane %v2021_v63, 3  ;;  %v714_v46 = vadd.f32 %v3190_v59, %v2878_v19  ;;  %v661_v24 = vadd.f32 %v3190_v59, %v2880_v25  ;;  %v3206_v19 = vld [vmem:[%s3476_s3] ss:$0 sm:$0xff] }
 0x180   : > { %v2188_v11 = vsel %vm2114_vm13, %v2187_v23, %v3107_v12  ;;  %927 = vst.msk [vmem:[%s2820_s19 + $0x40] sm:$0xff] %vm918_vm0, %v894_v48  ;;  %v955_v57 = vmax.f32 %v894_v48, %v3124_v50  ;;  %v2193_v29 = vrot.slane %v2023_v53, 1  ;;  %v725_v50 = vadd.f32 %v3190_v59, %v2882_v27  ;;  %v3228_v53 = vld [vmem:[%s2743_s9 + $0x18] sm:$0xff]  }
 0x181   : > { %v2190_v12 = vsel %vm2117_vm14, %v2189_v4, %v2188_v11  ;;  %v1806_v45 = vrot.slane %v3180_v39, 1  ;;  %v1807_v32 = vrot.slane %v3180_v39, 2  ;;  %v775_v25 = vmul.f32 %v3206_v19, %v714_v46 }
 0x182   : > { %v1051_v51 = vcombine.high %v955_v57, %v955_v57  ;;  %v1058_v15 = vrot.slane %v955_v57, %v2751_v33  ;;  %v2192_v60 = vsel %vm2120_vm15, %v2191_v31, %v2190_v12  ;;  %v762_v36 = vmul.f32 %v3206_v19, %v661_v24 }
 0x183   : > { %v2194_v42 = vsel %vm2123_vm2, %v2193_v29, %v2192_v60  ;;  %v814_v34 = vadd.f32 %v3161_v2, %v775_v25  ;;  %v653_v6 = vadd.f32 %v3190_v59, %v2888_v1  ;;  %v778_v13 = vmul.f32 %v3206_v19, %v725_v50 }
 0x184   : > { %v1065_v41 = vrot.slane %v1051_v51, %v2751_v33  ;;  %v1066_v55 = vcombine.high %v1058_v15, %v1058_v15  ;;  %v1432_v27 = vsel %vm1319_vm1, %v1058_v15, -inf  ;;  %2236 = vst.msk [vmem:[%s2975_s23 + $0x28] sm:$0xff] %vm918_vm0, %v2194_v42  ;;  %v801_v38 = vadd.f32 %v3161_v2, %v762_v36 }
 0x185   : > { %v1433_v5 = vrot.slane %v1432_v27, 4  ;;  %vm846_vm7 = vcmp.gt.f32.partialorder %v814_v34, 0.0  ;;  %v878_v58 = vmul.f32 0.2, %v814_v34  ;;  %v817_v1 = vadd.f32 %v3161_v2, %v778_v13 }
 0x186   : > { %v1067_v16 = vcombine.high %v1065_v41, %v1065_v41  ;;  %v1439_v17 = vsel %vm1319_vm1, %v1066_v55, -inf  ;;  %v1446_v61 = vsel %vm1319_vm1, %v1065_v41, -inf  ;;  %vm833_vm8 = vcmp.gt.f32.partialorder %v801_v38, 0.0 }
 0x187   : > { %v1434_v40 = vmax.f32 %v1432_v27, %v1433_v5  ;;  %v1440_v22 = vrot.slane %v1439_v17, 4  ;;  %v1447_v54 = vrot.slane %v1446_v61, 4  ;;  %v910_v9 = vsel %vm846_vm7, %v814_v34, %v878_v58 }
 0x188   : > { %v1453_v35 = vsel %vm1319_vm1, %v1067_v16, -inf  ;;  %v865_v52 = vmul.f32 0.2, %v801_v38  ;;  %vm849_vm12 = vcmp.gt.f32.partialorder %v817_v1, 0.0  ;;  %943 = vst.msk [vmem:[%s2820_s19 + $0xc0] sm:$0xff] %vm918_vm0, %v910_v9  ;;  %v963_v63 = vmax.f32 %v910_v9, %v3156_v30 }
 0x189   : > { %v1435_v26 = vrot.slane %v1434_v40, 2  ;;  %v1441_v56 = vmax.f32 %v1439_v17, %v1440_v22  ;;  %v1448_v14 = vmax.f32 %v1446_v61, %v1447_v54  ;;  %v1454_v44 = vrot.slane %v1453_v35, 4 }
 0x18a   : > { %v897_v23 = vsel %vm833_vm8, %v801_v38, %v865_v52  ;;  %v881_v48 = vmul.f32 0.2, %v817_v1  ;;  %v760_v11 = vmul.f32 %v3206_v19, %v653_v6  ;;  %v1808_v46 = vrot.slane %v3180_v39, 3 }
 0x18b   : > { %v1436_v7 = vmax.f32 %v1434_v40, %v1435_v26  ;;  %v1442_v49 = vrot.slane %v1441_v56, 2  ;;  %v1449_v10 = vrot.slane %v1448_v14, 2  ;;  %v1455_v62 = vmax.f32 %v1453_v35, %v1454_v44  ;;  %930 = vst.msk [vmem:[%s2820_s19 + $0x58] sm:$0xff] %vm918_vm0, %v897_v23 }
 0x18c   : > { %v1187_v24 = vcombine.high %v963_v63, %v963_v63  ;;  %v1194_v12 = vrot.slane %v963_v63, %v2751_v33  ;;  %v3236_v30 = vsel %vm849_vm12, %v817_v1, %v881_v48  ;;  %v3239_v60 = vunpack.c.l.bf16 %v3228_v53 }
 0x18d   : > { %v1437_v4 = vrot.slane %v1436_v7, 1  ;;  %v1443_v57 = vmax.f32 %v1441_v56, %v1442_v49  ;;  %v1450_v31 = vmax.f32 %v1448_v14, %v1449_v10  ;;  %v1456_v29 = vrot.slane %v1455_v62, 2  ;;  %946 = vst.msk [vmem:[%s2820_s19 + $0xd8] sm:$0xff] %vm918_vm0, %v3236_v30 }
 0x18e   : > { %v1201_v25 = vrot.slane %v1187_v24, %v2751_v33  ;;  %v1202_v42 = vcombine.high %v1194_v12, %v1194_v12  ;;  %v1656_v41 = vsel %vm1319_vm1, %v1194_v12, -inf  ;;  %v799_v55 = vadd.f32 %v3161_v2, %v760_v11 }
 0x18f   : > { %v1444_v51 = vrot.slane %v1443_v57, 1  ;;  %v1451_v15 = vrot.slane %v1450_v31, 1  ;;  %v1457_v50 = vmax.f32 %v1455_v62, %v1456_v29  ;;  %v1438_v27 = vmax.f32 %v1436_v7, %v1437_v4 }
 0x190   : > { %v1203_v6 = vcombine.high %v1201_v25, %v1201_v25  ;;  %v1657_v16 = vrot.slane %v1656_v41, 4  ;;  %v1663_v17 = vsel %vm1319_vm1, %v1202_v42, -inf  ;;  %v1670_v61 = vsel %vm1319_vm1, %v1201_v25, -inf }
 0x191   : > { %v1445_v5 = vmax.f32 %v1443_v57, %v1444_v51  ;;  %v1452_v34 = vmax.f32 %v1450_v31, %v1451_v15  ;;  %v1458_v36 = vrot.slane %v1457_v50, 1  ;;  %v1834_v54 = vrot.slane %v3239_v60, 1 }
 0x192   : > { %v1658_v35 = vmax.f32 %v1656_v41, %v1657_v16  ;;  %v1664_v58 = vrot.slane %v1663_v17, 4  ;;  %v1671_v38 = vrot.slane %v1670_v61, 4  ;;  %v1677_v1 = vsel %vm1319_vm1, %v1203_v6, -inf }
 0x193   : > { %v1459_v13 = vmax.f32 %v1457_v50, %v1458_v36  ;;  %v1929_v40 = vmul.f32 %v1806_v45, %v1445_v5  ;;  %v1930_v22 = vmul.f32 %v1807_v32, %v1452_v34  ;;  %v1928_v26 = vmul.f32 %v3180_v39, %v1438_v27 }
 0x194   : > { %v1678_v14 = vrot.slane %v1677_v1, 4  ;;  %vm831_vm3 = vcmp.gt.f32.partialorder %v799_v55, 0.0  ;;  %v1659_v44 = vrot.slane %v1658_v35, 2  ;;  %v1665_v9 = vmax.f32 %v1663_v17, %v1664_v58 }
 0x195   : > { %v1993_v56 = vmul.f32 1.1111112, %v1929_v40  ;;  %v1672_v52 = vmax.f32 %v1670_v61, %v1671_v38  ;;  %v863_v45 = vmul.f32 0.2, %v799_v55  ;;  %v1931_v7 = vmul.f32 %v1808_v46, %v1459_v13 }
 0x196   : > { %v1994_v49 = vmul.f32 1.1111112, %v1930_v22  ;;  %v1679_v32 = vmax.f32 %v1677_v1, %v1678_v14  ;;  %v1835_v10 = vrot.slane %v3239_v60, 2  ;;  %v1660_v62 = vmax.f32 %v1658_v35, %v1659_v44 }
 0x197   : > { %v1666_v63 = vrot.slane %v1665_v9, 2  ;;  %v1673_v48 = vrot.slane %v1672_v52, 2  ;;  %v895_v11 = vsel %vm831_vm3, %v799_v55, %v863_v45  ;;  %v1992_v4 = vmul.f32 1.1111112, %v1928_v26 }
 0x198   : > { %v1680_v57 = vrot.slane %v1679_v32, 2  ;;  %v1836_v31 = vrot.slane %v3239_v60, 3  ;;  %928 = vst.msk [vmem:[%s2820_s19 + $0x48] sm:$0xff] %vm918_vm0, %v895_v11  ;;  %v956_v29 = vmax.f32 %v895_v11, %v897_v23  ;;  %v2139_v24 = vrot.slane %v1993_v56, 7 }
 0x199   : > { %v1661_v12 = vrot.slane %v1660_v62, 1  ;;  %v1667_v51 = vmax.f32 %v1665_v9, %v1666_v63  ;;  %v1674_v15 = vmax.f32 %v1672_v52, %v1673_v48  ;;  %v3260_v46 = vmul.f32 1.1111112, %v1931_v7 }
 0x19a   : > { %v1681_v50 = vmax.f32 %v1679_v32, %v1680_v57  ;;  %v1068_v25 = vcombine.high %v956_v29, %v956_v29  ;;  %v1075_v42 = vrot.slane %v956_v29, %v2751_v33  ;;  %v2141_v41 = vrot.slane %v1994_v49, 6 }
 0x19b   : > { %v1662_v27 = vmax.f32 %v1660_v62, %v1661_v12  ;;  %v1668_v55 = vrot.slane %v1667_v51, 1  ;;  %v1675_v5 = vrot.slane %v1674_v15, 1  ;;  %v2140_v16 = vsel %vm2105_vm9, %v2139_v24, %v1992_v4 }
 0x19c   : > { %v1682_v34 = vrot.slane %v1681_v50, 1  ;;  %v1082_v36 = vrot.slane %v1068_v25, %v2751_v33  ;;  %v1083_v6 = vcombine.high %v1075_v42, %v1075_v42  ;;  %v1460_v23 = vsel %vm1319_vm1, %v1075_v42, -inf }
 0x19d   : > { %v1669_v17 = vmax.f32 %v1667_v51, %v1668_v55  ;;  %v1676_v61 = vmax.f32 %v1674_v15, %v1675_v5  ;;  %v1461_v13 = vrot.slane %v1460_v23, 4  ;;  %v1960_v38 = vmul.f32 %v3239_v60, %v1662_v27 }
 0x19e   : > { %v1683_v40 = vmax.f32 %v1681_v50, %v1682_v34  ;;  %v1084_v22 = vcombine.high %v1082_v36, %v1082_v36  ;;  %v1467_v35 = vsel %vm1319_vm1, %v1083_v6, -inf  ;;  %v1474_v58 = vsel %vm1319_vm1, %v1082_v36, -inf }
 0x19f   : > { %v1961_v1 = vmul.f32 %v1834_v54, %v1669_v17  ;;  %v1962_v26 = vmul.f32 %v1835_v10, %v1676_v61  ;;  %v1462_v56 = vmax.f32 %v1460_v23, %v1461_v13  ;;  %v1468_v44 = vrot.slane %v1467_v35, 4 }
 0x1a0   : > { %v1963_v14 = vmul.f32 %v1836_v31, %v1683_v40  ;;  %v1475_v9 = vrot.slane %v1474_v58, 4  ;;  %v1481_v52 = vsel %vm1319_vm1, %v1084_v22, -inf  ;;  %v2142_v62 = vsel %vm2108_vm10, %v2141_v41, %v2140_v16 }
 0x1a1   : > { %v2025_v45 = vmul.f32 1.1111112, %v1961_v1  ;;  %v2026_v7 = vmul.f32 1.1111112, %v1962_v26  ;;  %v1463_v49 = vrot.slane %v1462_v56, 2  ;;  %v1482_v32 = vrot.slane %v1481_v52, 4 }
 0x1a2   : > { %v2143_v63 = vrot.slane %v3260_v46, 5  ;;  %v1469_v48 = vmax.f32 %v1467_v35, %v1468_v44  ;;  %v1476_v11 = vmax.f32 %v1474_v58, %v1475_v9  ;;  %v3272_v4 = vmul.f32 1.1111112, %v1963_v14 }
 0x1a3   : > { %v2195_v54 = vrot.slane %v2025_v45, 7  ;;  %v1464_v10 = vmax.f32 %v1462_v56, %v1463_v49  ;;  %v1483_v57 = vmax.f32 %v1481_v52, %v1482_v32  ;;  %v2024_v31 = vmul.f32 1.1111112, %v1960_v38 }
 0x1a4   : > { %v1470_v29 = vrot.slane %v1469_v48, 2  ;;  %v1477_v24 = vrot.slane %v1476_v11, 2  ;;  %v1809_v12 = vrot.slane %v3180_v39, 4  ;;  %v2197_v51 = vrot.slane %v2026_v7, 6 }
 0x1a5   : > { %v1465_v15 = vrot.slane %v1464_v10, 1  ;;  %v1484_v50 = vrot.slane %v1483_v57, 2  ;;  %v1810_v25 = vrot.slane %v3180_v39, 5  ;;  %v2196_v42 = vsel %vm2105_vm9, %v2195_v54, %v2024_v31 }
 0x1a6   : > { %v1471_v46 = vmax.f32 %v1469_v48, %v1470_v29  ;;  %v1478_v41 = vmax.f32 %v1476_v11, %v1477_v24  ;;  %v717_v27 = vadd.f32 %v3190_v59, %v2890_v0  ;;  %v2199_v55 = vrot.slane %v3272_v4, 5 }
 0x1a7   : > { %v1466_v5 = vmax.f32 %v1464_v10, %v1465_v15  ;;  %v1485_v34 = vmax.f32 %v1483_v57, %v1484_v50  ;;  %v1811_v36 = vrot.slane %v3180_v39, 6  ;;  %v1812_v16 = vrot.slane %v3180_v39, 7 }
 0x1a8   : > { %v1472_v6 = vrot.slane %v1471_v46, 1  ;;  %v1479_v23 = vrot.slane %v1478_v41, 1  ;;  %v776_v17 = vmul.f32 %v3206_v19, %v717_v27  ;;  %v3284_v61 = vsel %vm2108_vm10, %v2197_v51, %v2196_v42 }
 0x1a9   : > { %v1486_v13 = vrot.slane %v1485_v34, 1  ;;  %v1932_v40 = vmul.f32 %v1809_v12, %v1466_v5  ;;  %v2144_v22 = vsel %vm2111_vm11, %v2143_v63, %v2142_v62  ;;  %v674_v38 = vadd.f32 %v3190_v59, %v2937_v21 }
 0x1aa   : > { %v1473_v0 = vmax.f32 %v1471_v46, %v1472_v6  ;;  %v1480_v35 = vmax.f32 %v1478_v41, %v1479_v23  ;;  %v815_v58 = vadd.f32 %v3161_v2, %v776_v17  ;;  %v738_v39 = vadd.f32 %v3190_v59, %v2945_v20 }
 0x1ab   : > { %v1487_v1 = vmax.f32 %v1485_v34, %v1486_v13  ;;  %v1996_v26 = vmul.f32 1.1111112, %v1932_v40  ;;  %v666_v56 = vadd.f32 %v3190_v59, %v2947_v8  ;;  %v765_v7 = vmul.f32 %v3206_v19, %v674_v38 }
 0x1ac   : > { %v1933_v14 = vmul.f32 %v1810_v25, %v1473_v0  ;;  %v1934_v44 = vmul.f32 %v1811_v36, %v1480_v35  ;;  %vm847_vm4 = vcmp.gt.f32.partialorder %v815_v58, 0.0  ;;  %v879_v9 = vmul.f32 0.2, %v815_v58 }
 0x1ad   : > { %v1935_v52 = vmul.f32 %v1812_v16, %v1487_v1  ;;  %v2145_v45 = vrot.slane %v1996_v26, 4  ;;  %v781_v49 = vmul.f32 %v3206_v19, %v738_v39  ;;  %v763_v63 = vmul.f32 %v3206_v19, %v666_v56 }
 0x1ae   : > { %v1997_v21 = vmul.f32 1.1111112, %v1933_v14  ;;  %v1998_v32 = vmul.f32 1.1111112, %v1934_v44  ;;  %v911_v62 = vsel %vm847_vm4, %v815_v58, %v879_v9  ;;  %v804_v11 = vadd.f32 %v3161_v2, %v765_v7 }
 0x1af   : > { %v1999_v20 = vmul.f32 1.1111112, %v1935_v52  ;;  %v2146_v48 = vsel %vm2114_vm13, %v2145_v45, %v2144_v22  ;;  %944 = vst.msk [vmem:[%s2820_s19 + $0xc8] sm:$0xff] %vm918_vm0, %v911_v62  ;;  %v964_v8 = vmax.f32 %v911_v62, %v3236_v30  ;;  %v820_v57 = vadd.f32 %v3161_v2, %v781_v49 }
 0x1b0   : > { %v2147_v54 = vrot.slane %v1997_v21, 3  ;;  %v2149_v10 = vrot.slane %v1998_v32, 2  ;;  %v802_v31 = vadd.f32 %v3161_v2, %v763_v63  ;;  %vm836_vm5 = vcmp.gt.f32.partialorder %v804_v11, 0.0 }
 0x1b1   : > { %v2151_v29 = vrot.slane %v1999_v20, 1  ;;  %v1204_v24 = vcombine.high %v964_v8, %v964_v8  ;;  %v1211_v12 = vrot.slane %v964_v8, %v2751_v33  ;;  %v868_v15 = vmul.f32 0.2, %v804_v11 }
 0x1b2   : > { %v2148_v51 = vsel %vm2117_vm14, %v2147_v54, %v2146_v48  ;;  %vm852_vm6 = vcmp.gt.f32.partialorder %v820_v57, 0.0  ;;  %v884_v30 = vmul.f32 0.2, %v820_v57  ;;  %vm834_vm7 = vcmp.gt.f32.partialorder %v802_v31, 0.0 }
 0x1b3   : > { %v2150_v50 = vsel %vm2120_vm15, %v2149_v10, %v2148_v51  ;;  %v1218_v25 = vrot.slane %v1204_v24, %v2751_v33  ;;  %v1219_v42 = vcombine.high %v1211_v12, %v1211_v12  ;;  %v1684_v46 = vsel %vm1319_vm1, %v1211_v12, -inf }
 0x1b4   : > { %v2152_v41 = vsel %vm2123_vm2, %v2151_v29, %v2150_v50  ;;  %v1685_v27 = vrot.slane %v1684_v46, 4  ;;  %v900_v5 = vsel %vm836_vm5, %v804_v11, %v868_v15  ;;  %v3310_v34 = vsel %vm852_vm6, %v820_v57, %v884_v30 }
 0x1b5   : > { %2233 = vst.msk [vmem:[%s2975_s23 + $0x10] sm:$0xff] %vm918_vm0, %v2152_v41  ;;  %v1220_v36 = vcombine.high %v1218_v25, %v1218_v25  ;;  %v1691_v6 = vsel %vm1319_vm1, %v1219_v42, -inf  ;;  %v1698_v23 = vsel %vm1319_vm1, %v1218_v25, -inf  ;;  %933 = vst.msk [vmem:[%s2820_s19 + $0x70] sm:$0xff] %vm918_vm0, %v900_v5  ;;  %v866_v40 = vmul.f32 0.2, %v802_v31 }
 0x1b6   : > { %949 = vst.msk [vmem:[%s2820_s19 + $0xf0] sm:$0xff] %vm918_vm0, %v3310_v34  ;;  %v1686_v16 = vmax.f32 %v1684_v46, %v1685_v27  ;;  %v1692_v17 = vrot.slane %v1691_v6, 4  ;;  %v1699_v13 = vrot.slane %v1698_v23, 4  ;;  %v1837_v0 = vrot.slane %v3239_v60, 4 }
 0x1b7   : > { %v1705_v22 = vsel %vm1319_vm1, %v1220_v36, -inf  ;;  %v3324_v35 = vunpack.c.h.bf16 %v3174_v18  ;;  %v730_v58 = vadd.f32 %v3190_v59, %v2965_v37  ;;  %v1838_v56 = vrot.slane %v3239_v60, 5 }
 0x1b8   : > { %v1687_v38 = vrot.slane %v1686_v16, 2  ;;  %v1693_v1 = vmax.f32 %v1691_v6, %v1692_v17  ;;  %v1700_v26 = vmax.f32 %v1698_v23, %v1699_v13  ;;  %v1706_v39 = vrot.slane %v1705_v22, 4 }
 0x1b9   : > { %v1839_v14 = vrot.slane %v3239_v60, 6  ;;  %v1840_v44 = vrot.slane %v3239_v60, 7  ;;  %v898_v9 = vsel %vm834_vm7, %v802_v31, %v866_v40  ;;  %v2200_v37 = vsel %vm2111_vm11, %v2199_v55, %v3284_v61 }
 0x1ba   : > { %v1688_v52 = vmax.f32 %v1686_v16, %v1687_v38  ;;  %v1694_v45 = vrot.slane %v1693_v1, 2  ;;  %v1701_v7 = vrot.slane %v1700_v26, 2  ;;  %v1707_v18 = vmax.f32 %v1705_v22, %v1706_v39  ;;  %931 = vst.msk [vmem:[%s2820_s19 + $0x60] sm:$0xff] %vm918_vm0, %v898_v9 }
 0x1bb   : > { %v957_v49 = vmax.f32 %v898_v9, %v900_v5  ;;  %v1813_v21 = vrot.slane %v3324_v35, 1  ;;  %v779_v32 = vmul.f32 %v3206_v19, %v730_v58  ;;  %v1814_v11 = vrot.slane %v3324_v35, 2 }
 0x1bc   : > { %v1689_v62 = vrot.slane %v1688_v52, 1  ;;  %v1695_v60 = vmax.f32 %v1693_v1, %v1694_v45  ;;  %v1702_v63 = vmax.f32 %v1700_v26, %v1701_v7  ;;  %v1708_v20 = vrot.slane %v1707_v18, 2 }
 0x1bd   : > { %v1085_v48 = vcombine.high %v957_v49, %v957_v49  ;;  %v1092_v8 = vrot.slane %v957_v49, %v2751_v33  ;;  %v818_v54 = vadd.f32 %v3161_v2, %v779_v32  ;;  %v677_v32 = vadd.f32 %v3190_v59, %v3016_v43 }
 0x1be   : > { %v1690_v10 = vmax.f32 %v1688_v52, %v1689_v62  ;;  %v1696_v4 = vrot.slane %v1695_v60, 1  ;;  %v1703_v57 = vrot.slane %v1702_v63, 1  ;;  %v1709_v55 = vmax.f32 %v1707_v18, %v1708_v20 }
 0x1bf   : > { %v1099_v61 = vrot.slane %v1085_v48, %v2751_v33  ;;  %v1100_v31 = vcombine.high %v1092_v8, %v1092_v8  ;;  %v1488_v29 = vsel %vm1319_vm1, %v1092_v8, -inf  ;;  %vm850_vm8 = vcmp.gt.f32.partialorder %v818_v54, 0.0 }
 0x1c0   : > { %v1697_v24 = vmax.f32 %v1695_v60, %v1696_v4  ;;  %v1704_v12 = vmax.f32 %v1702_v63, %v1703_v57  ;;  %v1710_v51 = vrot.slane %v1709_v55, 1  ;;  %v1964_v15 = vmul.f32 %v1837_v0, %v1690_v10 }
 0x1c1   : > { %v1101_v30 = vcombine.high %v1099_v61, %v1099_v61  ;;  %v1489_v50 = vrot.slane %v1488_v29, 4  ;;  %v1495_v25 = vsel %vm1319_vm1, %v1100_v31, -inf  ;;  %v1502_v42 = vsel %vm1319_vm1, %v1099_v61, -inf }
 0x1c2   : > { %v1711_v46 = vmax.f32 %v1709_v55, %v1710_v51  ;;  %v1965_v41 = vmul.f32 %v1838_v56, %v1697_v24  ;;  %v1966_v27 = vmul.f32 %v1839_v14, %v1704_v12  ;;  %v2028_v5 = vmul.f32 1.1111112, %v1964_v15 }
 0x1c3   : > { %v1490_v36 = vmax.f32 %v1488_v29, %v1489_v50  ;;  %v1496_v6 = vrot.slane %v1495_v25, 4  ;;  %v1503_v23 = vrot.slane %v1502_v42, 4  ;;  %v1509_v16 = vsel %vm1319_vm1, %v1101_v30, -inf }
 0x1c4   : > { %v1967_v17 = vmul.f32 %v1840_v44, %v1711_v46  ;;  %v2029_v13 = vmul.f32 1.1111112, %v1965_v41  ;;  %v2030_v40 = vmul.f32 1.1111112, %v1966_v27  ;;  %v2201_v22 = vrot.slane %v2028_v5, 4 }
 0x1c5   : > { %v1491_v0 = vrot.slane %v1490_v36, 2  ;;  %v1497_v58 = vmax.f32 %v1495_v25, %v1496_v6  ;;  %v1504_v38 = vmax.f32 %v1502_v42, %v1503_v23  ;;  %v1510_v1 = vrot.slane %v1509_v16, 4 }
 0x1c6   : > { %v2031_v26 = vmul.f32 1.1111112, %v1967_v17  ;;  %v2202_v39 = vsel %vm2114_vm13, %v2201_v22, %v2200_v37  ;;  %v2203_v9 = vrot.slane %v2029_v13, 3  ;;  %v2205_v56 = vrot.slane %v2030_v40, 2 }
 0x1c7   : > { %v1492_v14 = vmax.f32 %v1490_v36, %v1491_v0  ;;  %v1498_v52 = vrot.slane %v1497_v58, 2  ;;  %v1505_v45 = vrot.slane %v1504_v38, 2  ;;  %v1511_v7 = vmax.f32 %v1509_v16, %v1510_v1 }
 0x1c8   : > { %v2204_v18 = vsel %vm2117_vm14, %v2203_v9, %v2202_v39  ;;  %v2207_v44 = vrot.slane %v2031_v26, 1  ;;  %v882_v49 = vmul.f32 0.2, %v818_v54  ;;  %v766_v10 = vmul.f32 %v3206_v19, %v677_v32 }
 0x1c9   : > { %v2206_v62 = vsel %vm2120_vm15, %v2205_v56, %v2204_v18  ;;  %v1493_v60 = vrot.slane %v1492_v14, 1  ;;  %v1499_v63 = vmax.f32 %v1497_v58, %v1498_v52  ;;  %v1506_v37 = vmax.f32 %v1504_v38, %v1505_v45 }
 0x1ca   : > { %v2208_v20 = vsel %vm2123_vm2, %v2207_v44, %v2206_v62  ;;  %v1512_v48 = vrot.slane %v1511_v7, 2  ;;  %v914_v8 = vsel %vm850_vm8, %v818_v54, %v882_v49  ;;  %v1815_v31 = vrot.slane %v3324_v35, 3 }
 0x1cb   : > { %2237 = vst.msk [vmem:[%s2975_s23 + $0x30] sm:$0xff] %vm918_vm0, %v2208_v20  ;;  %v1494_v4 = vmax.f32 %v1492_v14, %v1493_v60  ;;  %v1500_v57 = vrot.slane %v1499_v63, 1  ;;  %v1507_v55 = vrot.slane %v1506_v37, 1  ;;  %947 = vst.msk [vmem:[%s2820_s19 + $0xe0] sm:$0xff] %vm918_vm0, %v914_v8  ;;  %v965_v43 = vmax.f32 %v914_v8, %v3310_v34 }
 0x1cc   : > { %v1513_v61 = vmax.f32 %v1511_v7, %v1512_v48  ;;  %v3363_v29 = vunpack.c.h.bf16 %v3228_v53  ;;  %v805_v24 = vadd.f32 %v3161_v2, %v766_v10  ;;  %v741_v15 = vadd.f32 %v3190_v59, %v3033_v28 }
 0x1cd   : > { %v1501_v54 = vmax.f32 %v1499_v63, %v1500_v57  ;;  %v1508_v12 = vmax.f32 %v1506_v37, %v1507_v55  ;;  %v1221_v51 = vcombine.high %v965_v43, %v965_v43  ;;  %v1228_v50 = vrot.slane %v965_v43, %v2751_v33 }
 0x1ce   : > { %v1514_v30 = vrot.slane %v1513_v61, 1  ;;  %vm837_vm12 = vcmp.gt.f32.partialorder %v805_v24, 0.0  ;;  %v869_v34 = vmul.f32 0.2, %v805_v24  ;;  %v1936_v25 = vmul.f32 %v3324_v35, %v1494_v4 }
 0x1cf   : > { %v1937_v53 = vmul.f32 %v1813_v21, %v1501_v54  ;;  %v1938_v42 = vmul.f32 %v1814_v11, %v1508_v12  ;;  %v1235_v46 = vrot.slane %v1221_v51, %v2751_v33  ;;  %v1236_v27 = vcombine.high %v1228_v50, %v1228_v50 }
 0x1d0   : > { %v1515_v41 = vmax.f32 %v1513_v61, %v1514_v30  ;;  %v1712_v28 = vsel %vm1319_vm1, %v1228_v50, -inf  ;;  %v901_v5 = vsel %vm837_vm12, %v805_v24, %v869_v34  ;;  %v782_v11 = vmul.f32 %v3206_v19, %v741_v15 }
 0x1d1   : > { %v2001_v36 = vmul.f32 1.1111112, %v1937_v53  ;;  %v2002_v6 = vmul.f32 1.1111112, %v1938_v42  ;;  %v1237_v23 = vcombine.high %v1235_v46, %v1235_v46  ;;  %v1713_v16 = vrot.slane %v1712_v28, 4  ;;  %934 = vst.msk [vmem:[%s2820_s19 + $0x78] sm:$0xff] %vm918_vm0, %v901_v5 }
 0x1d2   : > { %v1939_v17 = vmul.f32 %v1815_v31, %v1515_v41  ;;  %v1719_v13 = vsel %vm1319_vm1, %v1236_v27, -inf  ;;  %v1726_v21 = vsel %vm1319_vm1, %v1235_v46, -inf  ;;  %v669_v58 = vadd.f32 %v3190_v59, %v3054_v3 }
 0x1d3   : > { %v2153_v40 = vrot.slane %v2001_v36, 7  ;;  %v1714_v22 = vmax.f32 %v1712_v28, %v1713_v16  ;;  %v1720_v0 = vrot.slane %v1719_v13, 4  ;;  %v2000_v38 = vmul.f32 1.1111112, %v1936_v25 }
 0x1d4   : > { %v1727_v1 = vrot.slane %v1726_v21, 4  ;;  %v1733_v26 = vsel %vm1319_vm1, %v1237_v23, -inf  ;;  %v821_v39 = vadd.f32 %v3161_v2, %v782_v11  ;;  %v2155_v9 = vrot.slane %v2002_v6, 6 }
 0x1d5   : > { %v1715_v56 = vrot.slane %v1714_v22, 2  ;;  %v1721_v14 = vmax.f32 %v1719_v13, %v1720_v0  ;;  %v1734_v52 = vrot.slane %v1733_v26, 4  ;;  %v2003_v45 = vmul.f32 1.1111112, %v1939_v17 }
 0x1d6   : > { %v2154_v7 = vsel %vm2105_vm9, %v2153_v40, %v2000_v38  ;;  %v1728_v18 = vmax.f32 %v1726_v21, %v1727_v1  ;;  %vm853_vm3 = vcmp.gt.f32.partialorder %v821_v39, 0.0  ;;  %v885_v3 = vmul.f32 0.2, %v821_v39 }
 0x1d7   : > { %v1716_v44 = vmax.f32 %v1714_v22, %v1715_v56  ;;  %v1722_v49 = vrot.slane %v1721_v14, 2  ;;  %v1735_v32 = vmax.f32 %v1733_v26, %v1734_v52  ;;  %v1841_v60 = vrot.slane %v3363_v29, 1 }
 0x1d8   : > { %v1729_v62 = vrot.slane %v1728_v18, 2  ;;  %v1842_v63 = vrot.slane %v3363_v29, 2  ;;  %v764_v37 = vmul.f32 %v3206_v19, %v669_v58  ;;  %v917_v10 = vsel %vm853_vm3, %v821_v39, %v885_v3 }
 0x1d9   : > { %v1717_v20 = vrot.slane %v1716_v44, 1  ;;  %v1723_v48 = vmax.f32 %v1721_v14, %v1722_v49  ;;  %v1736_v8 = vrot.slane %v1735_v32, 2  ;;  %v2156_v4 = vsel %vm2108_vm10, %v2155_v9, %v2154_v7  ;;  %950 = vst.msk [vmem:[%s2820_s19 + $0xf8] sm:$0xff] %vm918_vm0, %v917_v10 }
 0x1da   : > { %v1730_v57 = vmax.f32 %v1728_v18, %v1729_v62  ;;  %v1843_v55 = vrot.slane %v3363_v29, 3  ;;  %v803_v43 = vadd.f32 %v3161_v2, %v764_v37  ;;  %v2157_v61 = vrot.slane %v2003_v45, 5 }
 0x1db   : > { %v1718_v31 = vmax.f32 %v1716_v44, %v1717_v20  ;;  %v1724_v24 = vrot.slane %v1723_v48, 1  ;;  %v1737_v54 = vmax.f32 %v1735_v32, %v1736_v8  ;;  %v733_v15 = vadd.f32 %v3190_v59, %v3061_v47 }
 0x1dc   : > { %v1731_v12 = vrot.slane %v1730_v57, 1  ;;  %vm835_vm4 = vcmp.gt.f32.partialorder %v803_v43, 0.0  ;;  %v867_v51 = vmul.f32 0.2, %v803_v43  ;;  %v1816_v34 = vrot.slane %v3324_v35, 4 }
 0x1dd   : > { %v1725_v30 = vmax.f32 %v1723_v48, %v1724_v24  ;;  %v1738_v50 = vrot.slane %v1737_v54, 1  ;;  %v1817_v25 = vrot.slane %v3324_v35, 5  ;;  %v1818_v46 = vrot.slane %v3324_v35, 6 }
 0x1de   : > { %v1732_v53 = vmax.f32 %v1730_v57, %v1731_v12  ;;  %v899_v42 = vsel %vm835_vm4, %v803_v43, %v867_v51  ;;  %v780_v41 = vmul.f32 %v3206_v19, %v733_v15  ;;  %v1819_v6 = vrot.slane %v3324_v35, 7 }
 0x1df   : > { %v1739_v27 = vmax.f32 %v1737_v54, %v1738_v50  ;;  %v1969_v28 = vmul.f32 %v1841_v60, %v1725_v30  ;;  %932 = vst.msk [vmem:[%s2820_s19 + $0x68] sm:$0xff] %vm918_vm0, %v899_v42  ;;  %v958_v36 = vmax.f32 %v899_v42, %v901_v5  ;;  %v1968_v47 = vmul.f32 %v3363_v29, %v1718_v31 }
 0x1e0   : > { %v1970_v59 = vmul.f32 %v1842_v63, %v1732_v53  ;;  %v3405_v23 = vsel %vm2111_vm11, %v2157_v61, %v2156_v4  ;;  %v819_v16 = vadd.f32 %v3161_v2, %v780_v41  ;;  %v1844_v5 = vrot.slane %v3363_v29, 4 }
 0x1e1   : > { %v1971_v17 = vmul.f32 %v1843_v55, %v1739_v27  ;;  %v2033_v13 = vmul.f32 1.1111112, %v1969_v28  ;;  %v1102_v21 = vcombine.high %v958_v36, %v958_v36  ;;  %v1109_v19 = vrot.slane %v958_v36, %v2751_v33 }
 0x1e2   : > { %v2034_v11 = vmul.f32 1.1111112, %v1970_v59  ;;  %vm851_vm5 = vcmp.gt.f32.partialorder %v819_v16, 0.0  ;;  %v883_v40 = vmul.f32 0.2, %v819_v16  ;;  %v1845_v38 = vrot.slane %v3363_v29, 5 }
 0x1e3   : > { %v2209_v22 = vrot.slane %v2033_v13, 7  ;;  %v1116_v0 = vrot.slane %v1102_v21, %v2751_v33  ;;  %v1117_v58 = vcombine.high %v1109_v19, %v1109_v19  ;;  %v2032_v1 = vmul.f32 1.1111112, %v1968_v47 }
 0x1e4   : > { %v3412_v26 = vmul.f32 1.1111112, %v1971_v17  ;;  %v1516_v2 = vsel %vm1319_vm1, %v1109_v19, -inf  ;;  %v915_v39 = vsel %vm851_vm5, %v819_v16, %v883_v40  ;;  %v2211_v9 = vrot.slane %v2034_v11, 6 }
 0x1e5   : > { %v1118_v56 = vcombine.high %v1116_v0, %v1116_v0  ;;  %v1517_v14 = vrot.slane %v1516_v2, 4  ;;  %948 = vst.msk [vmem:[%s2820_s19 + $0xe8] sm:$0xff] %vm918_vm0, %v915_v39  ;;  %v1846_v52 = vrot.slane %v3363_v29, 6  ;;  %v2210_v45 = vsel %vm2105_vm9, %v2209_v22, %v2032_v1 }
 0x1e6   : > { %v1523_v7 = vsel %vm1319_vm1, %v1117_v58, -inf  ;;  %v1530_v18 = vsel %vm1319_vm1, %v1116_v0, -inf  ;;  %v966_v44 = vmax.f32 %v915_v39, %v917_v10  ;;  %v2213_v60 = vrot.slane %v3412_v26, 5 }
 0x1e7   : > { %v1518_v49 = vmax.f32 %v1516_v2, %v1517_v14  ;;  %v1524_v32 = vrot.slane %v1523_v7, 4  ;;  %v1531_v3 = vrot.slane %v1530_v18, 4  ;;  %v1537_v62 = vsel %vm1319_vm1, %v1118_v56, -inf }
 0x1e8   : > { %v1538_v63 = vrot.slane %v1537_v62, 4  ;;  %v1238_v37 = vcombine.high %v966_v44, %v966_v44  ;;  %v1245_v20 = vrot.slane %v966_v44, %v2751_v33  ;;  %v3425_v48 = vsel %vm2108_vm10, %v2211_v9, %v2210_v45 }
 0x1e9   : > { %v1519_v8 = vrot.slane %v1518_v49, 2  ;;  %v1525_v4 = vmax.f32 %v1523_v7, %v1524_v32  ;;  %v1532_v57 = vmax.f32 %v1530_v18, %v1531_v3 }
 0x1ea   : > { %v1539_v55 = vmax.f32 %v1537_v62, %v1538_v63  ;;  %v1252_v10 = vrot.slane %v1238_v37, %v2751_v33  ;;  %v1253_v43 = vcombine.high %v1245_v20, %v1245_v20  ;;  %v1740_v61 = vsel %vm1319_vm1, %v1245_v20, -inf }
 0x1eb   : > { %v1520_v31 = vmax.f32 %v1518_v49, %v1519_v8  ;;  %v1526_v24 = vrot.slane %v1525_v4, 2  ;;  %v1533_v54 = vrot.slane %v1532_v57, 2  ;;  %v1741_v12 = vrot.slane %v1740_v61, 4 }
 0x1ec   : > { %v1540_v51 = vrot.slane %v1539_v55, 2  ;;  %v1254_v15 = vcombine.high %v1252_v10, %v1252_v10  ;;  %v1747_v30 = vsel %vm1319_vm1, %v1253_v43, -inf  ;;  %v1754_v50 = vsel %vm1319_vm1, %v1252_v10, -inf }
 0x1ed   : > { %v1521_v53 = vrot.slane %v1520_v31, 1  ;;  %v1527_v42 = vmax.f32 %v1525_v4, %v1526_v24  ;;  %v1534_v41 = vmax.f32 %v1532_v57, %v1533_v54  ;;  %v1742_v27 = vmax.f32 %v1740_v61, %v1741_v12 }
 0x1ee   : > { %v1541_v28 = vmax.f32 %v1539_v55, %v1540_v51  ;;  %v1748_v36 = vrot.slane %v1747_v30, 4  ;;  %v1755_v33 = vrot.slane %v1754_v50, 4  ;;  %v1761_v47 = vsel %vm1319_vm1, %v1254_v15, -inf }
 0x1ef   : > { %v1522_v59 = vmax.f32 %v1520_v31, %v1521_v53  ;;  %v1528_v16 = vrot.slane %v1527_v42, 1  ;;  %v1535_v17 = vrot.slane %v1534_v41, 1  ;;  %v1743_v13 = vrot.slane %v1742_v27, 2 }
 0x1f0   : > { %v1542_v21 = vrot.slane %v1541_v28, 1  ;;  %v1749_v19 = vmax.f32 %v1747_v30, %v1748_v36  ;;  %v1756_v11 = vmax.f32 %v1754_v50, %v1755_v33  ;;  %v1762_v40 = vrot.slane %v1761_v47, 4 }
 0x1f1   : > { %v1529_v22 = vmax.f32 %v1527_v42, %v1528_v16  ;;  %v1536_v0 = vmax.f32 %v1534_v41, %v1535_v17  ;;  %v1940_v58 = vmul.f32 %v1816_v34, %v1522_v59  ;;  %v1744_v1 = vmax.f32 %v1742_v27, %v1743_v13 }
 0x1f2   : > { %v1543_v2 = vmax.f32 %v1541_v28, %v1542_v21  ;;  %v1750_v39 = vrot.slane %v1749_v19, 2  ;;  %v1757_v9 = vrot.slane %v1756_v11, 2  ;;  %v1763_v56 = vmax.f32 %v1761_v47, %v1762_v40 }
 0x1f3   : > { %v1941_v14 = vmul.f32 %v1817_v25, %v1529_v22  ;;  %v1942_v45 = vmul.f32 %v1818_v46, %v1536_v0  ;;  %v2004_v7 = vmul.f32 1.1111112, %v1940_v58  ;;  %v1745_v18 = vrot.slane %v1744_v1, 1 }
 0x1f4   : > { %v1943_v44 = vmul.f32 %v1819_v6, %v1543_v2  ;;  %v1751_v49 = vmax.f32 %v1749_v19, %v1750_v39  ;;  %v1758_v32 = vmax.f32 %v1756_v11, %v1757_v9  ;;  %v1764_v3 = vrot.slane %v1763_v56, 2 }
 0x1f5   : > { %v2005_v34 = vmul.f32 1.1111112, %v1941_v14  ;;  %v2006_v62 = vmul.f32 1.1111112, %v1942_v45  ;;  %v2159_v63 = vrot.slane %v2004_v7, 4  ;;  %v1746_v37 = vmax.f32 %v1744_v1, %v1745_v18 }
 0x1f6   : > { %v2007_v20 = vmul.f32 1.1111112, %v1943_v44  ;;  %v1752_v8 = vrot.slane %v1751_v49, 1  ;;  %v1759_v4 = vrot.slane %v1758_v32, 1  ;;  %v1765_v57 = vmax.f32 %v1763_v56, %v1764_v3 }
 0x1f7   : > { %v2160_v25 = vsel %vm2114_vm13, %v2159_v63, %v3405_v23  ;;  %v2161_v46 = vrot.slane %v2005_v34, 3  ;;  %v1847_v55 = vrot.slane %v3363_v29, 7  ;;  %v1972_v35 = vmul.f32 %v1844_v5, %v1746_v37 }
 0x1f8   : > { %v2163_v6 = vrot.slane %v2006_v62, 2  ;;  %v1753_v10 = vmax.f32 %v1751_v49, %v1752_v8  ;;  %v1760_v43 = vmax.f32 %v1758_v32, %v1759_v4  ;;  %v1766_v61 = vrot.slane %v1765_v57, 1 }
 0x1f9   : > { %v2162_v31 = vsel %vm2117_vm14, %v2161_v46, %v2160_v25  ;;  %v2165_v24 = vrot.slane %v2007_v20, 1  ;;  %v2036_v54 = vmul.f32 1.1111112, %v1972_v35  ;;  %v2214_v23 = vsel %vm2111_vm11, %v2213_v60, %v3425_v48 }
 0x1fa   : > { %v2164_v12 = vsel %vm2120_vm15, %v2163_v6, %v2162_v31  ;;  %v1767_v51 = vmax.f32 %v1765_v57, %v1766_v61  ;;  %v1973_v15 = vmul.f32 %v1845_v38, %v1753_v10  ;;  %v1974_v5 = vmul.f32 %v1846_v52, %v1760_v43 }
 0x1fb   : > { %v2166_v30 = vsel %vm2123_vm2, %v2165_v24, %v2164_v12  ;;  %v2215_v50 = vrot.slane %v2036_v54, 4 }
 0x1fc   : > { %2234 = vst.msk [vmem:[%s2975_s23 + $0x18] sm:$0xff] %vm918_vm0, %v2166_v30  ;;  %v1975_v53 = vmul.f32 %v1847_v55, %v1767_v51  ;;  %v2037_v42 = vmul.f32 1.1111112, %v1973_v15  ;;  %v2038_v26 = vmul.f32 1.1111112, %v1974_v5 }
 0x1fd   : > { %v2216_v60 = vsel %vm2114_vm13, %v2215_v50, %v2214_v23 }
 0x1fe   : > { %v2039_v48 = vmul.f32 1.1111112, %v1975_v53  ;;  %v2217_v41 = vrot.slane %v2037_v42, 3  ;;  %v2219_v27 = vrot.slane %v2038_v26, 2 }
 0x200   : > { %v2218_v28 = vsel %vm2117_vm14, %v2217_v41, %v2216_v60  ;;  %v2221_v38 = vrot.slane %v2039_v48, 1 }
 0x201   : > { %v2220_v29 = vsel %vm2120_vm15, %v2219_v27, %v2218_v28 }
 0x202   : > { %v2222_v52 = vsel %vm2123_vm2, %v2221_v38, %v2220_v29 }
 0x203   : > { %2238 = vst.msk [vmem:[%s2975_s23 + $0x38] sm:$0xff] %vm918_vm0, %v2222_v52 }
 0x204 PF: > { %s18_s26 = sadd.s32 1, %s2630_s26   ;;  %s3501_s24 = smov %s2626_s25 }
 0x205   : > { %p15_p5 = scmp.ge.s32.totalorder %s18_s26, 4   ;;  %s3502_s25 = smov %s3504_s27 }
 0x207   :  { %17 = sbr.rel (!%p15_p5) target bundleno = 2 (0x2), region = 89 }

</bundles_post_ra>
